<compile_context>
chip_gen: v7x
topology: tpu7x:2x2x1
jax: 0.10.0
libtpu: 0.0.40
codegen_flags: <defaults>
</compile_context>

<pallas_src>
import functools

import jax
import jax.numpy as jnp
from jax import lax
from jax.experimental import pallas as pl
from jax.experimental.pallas import tpu as pltpu


def _round_up(v, m):
    return ((v + m - 1) // m) * m


def _full_spec(a):
    nd = a.ndim
    return pl.BlockSpec(a.shape, lambda n: (0,) * nd)


def _choose_nb(N, H, Ho, max_rows=512):
    """Largest divisor of N giving sublane-aligned (Nb*H, Nb*Ho) blocks, capped."""
    cands = [nb for nb in range(1, N + 1)
             if N % nb == 0 and (nb == N or ((nb * H) % 8 == 0 and (nb * Ho) % 8 == 0))]
    small = [nb for nb in cands if nb * H <= max_rows]
    return max(small) if small else min(cands)


# -----------------------------------------------------------------------------
# Fused lane-packed kernel (rows = Nb*H, lanes = W*C), any stride.
# -----------------------------------------------------------------------------
def _mbconv_packed_kernel(*refs, Nb, H, W, Cexp, K, S, Ho, Wo, PT, PL,
                          Wout_pad, WCin, has_skip, expand):
    if expand:
        (x_ref, webig_ref, bexp_ref, wdw_ref, bdw_ref, wse1_ref, bse1_ref,
         wse2_ref, bse2_ref, wpbig_ref, bproj_ref,
         o_ref, xpad_ref, gacc_ref) = refs
    else:
        (x_ref, wdw_ref, bdw_ref, wse1_ref, bse1_ref,
         wse2_ref, bse2_ref, wpbig_ref, bproj_ref,
         o_ref, xpad_ref, gacc_ref) = refs

    p = K // 2
    bf16 = jnp.bfloat16

    # Zero the padded-halo scratch once; only the interior is rewritten per image,
    # so the zero border persists across grid steps (grid axis is sequential).
    @pl.when(pl.program_id(0) == 0)
    def _():
        xpad_ref[...] = jnp.zeros_like(xpad_ref)

    x2d = x_ref[...]                                         # (Nb*H, W*Cin), f32

    # -- 1) expansion 1x1 conv (+ folded BN) + SiLU : one bf16 MXU matmul -------
    if expand:
        e = jnp.dot(x2d.astype(bf16), webig_ref[...],
                    preferred_element_type=jnp.float32) + bexp_ref[...]
        e = e * jax.nn.sigmoid(e)
    else:
        e = x2d                                              # Cexp == Cin

    # -- 2/3) per-image depthwise KxK + squeeze-excite, all in VMEM -------------
    for b in range(Nb):                                      # static, small
        e_b = e[b * H:(b + 1) * H]                           # sublane-aligned slice
        # tile-aligned interior store (PT % 8 == 0, PL % 128 == 0) -> unmasked vst
        xpad_ref[pl.ds(PT, H), pl.ds(PL, W * Cexp)] = e_b

        acc = jnp.zeros((H, W * Cexp), jnp.float32)
        for kw in range(K):                                  # K lane-offset ref reads
            c0 = PL + (kw - p) * Cexp
            col = xpad_ref[:, pl.ds(c0, W * Cexp)]
            for kh in range(K):                              # cheap sublane slices
                r0 = PT - p + kh
                acc = acc + col[r0:r0 + H, :] * wdw_ref[kh * K + kw, :]
        if S > 1:                                            # stride row subsample
            acc = acc[0:(Ho - 1) * S + 1:S]
        y = acc + bdw_ref[...]
        y = y * jax.nn.sigmoid(y)                            # (Ho, W*Cexp)

        # squeeze-excite: pooling matrix / stride selection / 1/(Ho*Wo) folded
        # into wse1; gate is produced already lane-packed (no spread matmul).
        colsum = jnp.sum(y, axis=0, keepdims=True)           # (1, W*Cexp)
        s1 = jnp.dot(colsum.astype(bf16), wse1_ref[...],
                     preferred_element_type=jnp.float32) + bse1_ref[...]
        s1 = s1 * jax.nn.sigmoid(s1)
        s2 = jnp.dot(s1.astype(bf16), wse2_ref[...],
                     preferred_element_type=jnp.float32) + bse2_ref[...]
        gate = jax.nn.sigmoid(s2)                            # (1, W*Cexp)
        gacc_ref[pl.ds(b * Ho, Ho), :] = y * gate

    gated = gacc_ref[...]                                    # (Nb*Ho, W*Cexp)

    # -- 4) projection 1x1 (+ folded BN, stride col-selection folded) + residual -
    out = jnp.dot(gated.astype(bf16), wpbig_ref[...],
                  preferred_element_type=jnp.float32) + bproj_ref[...]
    if has_skip:
        if Wout_pad == WCin:
            out = out + x2d                                  # residual: resident input
        else:
            out = out + jnp.pad(x2d, ((0, 0), (0, Wout_pad - WCin)))
    o_ref[...] = out.astype(o_ref.dtype)                     # dense lane-packed store


# -----------------------------------------------------------------------------
# Fused fallback kernel (very wide W*C / Cexp >= 128), pixel-rows x channel-lanes.
# -----------------------------------------------------------------------------
def _mbconv_px_kernel(x_ref, we_ref, be_ref, wdw_ref, bdw_ref,
                      wse1_ref, bse1_ref, wse2_ref, bse2_ref,
                      wp_ref, bp_ref, o_ref, xpad_ref,
                      *, H, W, Cexp, K, S, Ho, Wo, PW, has_skip, expand):
    p = K // 2
    bf16 = jnp.bfloat16
    x_pix = x_ref[0]                                         # (H*W, Cin), f32

    if expand:
        e = jnp.dot(x_pix.astype(bf16), we_ref[...],
                    preferred_element_type=jnp.float32) + be_ref[...]
        e = e * jax.nn.sigmoid(e)
    else:
        e = x_pix

    xpad_ref[...] = jnp.zeros_like(xpad_ref)
    xpad_ref[pl.ds(p, H), pl.ds(PW, W), :] = e.reshape(H, W, Cexp)
    xpad = xpad_ref[...]

    acc = jnp.zeros((Ho, Wo, Cexp), jnp.float32)
    for kh in range(K):
        for kw in range(K):
            c0 = PW - p + kw
            tap = lax.slice(xpad, (kh, c0, 0),
                            (kh + (Ho - 1) * S + 1, c0 + (Wo - 1) * S + 1, Cexp),
                            (S, S, 1))
            acc = acc + tap * wdw_ref[kh * K + kw, :]
    y = acc + bdw_ref[...]
    y = y * jax.nn.sigmoid(y)

    ypix = y.reshape(Ho * Wo, Cexp)
    pooled = jnp.sum(ypix, axis=0, keepdims=True) * (1.0 / (Ho * Wo))
    s1 = jnp.dot(pooled.astype(bf16), wse1_ref[...],
                 preferred_element_type=jnp.float32) + bse1_ref[...]
    s1 = s1 * jax.nn.sigmoid(s1)
    s2 = jnp.dot(s1.astype(bf16), wse2_ref[...],
                 preferred_element_type=jnp.float32) + bse2_ref[...]
    gate = jax.nn.sigmoid(s2)

    out = jnp.dot((ypix * gate).astype(bf16), wp_ref[...],
                  preferred_element_type=jnp.float32) + bp_ref[...]
    if has_skip:
        out = out + x_pix
    o_ref[0] = out.astype(o_ref.dtype)


# ------------------------------ weight packing ---------------------------------
def _pack_packed_weights(params, *, W, K, S, Ho, Wo, Wout_pad, expand):
    """One-time packing of the folded-BN weights into lane-packed kron/tile form.

    In a real block stack this is computed once per config and cached; only the
    per-call activation layout transform remains on the forward path.
    """
    f32, bf16 = jnp.float32, jnp.bfloat16
    Cexp = params["w_dw"].shape[-1]
    Cout = params["w_proj"].shape[-1]

    pk = {}
    if expand:
        pk["webig"] = jnp.kron(jnp.eye(W, dtype=f32),
                               params["w_exp"] * params["s_exp"]).astype(bf16)
        pk["bexp"] = jnp.tile(params["b_exp"], (1, W)).astype(f32)
    pk["wdw"] = jnp.tile((params["w_dw"] * params["s_dw"]).reshape(K * K, Cexp),
                         (1, W)).astype(f32)                 # VPU taps stay f32
    pk["bdw"] = jnp.tile(params["b_dw"], (1, W)).astype(f32)

    # SE: fold pooling sum, stride column selection and 1/(Ho*Wo) into FC1.
    colmask = jnp.zeros((W, 1), f32).at[S * jnp.arange(Wo), 0].set(1.0)
    pk["wse1"] = (jnp.kron(colmask, params["w_se1"]) / float(Ho * Wo)).astype(bf16)
    pk["bse1"] = params["b_se1"].astype(f32)
    pk["wse2"] = jnp.tile(params["w_se2"], (1, W)).astype(bf16)
    pk["bse2"] = jnp.tile(params["b_se2"], (1, W)).astype(f32)

    # Projection: stride column selection folded in; output lanes padded to a
    # multiple of 128 so the final store is always dense (unmasked).
    sel = jnp.zeros((W, Wo), f32).at[S * jnp.arange(Wo), jnp.arange(Wo)].set(1.0)
    wpbig = jnp.kron(sel, params["w_proj"] * params["s_proj"])
    bproj = jnp.tile(params["b_proj"], (1, Wo))
    Wout = Wo * Cout
    if Wout_pad != Wout:
        wpbig = jnp.pad(wpbig, ((0, 0), (0, Wout_pad - Wout)))
        bproj = jnp.pad(bproj, ((0, 0), (0, Wout_pad - Wout)))
    pk["wpbig"] = wpbig.astype(bf16)
    pk["bproj"] = bproj.astype(f32)
    return pk


# ------------------------------- forward wrapper --------------------------------
def mbconv_forward(x_nchw, params, *, kernel_size, stride, expand_ratio,
                   packed_lane_limit=2048):
    N, Cin, H, W = x_nchw.shape
    K, S = int(kernel_size), int(stride)
    p = K // 2
    Ho = (H + 2 * p - K) // S + 1
    Wo = (W + 2 * p - K) // S + 1
    expand = expand_ratio != 1
    Cexp = params["w_dw"].shape[-1]
    Cout = params["w_proj"].shape[-1]
    has_skip = (S == 1) and (Cin == Cout)
    if not expand:
        assert Cexp == Cin, "expand_ratio == 1 requires expanded channels == Cin"

    f32 = jnp.float32
    # TODO(synk): keep activations NHWC across a block stack so this transpose
    # (one HBM pass) disappears; NCHW retained to match the PyTorch interface.
    x_nhwc = jnp.transpose(x_nchw, (0, 2, 3, 1)).astype(f32)

    Wout = Wo * Cout
    Wout_pad = _round_up(Wout, 128)
    use_packed = (W * Cexp <= packed_lane_limit
                  and Wout_pad <= packed_lane_limit
                  and Cexp < 128)   # kron trick wastes MXU once C reaches MXU width

    if use_packed:
        # --- lane-packed fused path (any stride) ---
        pk = _pack_packed_weights(params, W=W, K=K, S=S, Ho=Ho, Wo=Wo,
                                  Wout_pad=Wout_pad, expand=expand)
        Nb = _choose_nb(N, H, Ho)
        x_in = x_nhwc.reshape(N * H, W * Cin)

        PT = _round_up(p, 8)                 # tile-aligned halo offsets
        PL = _round_up(p * Cexp, 128)
        pad_rows = PT + H + p
        pad_cols = PL + (W + p) * Cexp

        names = (("webig", "bexp") if expand else ()) + \
                ("wdw", "bdw", "wse1", "bse1", "wse2", "bse2", "wpbig", "bproj")
        weights = [pk[n] for n in names]

        kernel = functools.partial(
            _mbconv_packed_kernel, Nb=Nb, H=H, W=W, Cexp=Cexp, K=K, S=S,
            Ho=Ho, Wo=Wo, PT=PT, PL=PL, Wout_pad=Wout_pad, WCin=W * Cin,
            has_skip=has_skip, expand=expand)

        in_specs = [pl.BlockSpec((Nb * H, W * Cin), lambda n: (n, 0))]
        in_specs += [_full_spec(a) for a in weights]

        # VMEM bound derived from actual buffer sizes (double-buffered I/O + weights
        # + scratch), capped at v7x-safe 64 MiB.
        blk_bytes = (Nb * H * W * Cin + Nb * Ho * Wout_pad) * 4
        w_bytes = sum(int(a.size) * a.dtype.itemsize for a in weights)
        scratch_bytes = (pad_rows * pad_cols + Nb * Ho * W * Cexp) * 4
        vmem_limit = int(min(64 << 20,
                             max(16 << 20,
                                 2 * (blk_bytes + w_bytes) + scratch_bytes + (8 << 20))))

        out = pl.pallas_call(
            kernel,
            out_shape=jax.ShapeDtypeStruct((N * Ho, Wout_pad), f32),
            grid=(N // Nb,),
            in_specs=in_specs,
            out_specs=pl.BlockSpec((Nb * Ho, Wout_pad), lambda n: (n, 0)),
            scratch_shapes=[pltpu.VMEM((pad_rows, pad_cols), f32),
                            pltpu.VMEM((Nb * Ho, W * Cexp), f32)],
            # 'arbitrary': the zero-once halo scratch must stay on one core; the
            # batch grid is tiny after Nb-batching so megacore sharding is moot here.
            compiler_params=pltpu.CompilerParams(
                dimension_semantics=("arbitrary",),
                vmem_limit_bytes=vmem_limit),
        )(x_in, *weights)
        out = out[:, :Wout].reshape(N, Ho, Wo, Cout)
    else:
        # --- fused pixel-layout fallback (very wide W*C / Cexp >= 128) ---
        bf16 = jnp.bfloat16
        x_in = x_nhwc.reshape(N, H * W, Cin)
        if expand:
            we = (params["w_exp"] * params["s_exp"]).astype(bf16)
            be = params["b_exp"].astype(f32)
        else:
            # TODO(synk): omit these zero tensors from the arg list on this path too.
            we = jnp.zeros((Cin, Cexp), bf16)
            be = jnp.zeros((1, Cexp), f32)
        wdw = (params["w_dw"] * params["s_dw"]).reshape(K * K, Cexp).astype(f32)
        bdw = params["b_dw"].astype(f32)
        wse1 = params["w_se1"].astype(bf16)
        bse1 = params["b_se1"].astype(f32)
        wse2 = params["w_se2"].astype(bf16)
        bse2 = params["b_se2"].astype(f32)
        wp = (params["w_proj"] * params["s_proj"]).astype(bf16)
        bp = params["b_proj"].astype(f32)

        PW = _round_up(p, 8)
        kernel = functools.partial(
            _mbconv_px_kernel, H=H, W=W, Cexp=Cexp, K=K, S=S, Ho=Ho, Wo=Wo,
            PW=PW, has_skip=has_skip, expand=expand)

        args = (x_in, we, be, wdw, bdw, wse1, bse1, wse2, bse2, wp, bp)
        in_specs = [pl.BlockSpec((1, H * W, Cin), lambda n: (n, 0, 0))]
        in_specs += [_full_spec(a) for a in args[1:]]

        out = pl.pallas_call(
            kernel,
            out_shape=jax.ShapeDtypeStruct((N, Ho * Wo, Cout), f32),
            grid=(N,),
            in_specs=in_specs,
            out_specs=pl.BlockSpec((1, Ho * Wo, Cout), lambda n: (n, 0, 0)),
            scratch_shapes=[pltpu.VMEM((H + 2 * p, PW + W + p, Cexp), f32)],
            compiler_params=pltpu.CompilerParams(dimension_semantics=("parallel",)),
        )(*args)
        out = out.reshape(N, Ho, Wo, Cout)

    return jnp.transpose(out, (0, 3, 1, 2))                  # back to NCHW


# ------------------------------ reference (plain JAX) ---------------------------
def mbconv_reference(x_nchw, params, *, kernel_size, stride, expand_ratio):
    x = jnp.transpose(x_nchw, (0, 2, 3, 1)).astype(jnp.float32)
    N, H, W, Cin = x.shape
    h = x
    if expand_ratio != 1:
        h = jnp.einsum("nhwc,cd->nhwd", x, params["w_exp"])
        h = h * params["s_exp"].reshape(1, 1, 1, -1) + params["b_exp"].reshape(1, 1, 1, -1)
        h = h * jax.nn.sigmoid(h)
    K = kernel_size
    p = K // 2
    Cexp = h.shape[-1]
    rhs = params["w_dw"][:, :, None, :]                      # HWIO, I/g = 1
    h = lax.conv_general_dilated(
        h, rhs, window_strides=(stride, stride), padding=[(p, p), (p, p)],
        dimension_numbers=("NHWC", "HWIO", "NHWC"), feature_group_count=Cexp)
    h = h * params["s_dw"].reshape(1, 1, 1, -1) + params["b_dw"].reshape(1, 1, 1, -1)
    h = h * jax.nn.sigmoid(h)
    pooled = jnp.mean(h, axis=(1, 2))                        # (N, Cexp)
    s1 = pooled @ params["w_se1"] + params["b_se1"]
    s1 = s1 * jax.nn.sigmoid(s1)
    s2 = s1 @ params["w_se2"] + params["b_se2"]
    h = h * jax.nn.sigmoid(s2)[:, None, None, :]
    y = jnp.einsum("nhwc,cd->nhwd", h, params["w_proj"])
    y = y * params["s_proj"].reshape(1, 1, 1, -1) + params["b_proj"].reshape(1, 1, 1, -1)
    Cout = y.shape[-1]
    if stride == 1 and Cin == Cout:
        y = y + x
    return jnp.transpose(y, (0, 3, 1, 2))


# ------------------------------ param init --------------------------------------
def _bn_fold(gamma, beta, mean, var, eps=1e-5):
    scale = gamma / jnp.sqrt(var + eps)
    bias = beta - mean * scale
    return scale.reshape(1, -1), bias.reshape(1, -1)


def make_params(key, Cin, Cout, K, expand_ratio, se_ratio):
    Cexp = int(Cin * expand_ratio)
    Cred = max(1, int(Cexp * se_ratio))
    ks = jax.random.split(key, 10)
    f32 = jnp.float32

    def rand_bn(k, C):
        kg, kb, km, kv = jax.random.split(k, 4)
        gamma = 1.0 + 0.1 * jax.random.normal(kg, (C,), f32)
        beta = 0.1 * jax.random.normal(kb, (C,), f32)
        mean = 0.1 * jax.random.normal(km, (C,), f32)
        var = 1.0 + 0.2 * jax.random.uniform(kv, (C,), f32)
        return _bn_fold(gamma, beta, mean, var)

    prm = {}
    if expand_ratio != 1:
        prm["w_exp"] = 0.1 * jax.random.normal(ks[0], (Cin, Cexp), f32)
        prm["s_exp"], prm["b_exp"] = rand_bn(ks[1], Cexp)
    prm["w_dw"] = 0.1 * jax.random.normal(ks[2], (K, K, Cexp), f32)
    prm["s_dw"], prm["b_dw"] = rand_bn(ks[3], Cexp)
    prm["w_se1"] = 0.1 * jax.random.normal(ks[4], (Cexp, Cred), f32)
    prm["b_se1"] = (0.1 * jax.random.normal(ks[5], (Cred,), f32)).reshape(1, -1)
    prm["w_se2"] = 0.1 * jax.random.normal(ks[6], (Cred, Cexp), f32)
    prm["b_se2"] = (0.1 * jax.random.normal(ks[7], (Cexp,), f32)).reshape(1, -1)
    prm["w_proj"] = 0.1 * jax.random.normal(ks[8], (Cexp, Cout), f32)
    prm["s_proj"], prm["b_proj"] = rand_bn(ks[9], Cout)
    return prm


# ---------------------------------- main ----------------------------------------
if __name__ == "__main__":
    def run_case(name, key, *, Cin, Cout, K, S, ER, SR, N, H, W, **fwd_kw):
        kx, kp = jax.random.split(key)
        x = jax.random.normal(kx, (N, Cin, H, W), jnp.float32)
        params = make_params(kp, Cin, Cout, K, ER, SR)
        out = mbconv_forward(x, params, kernel_size=K, stride=S, expand_ratio=ER, **fwd_kw)
        out = jax.block_until_ready(out)
        ref = mbconv_reference(x, params, kernel_size=K, stride=S, expand_ratio=ER)
        p = K // 2
        Ho = (H + 2 * p - K) // S + 1
        Wo = (W + 2 * p - K) // S + 1
        assert out.shape == (N, Cout, Ho, Wo), (name, out.shape)
        err = float(jnp.max(jnp.abs(out - ref)))
        # bf16 MXU operands -> slightly looser tolerance than the pure-f32 version.
        assert jnp.allclose(out, ref, atol=1e-2, rtol=1e-2), (name, err)

    root = jax.random.PRNGKey(0)
    k1, k2, k3, k4 = jax.random.split(root, 4)
    # main config: MBConv(in=8, out=8, k=3, s=1, expand=4, se=0.25) on (2, 8, 16, 16)
    run_case("s1_skip", k1, Cin=8, Cout=8, K=3, S=1, ER=4, SR=0.25, N=2, H=16, W=16)
    # stride-2, channel change (no skip): now handled by the lane-packed kernel
    run_case("s2_noskip", k2, Cin=8, Cout=16, K=3, S=2, ER=4, SR=0.25, N=2, H=16, W=16)
    # expand_ratio == 1 (no expansion conv) with residual, shorter arg list
    run_case("er1_skip", k3, Cin=16, Cout=16, K=3, S=1, ER=1, SR=0.25, N=2, H=16, W=16)
    # keep the wide-config pixel fallback path exercised
    run_case("px_fallback", k4, Cin=8, Cout=16, K=3, S=2, ER=4, SR=0.25, N=2, H=16, W=16,
             packed_lane_limit=64)

    print("KERNEL_OK")
</pallas_src>

<mosaic_0001>
module attributes {stable_mosaic.version = 11 : i64} {
  func.func @_mbconv_packed_kernel(%arg0: i32, %arg1: memref<32x128xf32, #tpu.memory_space<vmem>>, %arg2: memref<128x512xbf16, #tpu.memory_space<vmem>>, %arg3: memref<1x512xf32, #tpu.memory_space<vmem>>, %arg4: memref<9x512xf32, #tpu.memory_space<vmem>>, %arg5: memref<1x512xf32, #tpu.memory_space<vmem>>, %arg6: memref<512x8xbf16, #tpu.memory_space<vmem>>, %arg7: memref<1x8xf32, #tpu.memory_space<vmem>>, %arg8: memref<8x512xbf16, #tpu.memory_space<vmem>>, %arg9: memref<1x512xf32, #tpu.memory_space<vmem>>, %arg10: memref<512x128xbf16, #tpu.memory_space<vmem>>, %arg11: memref<1x128xf32, #tpu.memory_space<vmem>>, %arg12: memref<32x128xf32, #tpu.memory_space<vmem>>, %arg13: memref<25x672xf32, #tpu.memory_space<vmem>>, %arg14: memref<32x512xf32, #tpu.memory_space<vmem>>) attributes {dimension_semantics = [#tpu.dimension_semantics<arbitrary>], iteration_bounds = array<i64: 1>, scalar_prefetch = 0 : i64, scratch_operands = 2 : i64, tpu.core_type = #tpu.core_type<tc>, window_params = [{transform_indices = @transform_0, window_bounds = array<i64: 32, 128>}, {pipeline_mode = #tpu.pipeline_mode<synchronous>, transform_indices = @transform_1, window_bounds = array<i64: 128, 512>}, {pipeline_mode = #tpu.pipeline_mode<synchronous>, transform_indices = @transform_2, window_bounds = array<i64: 1, 512>}, {pipeline_mode = #tpu.pipeline_mode<synchronous>, transform_indices = @transform_3, window_bounds = array<i64: 9, 512>}, {pipeline_mode = #tpu.pipeline_mode<synchronous>, transform_indices = @transform_4, window_bounds = array<i64: 1, 512>}, {pipeline_mode = #tpu.pipeline_mode<synchronous>, transform_indices = @transform_5, window_bounds = array<i64: 512, 8>}, {pipeline_mode = #tpu.pipeline_mode<synchronous>, transform_indices = @transform_6, window_bounds = array<i64: 1, 8>}, {pipeline_mode = #tpu.pipeline_mode<synchronous>, transform_indices = @transform_7, window_bounds = array<i64: 8, 512>}, {pipeline_mode = #tpu.pipeline_mode<synchronous>, transform_indices = @transform_8, window_bounds = array<i64: 1, 512>}, {pipeline_mode = #tpu.pipeline_mode<synchronous>, transform_indices = @transform_9, window_bounds = array<i64: 512, 128>}, {pipeline_mode = #tpu.pipeline_mode<synchronous>, transform_indices = @transform_10, window_bounds = array<i64: 1, 128>}, {transform_indices = @transform_11, window_bounds = array<i64: 32, 128>}]} {
    %c0_i32 = arith.constant 0 : i32
    %0 = arith.cmpi eq, %arg0, %c0_i32 : i32
    %1 = arith.extui %0 : i1 to i32
    %c0_i32_0 = arith.constant 0 : i32
    %2 = arith.cmpi ne, %1, %c0_i32_0 : i32
    scf.if %2 {
      %cst_94 = arith.constant 0.000000e+00 : f32
      %233 = vector.broadcast %cst_94 : f32 to vector<25x672xf32>
      %c0_95 = arith.constant 0 : index
      %c0_96 = arith.constant 0 : index
      %234 = vector.load %arg13[%c0_95, %c0_96] : memref<25x672xf32, #tpu.memory_space<vmem>>, vector<25x672xf32>
      tpu.vector_store %arg13[%c0_95, %c0_96], %233 {strides = array<i32>} : memref<25x672xf32, #tpu.memory_space<vmem>>, vector<25x672xf32>,
    } else {
    }
    %c0 = arith.constant 0 : index
    %c0_1 = arith.constant 0 : index
    %3 = vector.load %arg1[%c0, %c0_1] : memref<32x128xf32, #tpu.memory_space<vmem>>, vector<32x128xf32>
    %4 = arith.truncf %3 : vector<32x128xf32> to vector<32x128xbf16>
    %c0_2 = arith.constant 0 : index
    %c0_3 = arith.constant 0 : index
    %5 = vector.load %arg2[%c0_2, %c0_3] : memref<128x512xbf16, #tpu.memory_space<vmem>>, vector<128x512xbf16>
    %cst = arith.constant dense<0.000000e+00> : vector<32x512xf32>
    %6 = tpu.matmul %4, %5, %cst {dimension_numbers = #tpu.dot_dimension_numbers<[1], [0], [0], [1], [0, 0, 1, 1], [], []>} : vector<32x128xbf16>, vector<128x512xbf16>, vector<32x512xf32> -> vector<32x512xf32>
    %c0_4 = arith.constant 0 : index
    %c0_5 = arith.constant 0 : index
    %7 = vector.load %arg3[%c0_4, %c0_5] : memref<1x512xf32, #tpu.memory_space<vmem>>, vector<1x512xf32>
    %8 = vector.broadcast %7 : vector<1x512xf32> to vector<32x512xf32>
    %9 = arith.addf %6, %8 : vector<32x512xf32>
    %10 = arith.negf %9 : vector<32x512xf32>
    %11 = math.exp %10 : vector<32x512xf32>
    %cst_6 = arith.constant 1.000000e+00 : f32
    %12 = vector.broadcast %cst_6 : f32 to vector<32x512xf32>
    %13 = arith.addf %12, %11 : vector<32x512xf32>
    %14 = arith.divf %12, %13 : vector<32x512xf32>
    %15 = arith.mulf %9, %14 : vector<32x512xf32>
    %16 = vector.extract_strided_slice %15 {offsets = [0, 0], sizes = [16, 512], strides = [1, 1]} : vector<32x512xf32> to vector<16x512xf32>
    %c8 = arith.constant 8 : index
    %c128 = arith.constant 128 : index
    %17 = vector.load %arg13[%c8, %c128] : memref<25x672xf32, #tpu.memory_space<vmem>>, vector<16x512xf32>
    tpu.vector_store %arg13[%c8, %c128], %16 {strides = array<i32>} : memref<25x672xf32, #tpu.memory_space<vmem>>, vector<16x512xf32>,
    %cst_7 = arith.constant 0.000000e+00 : f32
    %18 = vector.broadcast %cst_7 : f32 to vector<16x512xf32>
    %c0_8 = arith.constant 0 : index
    %c96 = arith.constant 96 : index
    %19 = vector.load %arg13[%c0_8, %c96] : memref<25x672xf32, #tpu.memory_space<vmem>>, vector<25x512xf32>
    %20 = vector.extract_strided_slice %19 {offsets = [7, 0], sizes = [16, 512], strides = [1, 1]} : vector<25x512xf32> to vector<16x512xf32>
    %c0_9 = arith.constant 0 : index
    %c0_10 = arith.constant 0 : index
    %21 = vector.load %arg4[%c0_9, %c0_10] : memref<9x512xf32, #tpu.memory_space<vmem>>, vector<1x512xf32>
    %22 = vector.shape_cast %21 : vector<1x512xf32> to vector<512xf32>
    %23 = vector.shape_cast %22 : vector<512xf32> to vector<1x512xf32>
    %24 = vector.broadcast %23 : vector<1x512xf32> to vector<16x512xf32>
    %25 = arith.mulf %20, %24 : vector<16x512xf32>
    %26 = arith.addf %18, %25 : vector<16x512xf32>
    %27 = vector.extract_strided_slice %19 {offsets = [8, 0], sizes = [16, 512], strides = [1, 1]} : vector<25x512xf32> to vector<16x512xf32>
    %c3 = arith.constant 3 : index
    %c0_11 = arith.constant 0 : index
    %28 = vector.load %arg4[%c3, %c0_11] : memref<9x512xf32, #tpu.memory_space<vmem>>, vector<1x512xf32>
    %29 = vector.shape_cast %28 : vector<1x512xf32> to vector<512xf32>
    %30 = vector.shape_cast %29 : vector<512xf32> to vector<1x512xf32>
    %31 = vector.broadcast %30 : vector<1x512xf32> to vector<16x512xf32>
    %32 = arith.mulf %27, %31 : vector<16x512xf32>
    %33 = arith.addf %26, %32 : vector<16x512xf32>
    %34 = vector.extract_strided_slice %19 {offsets = [9, 0], sizes = [16, 512], strides = [1, 1]} : vector<25x512xf32> to vector<16x512xf32>
    %c6 = arith.constant 6 : index
    %c0_12 = arith.constant 0 : index
    %35 = vector.load %arg4[%c6, %c0_12] : memref<9x512xf32, #tpu.memory_space<vmem>>, vector<1x512xf32>
    %36 = vector.shape_cast %35 : vector<1x512xf32> to vector<512xf32>
    %37 = vector.shape_cast %36 : vector<512xf32> to vector<1x512xf32>
    %38 = vector.broadcast %37 : vector<1x512xf32> to vector<16x512xf32>
    %39 = arith.mulf %34, %38 : vector<16x512xf32>
    %40 = arith.addf %33, %39 : vector<16x512xf32>
    %c0_13 = arith.constant 0 : index
    %c128_14 = arith.constant 128 : index
    %41 = vector.load %arg13[%c0_13, %c128_14] : memref<25x672xf32, #tpu.memory_space<vmem>>, vector<25x512xf32>
    %42 = vector.extract_strided_slice %41 {offsets = [7, 0], sizes = [16, 512], strides = [1, 1]} : vector<25x512xf32> to vector<16x512xf32>
    %c1 = arith.constant 1 : index
    %c0_15 = arith.constant 0 : index
    %43 = vector.load %arg4[%c1, %c0_15] : memref<9x512xf32, #tpu.memory_space<vmem>>, vector<1x512xf32>
    %44 = vector.shape_cast %43 : vector<1x512xf32> to vector<512xf32>
    %45 = vector.shape_cast %44 : vector<512xf32> to vector<1x512xf32>
    %46 = vector.broadcast %45 : vector<1x512xf32> to vector<16x512xf32>
    %47 = arith.mulf %42, %46 : vector<16x512xf32>
    %48 = arith.addf %40, %47 : vector<16x512xf32>
    %49 = vector.extract_strided_slice %41 {offsets = [8, 0], sizes = [16, 512], strides = [1, 1]} : vector<25x512xf32> to vector<16x512xf32>
    %c4 = arith.constant 4 : index
    %c0_16 = arith.constant 0 : index
    %50 = vector.load %arg4[%c4, %c0_16] : memref<9x512xf32, #tpu.memory_space<vmem>>, vector<1x512xf32>
    %51 = vector.shape_cast %50 : vector<1x512xf32> to vector<512xf32>
    %52 = vector.shape_cast %51 : vector<512xf32> to vector<1x512xf32>
    %53 = vector.broadcast %52 : vector<1x512xf32> to vector<16x512xf32>
    %54 = arith.mulf %49, %53 : vector<16x512xf32>
    %55 = arith.addf %48, %54 : vector<16x512xf32>
    %56 = vector.extract_strided_slice %41 {offsets = [9, 0], sizes = [16, 512], strides = [1, 1]} : vector<25x512xf32> to vector<16x512xf32>
    %c7 = arith.constant 7 : index
    %c0_17 = arith.constant 0 : index
    %57 = vector.load %arg4[%c7, %c0_17] : memref<9x512xf32, #tpu.memory_space<vmem>>, vector<1x512xf32>
    %58 = vector.shape_cast %57 : vector<1x512xf32> to vector<512xf32>
    %59 = vector.shape_cast %58 : vector<512xf32> to vector<1x512xf32>
    %60 = vector.broadcast %59 : vector<1x512xf32> to vector<16x512xf32>
    %61 = arith.mulf %56, %60 : vector<16x512xf32>
    %62 = arith.addf %55, %61 : vector<16x512xf32>
    %c0_18 = arith.constant 0 : index
    %c160 = arith.constant 160 : index
    %63 = vector.load %arg13[%c0_18, %c160] : memref<25x672xf32, #tpu.memory_space<vmem>>, vector<25x512xf32>
    %64 = vector.extract_strided_slice %63 {offsets = [7, 0], sizes = [16, 512], strides = [1, 1]} : vector<25x512xf32> to vector<16x512xf32>
    %c2 = arith.constant 2 : index
    %c0_19 = arith.constant 0 : index
    %65 = vector.load %arg4[%c2, %c0_19] : memref<9x512xf32, #tpu.memory_space<vmem>>, vector<1x512xf32>
    %66 = vector.shape_cast %65 : vector<1x512xf32> to vector<512xf32>
    %67 = vector.shape_cast %66 : vector<512xf32> to vector<1x512xf32>
    %68 = vector.broadcast %67 : vector<1x512xf32> to vector<16x512xf32>
    %69 = arith.mulf %64, %68 : vector<16x512xf32>
    %70 = arith.addf %62, %69 : vector<16x512xf32>
    %71 = vector.extract_strided_slice %63 {offsets = [8, 0], sizes = [16, 512], strides = [1, 1]} : vector<25x512xf32> to vector<16x512xf32>
    %c5 = arith.constant 5 : index
    %c0_20 = arith.constant 0 : index
    %72 = vector.load %arg4[%c5, %c0_20] : memref<9x512xf32, #tpu.memory_space<vmem>>, vector<1x512xf32>
    %73 = vector.shape_cast %72 : vector<1x512xf32> to vector<512xf32>
    %74 = vector.shape_cast %73 : vector<512xf32> to vector<1x512xf32>
    %75 = vector.broadcast %74 : vector<1x512xf32> to vector<16x512xf32>
    %76 = arith.mulf %71, %75 : vector<16x512xf32>
    %77 = arith.addf %70, %76 : vector<16x512xf32>
    %78 = vector.extract_strided_slice %63 {offsets = [9, 0], sizes = [16, 512], strides = [1, 1]} : vector<25x512xf32> to vector<16x512xf32>
    %c8_21 = arith.constant 8 : index
    %c0_22 = arith.constant 0 : index
    %79 = vector.load %arg4[%c8_21, %c0_22] : memref<9x512xf32, #tpu.memory_space<vmem>>, vector<1x512xf32>
    %80 = vector.shape_cast %79 : vector<1x512xf32> to vector<512xf32>
    %81 = vector.shape_cast %80 : vector<512xf32> to vector<1x512xf32>
    %82 = vector.broadcast %81 : vector<1x512xf32> to vector<16x512xf32>
    %83 = arith.mulf %78, %82 : vector<16x512xf32>
    %84 = arith.addf %77, %83 : vector<16x512xf32>
    %c0_23 = arith.constant 0 : index
    %c0_24 = arith.constant 0 : index
    %85 = vector.load %arg5[%c0_23, %c0_24] : memref<1x512xf32, #tpu.memory_space<vmem>>, vector<1x512xf32>
    %86 = vector.broadcast %85 : vector<1x512xf32> to vector<16x512xf32>
    %87 = arith.addf %84, %86 : vector<16x512xf32>
    %88 = arith.negf %87 : vector<16x512xf32>
    %89 = math.exp %88 : vector<16x512xf32>
    %cst_25 = arith.constant 1.000000e+00 : f32
    %90 = vector.broadcast %cst_25 : f32 to vector<16x512xf32>
    %91 = arith.addf %90, %89 : vector<16x512xf32>
    %92 = arith.divf %90, %91 : vector<16x512xf32>
    %93 = arith.mulf %87, %92 : vector<16x512xf32>
    %cst_26 = arith.constant dense<0.000000e+00> : vector<512xf32>
    %94 = vector.multi_reduction <add>, %93, %cst_26 [0] : vector<16x512xf32> to vector<512xf32>
    %95 = vector.shape_cast %94 : vector<512xf32> to vector<1x512xf32>
    %96 = arith.truncf %95 : vector<1x512xf32> to vector<1x512xbf16>
    %c0_27 = arith.constant 0 : index
    %c0_28 = arith.constant 0 : index
    %97 = vector.load %arg6[%c0_27, %c0_28] : memref<512x8xbf16, #tpu.memory_space<vmem>>, vector<512x8xbf16>
    %cst_29 = arith.constant dense<0.000000e+00> : vector<1x8xf32>
    %98 = tpu.matmul %96, %97, %cst_29 {dimension_numbers = #tpu.dot_dimension_numbers<[1], [0], [0], [1], [0, 0, 1, 1], [], []>} : vector<1x512xbf16>, vector<512x8xbf16>, vector<1x8xf32> -> vector<1x8xf32>
    %c0_30 = arith.constant 0 : index
    %c0_31 = arith.constant 0 : index
    %99 = vector.load %arg7[%c0_30, %c0_31] : memref<1x8xf32, #tpu.memory_space<vmem>>, vector<1x8xf32>
    %100 = arith.addf %98, %99 : vector<1x8xf32>
    %101 = arith.negf %100 : vector<1x8xf32>
    %102 = math.exp %101 : vector<1x8xf32>
    %cst_32 = arith.constant 1.000000e+00 : f32
    %103 = vector.broadcast %cst_32 : f32 to vector<1x8xf32>
    %104 = arith.addf %103, %102 : vector<1x8xf32>
    %105 = arith.divf %103, %104 : vector<1x8xf32>
    %106 = arith.mulf %100, %105 : vector<1x8xf32>
    %107 = arith.truncf %106 : vector<1x8xf32> to vector<1x8xbf16>
    %c0_33 = arith.constant 0 : index
    %c0_34 = arith.constant 0 : index
    %108 = vector.load %arg8[%c0_33, %c0_34] : memref<8x512xbf16, #tpu.memory_space<vmem>>, vector<8x512xbf16>
    %cst_35 = arith.constant dense<0.000000e+00> : vector<1x512xf32>
    %109 = tpu.matmul %107, %108, %cst_35 {dimension_numbers = #tpu.dot_dimension_numbers<[1], [0], [0], [1], [0, 0, 1, 1], [], []>} : vector<1x8xbf16>, vector<8x512xbf16>, vector<1x512xf32> -> vector<1x512xf32>
    %c0_36 = arith.constant 0 : index
    %c0_37 = arith.constant 0 : index
    %110 = vector.load %arg9[%c0_36, %c0_37] : memref<1x512xf32, #tpu.memory_space<vmem>>, vector<1x512xf32>
    %111 = arith.addf %109, %110 : vector<1x512xf32>
    %112 = arith.negf %111 : vector<1x512xf32>
    %113 = math.exp %112 : vector<1x512xf32>
    %cst_38 = arith.constant 1.000000e+00 : f32
    %114 = vector.broadcast %cst_38 : f32 to vector<1x512xf32>
    %115 = arith.addf %114, %113 : vector<1x512xf32>
    %116 = arith.divf %114, %115 : vector<1x512xf32>
    %117 = vector.broadcast %116 : vector<1x512xf32> to vector<16x512xf32>
    %118 = arith.mulf %93, %117 : vector<16x512xf32>
    %c0_39 = arith.constant 0 : index
    %c0_40 = arith.constant 0 : index
    %119 = vector.load %arg14[%c0_39, %c0_40] : memref<32x512xf32, #tpu.memory_space<vmem>>, vector<16x512xf32>
    tpu.vector_store %arg14[%c0_39, %c0_40], %118 {strides = array<i32>} : memref<32x512xf32, #tpu.memory_space<vmem>>, vector<16x512xf32>,
    %120 = vector.extract_strided_slice %15 {offsets = [16, 0], sizes = [16, 512], strides = [1, 1]} : vector<32x512xf32> to vector<16x512xf32>
    %c8_41 = arith.constant 8 : index
    %c128_42 = arith.constant 128 : index
    %121 = vector.load %arg13[%c8_41, %c128_42] : memref<25x672xf32, #tpu.memory_space<vmem>>, vector<16x512xf32>
    tpu.vector_store %arg13[%c8_41, %c128_42], %120 {strides = array<i32>} : memref<25x672xf32, #tpu.memory_space<vmem>>, vector<16x512xf32>,
    %cst_43 = arith.constant 0.000000e+00 : f32
    %122 = vector.broadcast %cst_43 : f32 to vector<16x512xf32>
    %c0_44 = arith.constant 0 : index
    %c96_45 = arith.constant 96 : index
    %123 = vector.load %arg13[%c0_44, %c96_45] : memref<25x672xf32, #tpu.memory_space<vmem>>, vector<25x512xf32>
    %124 = vector.extract_strided_slice %123 {offsets = [7, 0], sizes = [16, 512], strides = [1, 1]} : vector<25x512xf32> to vector<16x512xf32>
    %c0_46 = arith.constant 0 : index
    %c0_47 = arith.constant 0 : index
    %125 = vector.load %arg4[%c0_46, %c0_47] : memref<9x512xf32, #tpu.memory_space<vmem>>, vector<1x512xf32>
    %126 = vector.shape_cast %125 : vector<1x512xf32> to vector<512xf32>
    %127 = vector.shape_cast %126 : vector<512xf32> to vector<1x512xf32>
    %128 = vector.broadcast %127 : vector<1x512xf32> to vector<16x512xf32>
    %129 = arith.mulf %124, %128 : vector<16x512xf32>
    %130 = arith.addf %122, %129 : vector<16x512xf32>
    %131 = vector.extract_strided_slice %123 {offsets = [8, 0], sizes = [16, 512], strides = [1, 1]} : vector<25x512xf32> to vector<16x512xf32>
    %c3_48 = arith.constant 3 : index
    %c0_49 = arith.constant 0 : index
    %132 = vector.load %arg4[%c3_48, %c0_49] : memref<9x512xf32, #tpu.memory_space<vmem>>, vector<1x512xf32>
    %133 = vector.shape_cast %132 : vector<1x512xf32> to vector<512xf32>
    %134 = vector.shape_cast %133 : vector<512xf32> to vector<1x512xf32>
    %135 = vector.broadcast %134 : vector<1x512xf32> to vector<16x512xf32>
    %136 = arith.mulf %131, %135 : vector<16x512xf32>
    %137 = arith.addf %130, %136 : vector<16x512xf32>
    %138 = vector.extract_strided_slice %123 {offsets = [9, 0], sizes = [16, 512], strides = [1, 1]} : vector<25x512xf32> to vector<16x512xf32>
    %c6_50 = arith.constant 6 : index
    %c0_51 = arith.constant 0 : index
    %139 = vector.load %arg4[%c6_50, %c0_51] : memref<9x512xf32, #tpu.memory_space<vmem>>, vector<1x512xf32>
    %140 = vector.shape_cast %139 : vector<1x512xf32> to vector<512xf32>
    %141 = vector.shape_cast %140 : vector<512xf32> to vector<1x512xf32>
    %142 = vector.broadcast %141 : vector<1x512xf32> to vector<16x512xf32>
    %143 = arith.mulf %138, %142 : vector<16x512xf32>
    %144 = arith.addf %137, %143 : vector<16x512xf32>
    %c0_52 = arith.constant 0 : index
    %c128_53 = arith.constant 128 : index
    %145 = vector.load %arg13[%c0_52, %c128_53] : memref<25x672xf32, #tpu.memory_space<vmem>>, vector<25x512xf32>
    %146 = vector.extract_strided_slice %145 {offsets = [7, 0], sizes = [16, 512], strides = [1, 1]} : vector<25x512xf32> to vector<16x512xf32>
    %c1_54 = arith.constant 1 : index
    %c0_55 = arith.constant 0 : index
    %147 = vector.load %arg4[%c1_54, %c0_55] : memref<9x512xf32, #tpu.memory_space<vmem>>, vector<1x512xf32>
    %148 = vector.shape_cast %147 : vector<1x512xf32> to vector<512xf32>
    %149 = vector.shape_cast %148 : vector<512xf32> to vector<1x512xf32>
    %150 = vector.broadcast %149 : vector<1x512xf32> to vector<16x512xf32>
    %151 = arith.mulf %146, %150 : vector<16x512xf32>
    %152 = arith.addf %144, %151 : vector<16x512xf32>
    %153 = vector.extract_strided_slice %145 {offsets = [8, 0], sizes = [16, 512], strides = [1, 1]} : vector<25x512xf32> to vector<16x512xf32>
    %c4_56 = arith.constant 4 : index
    %c0_57 = arith.constant 0 : index
    %154 = vector.load %arg4[%c4_56, %c0_57] : memref<9x512xf32, #tpu.memory_space<vmem>>, vector<1x512xf32>
    %155 = vector.shape_cast %154 : vector<1x512xf32> to vector<512xf32>
    %156 = vector.shape_cast %155 : vector<512xf32> to vector<1x512xf32>
    %157 = vector.broadcast %156 : vector<1x512xf32> to vector<16x512xf32>
    %158 = arith.mulf %153, %157 : vector<16x512xf32>
    %159 = arith.addf %152, %158 : vector<16x512xf32>
    %160 = vector.extract_strided_slice %145 {offsets = [9, 0], sizes = [16, 512], strides = [1, 1]} : vector<25x512xf32> to vector<16x512xf32>
    %c7_58 = arith.constant 7 : index
    %c0_59 = arith.constant 0 : index
    %161 = vector.load %arg4[%c7_58, %c0_59] : memref<9x512xf32, #tpu.memory_space<vmem>>, vector<1x512xf32>
    %162 = vector.shape_cast %161 : vector<1x512xf32> to vector<512xf32>
    %163 = vector.shape_cast %162 : vector<512xf32> to vector<1x512xf32>
    %164 = vector.broadcast %163 : vector<1x512xf32> to vector<16x512xf32>
    %165 = arith.mulf %160, %164 : vector<16x512xf32>
    %166 = arith.addf %159, %165 : vector<16x512xf32>
    %c0_60 = arith.constant 0 : index
    %c160_61 = arith.constant 160 : index
    %167 = vector.load %arg13[%c0_60, %c160_61] : memref<25x672xf32, #tpu.memory_space<vmem>>, vector<25x512xf32>
    %168 = vector.extract_strided_slice %167 {offsets = [7, 0], sizes = [16, 512], strides = [1, 1]} : vector<25x512xf32> to vector<16x512xf32>
    %c2_62 = arith.constant 2 : index
    %c0_63 = arith.constant 0 : index
    %169 = vector.load %arg4[%c2_62, %c0_63] : memref<9x512xf32, #tpu.memory_space<vmem>>, vector<1x512xf32>
    %170 = vector.shape_cast %169 : vector<1x512xf32> to vector<512xf32>
    %171 = vector.shape_cast %170 : vector<512xf32> to vector<1x512xf32>
    %172 = vector.broadcast %171 : vector<1x512xf32> to vector<16x512xf32>
    %173 = arith.mulf %168, %172 : vector<16x512xf32>
    %174 = arith.addf %166, %173 : vector<16x512xf32>
    %175 = vector.extract_strided_slice %167 {offsets = [8, 0], sizes = [16, 512], strides = [1, 1]} : vector<25x512xf32> to vector<16x512xf32>
    %c5_64 = arith.constant 5 : index
    %c0_65 = arith.constant 0 : index
    %176 = vector.load %arg4[%c5_64, %c0_65] : memref<9x512xf32, #tpu.memory_space<vmem>>, vector<1x512xf32>
    %177 = vector.shape_cast %176 : vector<1x512xf32> to vector<512xf32>
    %178 = vector.shape_cast %177 : vector<512xf32> to vector<1x512xf32>
    %179 = vector.broadcast %178 : vector<1x512xf32> to vector<16x512xf32>
    %180 = arith.mulf %175, %179 : vector<16x512xf32>
    %181 = arith.addf %174, %180 : vector<16x512xf32>
    %182 = vector.extract_strided_slice %167 {offsets = [9, 0], sizes = [16, 512], strides = [1, 1]} : vector<25x512xf32> to vector<16x512xf32>
    %c8_66 = arith.constant 8 : index
    %c0_67 = arith.constant 0 : index
    %183 = vector.load %arg4[%c8_66, %c0_67] : memref<9x512xf32, #tpu.memory_space<vmem>>, vector<1x512xf32>
    %184 = vector.shape_cast %183 : vector<1x512xf32> to vector<512xf32>
    %185 = vector.shape_cast %184 : vector<512xf32> to vector<1x512xf32>
    %186 = vector.broadcast %185 : vector<1x512xf32> to vector<16x512xf32>
    %187 = arith.mulf %182, %186 : vector<16x512xf32>
    %188 = arith.addf %181, %187 : vector<16x512xf32>
    %c0_68 = arith.constant 0 : index
    %c0_69 = arith.constant 0 : index
    %189 = vector.load %arg5[%c0_68, %c0_69] : memref<1x512xf32, #tpu.memory_space<vmem>>, vector<1x512xf32>
    %190 = vector.broadcast %189 : vector<1x512xf32> to vector<16x512xf32>
    %191 = arith.addf %188, %190 : vector<16x512xf32>
    %192 = arith.negf %191 : vector<16x512xf32>
    %193 = math.exp %192 : vector<16x512xf32>
    %cst_70 = arith.constant 1.000000e+00 : f32
    %194 = vector.broadcast %cst_70 : f32 to vector<16x512xf32>
    %195 = arith.addf %194, %193 : vector<16x512xf32>
    %196 = arith.divf %194, %195 : vector<16x512xf32>
    %197 = arith.mulf %191, %196 : vector<16x512xf32>
    %cst_71 = arith.constant dense<0.000000e+00> : vector<512xf32>
    %198 = vector.multi_reduction <add>, %197, %cst_71 [0] : vector<16x512xf32> to vector<512xf32>
    %199 = vector.shape_cast %198 : vector<512xf32> to vector<1x512xf32>
    %200 = arith.truncf %199 : vector<1x512xf32> to vector<1x512xbf16>
    %c0_72 = arith.constant 0 : index
    %c0_73 = arith.constant 0 : index
    %201 = vector.load %arg6[%c0_72, %c0_73] : memref<512x8xbf16, #tpu.memory_space<vmem>>, vector<512x8xbf16>
    %cst_74 = arith.constant dense<0.000000e+00> : vector<1x8xf32>
    %202 = tpu.matmul %200, %201, %cst_74 {dimension_numbers = #tpu.dot_dimension_numbers<[1], [0], [0], [1], [0, 0, 1, 1], [], []>} : vector<1x512xbf16>, vector<512x8xbf16>, vector<1x8xf32> -> vector<1x8xf32>
    %c0_75 = arith.constant 0 : index
    %c0_76 = arith.constant 0 : index
    %203 = vector.load %arg7[%c0_75, %c0_76] : memref<1x8xf32, #tpu.memory_space<vmem>>, vector<1x8xf32>
    %204 = arith.addf %202, %203 : vector<1x8xf32>
    %205 = arith.negf %204 : vector<1x8xf32>
    %206 = math.exp %205 : vector<1x8xf32>
    %cst_77 = arith.constant 1.000000e+00 : f32
    %207 = vector.broadcast %cst_77 : f32 to vector<1x8xf32>
    %208 = arith.addf %207, %206 : vector<1x8xf32>
    %209 = arith.divf %207, %208 : vector<1x8xf32>
    %210 = arith.mulf %204, %209 : vector<1x8xf32>
    %211 = arith.truncf %210 : vector<1x8xf32> to vector<1x8xbf16>
    %c0_78 = arith.constant 0 : index
    %c0_79 = arith.constant 0 : index
    %212 = vector.load %arg8[%c0_78, %c0_79] : memref<8x512xbf16, #tpu.memory_space<vmem>>, vector<8x512xbf16>
    %cst_80 = arith.constant dense<0.000000e+00> : vector<1x512xf32>
    %213 = tpu.matmul %211, %212, %cst_80 {dimension_numbers = #tpu.dot_dimension_numbers<[1], [0], [0], [1], [0, 0, 1, 1], [], []>} : vector<1x8xbf16>, vector<8x512xbf16>, vector<1x512xf32> -> vector<1x512xf32>
    %c0_81 = arith.constant 0 : index
    %c0_82 = arith.constant 0 : index
    %214 = vector.load %arg9[%c0_81, %c0_82] : memref<1x512xf32, #tpu.memory_space<vmem>>, vector<1x512xf32>
    %215 = arith.addf %213, %214 : vector<1x512xf32>
    %216 = arith.negf %215 : vector<1x512xf32>
    %217 = math.exp %216 : vector<1x512xf32>
    %cst_83 = arith.constant 1.000000e+00 : f32
    %218 = vector.broadcast %cst_83 : f32 to vector<1x512xf32>
    %219 = arith.addf %218, %217 : vector<1x512xf32>
    %220 = arith.divf %218, %219 : vector<1x512xf32>
    %221 = vector.broadcast %220 : vector<1x512xf32> to vector<16x512xf32>
    %222 = arith.mulf %197, %221 : vector<16x512xf32>
    %c16 = arith.constant 16 : index
    %c0_84 = arith.constant 0 : index
    %223 = vector.load %arg14[%c16, %c0_84] : memref<32x512xf32, #tpu.memory_space<vmem>>, vector<16x512xf32>
    tpu.vector_store %arg14[%c16, %c0_84], %222 {strides = array<i32>} : memref<32x512xf32, #tpu.memory_space<vmem>>, vector<16x512xf32>,
    %c0_85 = arith.constant 0 : index
    %c0_86 = arith.constant 0 : index
    %224 = vector.load %arg14[%c0_85, %c0_86] : memref<32x512xf32, #tpu.memory_space<vmem>>, vector<32x512xf32>
    %225 = arith.truncf %224 : vector<32x512xf32> to vector<32x512xbf16>
    %c0_87 = arith.constant 0 : index
    %c0_88 = arith.constant 0 : index
    %226 = vector.load %arg10[%c0_87, %c0_88] : memref<512x128xbf16, #tpu.memory_space<vmem>>, vector<512x128xbf16>
    %cst_89 = arith.constant dense<0.000000e+00> : vector<32x128xf32>
    %227 = tpu.matmul %225, %226, %cst_89 {dimension_numbers = #tpu.dot_dimension_numbers<[1], [0], [0], [1], [0, 0, 1, 1], [], []>} : vector<32x512xbf16>, vector<512x128xbf16>, vector<32x128xf32> -> vector<32x128xf32>
    %c0_90 = arith.constant 0 : index
    %c0_91 = arith.constant 0 : index
    %228 = vector.load %arg11[%c0_90, %c0_91] : memref<1x128xf32, #tpu.memory_space<vmem>>, vector<1x128xf32>
    %229 = vector.broadcast %228 : vector<1x128xf32> to vector<32x128xf32>
    %230 = arith.addf %227, %229 : vector<32x128xf32>
    %231 = arith.addf %230, %3 : vector<32x128xf32>
    %c0_92 = arith.constant 0 : index
    %c0_93 = arith.constant 0 : index
    %232 = vector.load %arg12[%c0_92, %c0_93] : memref<32x128xf32, #tpu.memory_space<vmem>>, vector<32x128xf32>
    tpu.vector_store %arg12[%c0_92, %c0_93], %231 {strides = array<i32>} : memref<32x128xf32, #tpu.memory_space<vmem>>, vector<32x128xf32>,
    return
  }
  func.func @transform_0(%arg0: i32) -> (i32, i32) {
    %c0_i32 = arith.constant 0 : i32
    %c0_i32_0 = arith.constant 0 : i32
    return %arg0, %c0_i32 : i32, i32
  }
  func.func @transform_1(%arg0: i32) -> (i32, i32) {
    %c0_i32 = arith.constant 0 : i32
    %c0_i32_0 = arith.constant 0 : i32
    %c0_i32_1 = arith.constant 0 : i32
    return %c0_i32, %c0_i32_0 : i32, i32
  }
  func.func @transform_2(%arg0: i32) -> (i32, i32) {
    %c0_i32 = arith.constant 0 : i32
    %c0_i32_0 = arith.constant 0 : i32
    %c0_i32_1 = arith.constant 0 : i32
    return %c0_i32, %c0_i32_0 : i32, i32
  }
  func.func @transform_3(%arg0: i32) -> (i32, i32) {
    %c0_i32 = arith.constant 0 : i32
    %c0_i32_0 = arith.constant 0 : i32
    %c0_i32_1 = arith.constant 0 : i32
    return %c0_i32, %c0_i32_0 : i32, i32
  }
  func.func @transform_4(%arg0: i32) -> (i32, i32) {
    %c0_i32 = arith.constant 0 : i32
    %c0_i32_0 = arith.constant 0 : i32
    %c0_i32_1 = arith.constant 0 : i32
    return %c0_i32, %c0_i32_0 : i32, i32
  }
  func.func @transform_5(%arg0: i32) -> (i32, i32) {
    %c0_i32 = arith.constant 0 : i32
    %c0_i32_0 = arith.constant 0 : i32
    %c0_i32_1 = arith.constant 0 : i32
    return %c0_i32, %c0_i32_0 : i32, i32
  }
  func.func @transform_6(%arg0: i32) -> (i32, i32) {
    %c0_i32 = arith.constant 0 : i32
    %c0_i32_0 = arith.constant 0 : i32
    %c0_i32_1 = arith.constant 0 : i32
    return %c0_i32, %c0_i32_0 : i32, i32
  }
  func.func @transform_7(%arg0: i32) -> (i32, i32) {
    %c0_i32 = arith.constant 0 : i32
    %c0_i32_0 = arith.constant 0 : i32
    %c0_i32_1 = arith.constant 0 : i32
    return %c0_i32, %c0_i32_0 : i32, i32
  }
  func.func @transform_8(%arg0: i32) -> (i32, i32) {
    %c0_i32 = arith.constant 0 : i32
    %c0_i32_0 = arith.constant 0 : i32
    %c0_i32_1 = arith.constant 0 : i32
    return %c0_i32, %c0_i32_0 : i32, i32
  }
  func.func @transform_9(%arg0: i32) -> (i32, i32) {
    %c0_i32 = arith.constant 0 : i32
    %c0_i32_0 = arith.constant 0 : i32
    %c0_i32_1 = arith.constant 0 : i32
    return %c0_i32, %c0_i32_0 : i32, i32
  }
  func.func @transform_10(%arg0: i32) -> (i32, i32) {
    %c0_i32 = arith.constant 0 : i32
    %c0_i32_0 = arith.constant 0 : i32
    %c0_i32_1 = arith.constant 0 : i32
    return %c0_i32, %c0_i32_0 : i32, i32
  }
  func.func @transform_11(%arg0: i32) -> (i32, i32) {
    %c0_i32 = arith.constant 0 : i32
    %c0_i32_0 = arith.constant 0 : i32
    return %arg0, %c0_i32 : i32, i32
  }
}

</mosaic_0001>

<bundles_post_ra>
// kernel: tpu_custom_call.1
= control target key start
LH: loop header
LB: loop body
LE: loop exit
PB: predicated region body
PF: predicated region fallthrough
CT: control target
= control target key end

     0   :  { %16 = vsyncpa [#allocation5], 0  ;;  %s9175_s0 = inlined_call_operand.hbm [shape: f32[32,128], index: 0, kind: input, shape index: {}]   ;;  %s9176_s1 = inlined_call_operand.vmem [shape: bf16[128,512], index: 1, kind: input, shape index: {}]   ;;  %s9177_s2 = inlined_call_operand.hbm [shape: f32[1,512], index: 2, kind: input, shape index: {}]   ;;  %s9178_s3 = inlined_call_operand.hbm [shape: f32[9,512], index: 3, kind: input, shape index: {}]   ;;  %s9179_s4 = inlined_call_operand.hbm [shape: f32[1,512], index: 4, kind: input, shape index: {}]   ;;  %s9180_s5 = inlined_call_operand.vmem [shape: bf16[512,8], index: 5, kind: input, shape index: {}]   ;;  %s9181_s6 = inlined_call_operand.vmem [shape: f32[1,8], index: 6, kind: input, shape index: {}]   ;;  %s9182_s7 = inlined_call_operand.vmem [shape: bf16[8,512], index: 7, kind: input, shape index: {}]   ;;  %s9183_s8 = inlined_call_operand.vmem [shape: f32[1,512], index: 8, kind: input, shape index: {}]   ;;  %s9184_s9 = inlined_call_operand.hbm [shape: bf16[512,128], index: 9, kind: input, shape index: {}]   ;;  %s9185_s10 = inlined_call_operand.vmem [shape: f32[1,128], index: 10, kind: input, shape index: {}]   ;;  %s9186_s11 = inlined_call_operand.hbm [shape: f32[32,128], index: 11, kind: output, shape index: {}]  }
   0x1   :  { %17 = vsyncpa [#allocation8], 0 }
   0x2   :  { %18 = vsyncpa [#allocation11], 0 }
   0x3   :  { %19 = vsyncpa [#allocation6], 0  ;;  %s5958_s17 = smov [#allocation7]   ;;  %s5959_s19 = smov [#allocation10]  }
   0x4   :  { %s40_s18 = sshll.u32 %s5958_s17, 4  ;;  %s62_s20 = sshll.u32 %s5959_s19, 4  ;;  %s41_s18 = int_to_ptr.vmem [resolvable:$true] %s40_s18  ;;  %s63_s20 = int_to_ptr.vmem [resolvable:$true] %s62_s20 }
   0x5   :  { %s5818_s23 = scalar_lea.hbm %s9177_s2, 64 }
   0x6   :  { %p5819_p0 = scmp.ne.s32.totalorder %s9177_s2, %s5818_s23  ;;  %p5822_p1 = scmp.lt.u32.totalorder %s5818_s23, %s9177_s2 }
   0x8   :  { %p5824_p2 = pnand %p5822_p1, %p5819_p0 }
   0xa   :  { %5827 = shalt.err (!%p5824_p2)
}
   0xb   :  { %s5828_s28 = scalar_lea.vmem %s41_s18, 64  ;;  %p5833_p4 = scmp.lt.s32.totalorder %s41_s18, %s41_s18 }
   0xc   :  { %p5829_p3 = scmp.ne.s32.totalorder %s41_s18, %s5828_s28  ;;  %p5834_p5 = scmp.lt.s32.totalorder %s5828_s28, %s5828_s28 }
   0xe   :  { %p5835_p6 = por %p5834_p5, %p5833_p4 }
  0x10   :  { %p5836_p7 = pnand %p5835_p6, %p5829_p3 }
  0x12   :  { %5839 = shalt.err (!%p5836_p7)
}
  0x13   :  { %43 = dma.hbm_to_vmem [thread:$0]  %s9177_s2, 64, %s41_s18, [#allocation8]  }
  0x14   :  { %s5840_s14 = scalar_lea.hbm %s9179_s4, 64 }
  0x15   :  { %p5841_p8 = scmp.ne.s32.totalorder %s9179_s4, %s5840_s14  ;;  %p5844_p9 = scmp.lt.u32.totalorder %s5840_s14, %s9179_s4 }
  0x17   :  { %p5846_p10 = pnand %p5844_p9, %p5841_p8 }
  0x19   :  { %5849 = shalt.err (!%p5846_p10)
}
  0x1a   :  { %s5850_s21 = scalar_lea.vmem %s63_s20, 64  ;;  %p5855_p12 = scmp.lt.s32.totalorder %s63_s20, %s63_s20 }
  0x1b   :  { %p5851_p11 = scmp.ne.s32.totalorder %s63_s20, %s5850_s21  ;;  %p5856_p13 = scmp.lt.s32.totalorder %s5850_s21, %s5850_s21 }
  0x1d   :  { %p5857_p0 = por %p5856_p13, %p5855_p12 }
  0x1f   :  { %p5858_p1 = pnand %p5857_p0, %p5851_p11 }
  0x21   :  { %5861 = shalt.err (!%p5858_p1)
}
  0x22   :  { %65 = dma.hbm_to_vmem [thread:$0]  %s9179_s4, 64, %s63_s20, [#allocation11]  }
  0x23   :  { %s5960_s22 = smov [#allocation4]   ;;  %s5862_s26 = scalar_lea.hbm %s9175_s0, 512 }
  0x24   :  { %s25_s23 = sshll.u32 %s5960_s22, 4  ;;  %p5863_p2 = scmp.ne.s32.totalorder %s9175_s0, %s5862_s26  ;;  %s26_s23 = int_to_ptr.vmem [resolvable:$true] %s25_s23 }
  0x25   :  { %p5866_p3 = scmp.lt.u32.totalorder %s5862_s26, %s9175_s0 }
  0x27   :  { %p5868_p4 = pnand %p5866_p3, %p5863_p2 }
  0x29   :  { %5871 = shalt.err (!%p5868_p4)
}
  0x2a   :  { %s5872_s12 = scalar_lea.vmem %s26_s23, 512  ;;  %p5877_p6 = scmp.lt.s32.totalorder %s26_s23, %s26_s23 }
  0x2b   :  { %p5873_p5 = scmp.ne.s32.totalorder %s26_s23, %s5872_s12  ;;  %p5878_p7 = scmp.lt.s32.totalorder %s5872_s12, %s5872_s12 }
  0x2d   :  { %p5879_p8 = por %p5878_p7, %p5877_p6 }
  0x2f   :  { %p5880_p9 = pnand %p5879_p8, %p5873_p5 }
  0x31   :  { %5883 = shalt.err (!%p5880_p9)
}
  0x32   :  { %s5961_s4 = smov 128   ;;  %s5962_s20 = smov 8  }
  0x33   :  { %31 = dma.hbm_to_vmem [thread:$0]  %s9175_s0, 512, %s26_s23, [#allocation5], %s5961_s4, %s5961_s4, %s5962_s20  }
  0x34   :  { %s5963_s15 = smov [#allocation9]   ;;  %s5884_s21 = scalar_lea.hbm %s9178_s3, 1024 }
  0x35   :  { %s49_s16 = sshll.u32 %s5963_s15, 4  ;;  %p5885_p10 = scmp.ne.s32.totalorder %s9178_s3, %s5884_s21  ;;  %s50_s16 = int_to_ptr.vmem [resolvable:$true] %s49_s16 }
  0x36   :  { %p5888_p11 = scmp.lt.u32.totalorder %s5884_s21, %s9178_s3 }
  0x38   :  { %p5890_p12 = pnand %p5888_p11, %p5885_p10 }
  0x3a   :  { %5893 = shalt.err (!%p5890_p12)
}
  0x3b   :  { %s5894_s25 = scalar_lea.vmem %s50_s16, 1024  ;;  %p5899_p0 = scmp.lt.s32.totalorder %s50_s16, %s50_s16 }
  0x3c   :  { %p5895_p13 = scmp.ne.s32.totalorder %s50_s16, %s5894_s25  ;;  %p5900_p1 = scmp.lt.s32.totalorder %s5894_s25, %s5894_s25 }
  0x3e   :  { %p5901_p2 = por %p5900_p1, %p5899_p0 }
  0x40   :  { %p5902_p3 = pnand %p5901_p2, %p5895_p13 }
  0x42   :  { %5905 = shalt.err (!%p5902_p3)
}
  0x43   :  { %s5964_s0 = smov 512   ;;  %s5965_s23 = smov 32  }
  0x44   :  { %55 = dma.hbm_to_vmem [thread:$0]  %s9178_s3, 1024, %s50_s16, [#allocation8], %s5964_s0, %s5964_s0, %s5965_s23  }
  0x45   :  { %s5966_s28 = smov [#allocation12]   ;;  %s5906_s13 = scalar_lea.hbm %s9184_s9, 4096 }
  0x46   :  { %s79_s29 = sshll.u32 %s5966_s28, 4  ;;  %p5907_p4 = scmp.ne.s32.totalorder %s9184_s9, %s5906_s13  ;;  %s80_s29 = int_to_ptr.vmem [resolvable:$true] %s79_s29 }
  0x47   :  { %p5910_p5 = scmp.lt.u32.totalorder %s5906_s13, %s9184_s9 }
  0x49   :  { %p5912_p6 = pnand %p5910_p5, %p5907_p4 }
  0x4b   :  { %5915 = shalt.err (!%p5912_p6)
}
  0x4c   :  { %s5916_s21 = scalar_lea.vmem %s80_s29, 4096  ;;  %p5921_p8 = scmp.lt.s32.totalorder %s80_s29, %s80_s29 }
  0x4d   :  { %p5917_p7 = scmp.ne.s32.totalorder %s80_s29, %s5916_s21  ;;  %p5922_p9 = scmp.lt.s32.totalorder %s5916_s21, %s5916_s21 }
  0x4f   :  { %p5923_p10 = por %p5922_p9, %p5921_p8 }
  0x51   :  { %p5924_p11 = pnand %p5923_p10, %p5917_p7 }
  0x53   :  { %5927 = shalt.err (!%p5924_p11)
}
  0x54   :  { %s5967_s3 = smov 64   ;;  %s5968_s16 = smov 4  }
  0x55   :  { %85 = dma.hbm_to_vmem [thread:$0]  %s9184_s9, 4096, %s80_s29, [#allocation11], %s5967_s3, %s5967_s3, %s5968_s16  }
  0x56   :  { %5950 = dma.done.wait [#allocation5], 512  }
  0x57   :  { %5951 = vsyncadd [#allocation5], 4294966784 }
  0x58   :  { %5952 = dma.done.wait [#allocation8], 1088  }
  0x59   :  { %5953 = vsyncadd [#allocation8], 4294966208 }
  0x5a   :  { %5954 = dma.done.wait [#allocation11], 4160  }
  0x5b   :  { %5955 = vsyncadd [#allocation11], 4294963136  ;;  %v9187_v0 = vmov 0   ;;  %v5970_v1 = vmov 0.0   ;;  %v5430_v2 = vld [vmem:[%s9176_s1 + $0x4] ss:$16 sps:$4 sm:$0xff]   ;;  %v174_v17 = vlaneseq }
  0x5c   :  { %386 = vmatprep.mubr.bf16.mxu0 %v9187_v0  ;;  %439 = vmatprep.mubr.bf16.mxu1 %v9187_v0  ;;  %110 = vst [vmem:[#allocation2 + $0x10] sm:$0xff] %v5970_v1  ;;  %127 = vst [vmem:[#allocation2 + $0x90] sm:$0x1] %v5970_v1  ;;  %v5432_v3 = vld [vmem:[%s9176_s1 + $0xc] ss:$16 sps:$4 sm:$0xff]   ;;  %vm113_vm0 = vcmask 261120  }
  0x5d   :  { %128 = vst [vmem:[#allocation2 + $0x98] sm:$0x1] %v5970_v1  ;;  %129 = vst [vmem:[#allocation2 + $0xa0] sm:$0x1] %v5970_v1  ;;  %354 = vmatprep.subr.bf16.mxu0 %v5430_v2  ;;  %v5434_v4 = vld [vmem:[%s9176_s1] ss:$16 sps:$4 sm:$0xff]   ;;  %407 = vmatprep.subr.bf16.mxu1 %v5432_v3 }
  0x5e   :  { %130 = vst [vmem:[#allocation2 + $0xa8] sm:$0x1] %v5970_v1  ;;  %131 = vst [vmem:[#allocation2 + $0xb0] sm:$0x1] %v5970_v1  ;;  %v5435_v5 = vld [vmem:[%s9176_s1 + $0x8] ss:$16 sps:$4 sm:$0xff]   ;;  %355 = vmatpush1.bf16.msra.mxu0 %v5434_v4 }
  0x5f   :  { %v5436_v6 = vld [vmem:[%s9176_s1 + $0x24] ss:$16 sps:$4 sm:$0xff]   ;;  %408 = vmatpush1.bf16.msra.mxu1 %v5435_v5  ;;  %v5438_v7 = vld [vmem:[%s9176_s1 + $0x2c] ss:$16 sps:$4 sm:$0xff]   ;;  %v5440_v8 = vld [vmem:[%s9176_s1 + $0x20] ss:$16 sps:$4 sm:$0xff]  }
  0x60   :  { %356 = vmatprep.subr.bf16.mxu0 %v5436_v6  ;;  %v5441_v9 = vld [vmem:[%s9176_s1 + $0x28] ss:$16 sps:$4 sm:$0xff]   ;;  %409 = vmatprep.subr.bf16.mxu1 %v5438_v7  ;;  %v5442_v10 = vld [vmem:[%s9176_s1 + $0x44] ss:$16 sps:$4 sm:$0xff]   ;;  %v5444_v11 = vld [vmem:[%s9176_s1 + $0x4c] ss:$16 sps:$4 sm:$0xff]  }
  0x61   :  { %v5446_v12 = vld [vmem:[%s9176_s1 + $0x40] ss:$16 sps:$4 sm:$0xff]   ;;  %v5447_v13 = vld [vmem:[%s9176_s1 + $0x48] ss:$16 sps:$4 sm:$0xff]   ;;  %v5448_v14 = vld [vmem:[%s9176_s1 + $0x64] ss:$16 sps:$4 sm:$0xff]  }
  0x62   :  { %357 = vmatpush1.bf16.msra.mxu0 %v5440_v8  ;;  %v5450_v15 = vld [vmem:[%s9176_s1 + $0x6c] ss:$16 sps:$4 sm:$0xff]   ;;  %v5452_v16 = vld [vmem:[%s9176_s1 + $0x60] ss:$16 sps:$4 sm:$0xff]   ;;  %v5453_v18 = vld [vmem:[%s9176_s1 + $0x68] ss:$16 sps:$4 sm:$0xff]  }
  0x63   :  { %410 = vmatpush1.bf16.msra.mxu1 %v5441_v9  ;;  %358 = vmatprep.subr.bf16.mxu0 %v5442_v10  ;;  %v5454_v19 = vld [vmem:[%s9176_s1 + $0x84] ss:$16 sps:$4 sm:$0xff]   ;;  %v5456_v20 = vld [vmem:[%s9176_s1 + $0x8c] ss:$16 sps:$4 sm:$0xff]   ;;  %v5458_v21 = vld [vmem:[%s9176_s1 + $0x80] ss:$16 sps:$4 sm:$0xff]  }
  0x64   :  { %411 = vmatprep.subr.bf16.mxu1 %v5444_v11  ;;  %v5459_v22 = vld [vmem:[%s9176_s1 + $0x88] ss:$16 sps:$4 sm:$0xff]   ;;  %v175_v23 = vshrl.u32 %v174_v17, 7  ;;  %v5460_v24 = vld [vmem:[%s9176_s1 + $0xa4] ss:$16 sps:$4 sm:$0xff]   ;;  %114 = vst.msk [vmem:[#allocation2 + $0x28] sm:$0xff] %vm113_vm0, %v5970_v1 }
  0x65   :  { %v5462_v25 = vld [vmem:[%s9176_s1 + $0xac] ss:$16 sps:$4 sm:$0xff]   ;;  %v5464_v27 = vld [vmem:[%s9176_s1 + $0xa0] ss:$16 sps:$4 sm:$0xff]   ;;  %v5465_v28 = vld [vmem:[%s9176_s1 + $0xa8] ss:$16 sps:$4 sm:$0xff]  }
  0x66   :  { %359 = vmatpush1.bf16.msra.mxu0 %v5446_v12  ;;  %v6173_v26 = vsub.s32 2, %v175_v23  ;;  %v5466_v29 = vld [vmem:[%s9176_s1 + $0xc4] ss:$16 sps:$4 sm:$0xff]   ;;  %v5468_v30 = vld [vmem:[%s9176_s1 + $0xcc] ss:$16 sps:$4 sm:$0xff]   ;;  %v6187_v31 = vsub.s32 0, %v175_v23 }
  0x67   :  { %412 = vmatpush1.bf16.msra.mxu1 %v5447_v13  ;;  %360 = vmatprep.subr.bf16.mxu0 %v5448_v14  ;;  %v1385_v32 = vld [vmem:[#allocation9 + $0x5] ss:$8 sm:$0xf]  ;;  %v6189_v33 = vsub.s32 1, %v175_v23  ;;  %v5472_v39 = vld [vmem:[%s9176_s1 + $0xe4] ss:$16 sps:$4 sm:$0xff]  }
  0x68   :  { %413 = vmatprep.subr.bf16.mxu1 %v5450_v15  ;;  %9308 = vst [vmem:[#allocation18_spill] sm:$0xff] %v6173_v26  ;;  %9309 = vst [vmem:[#allocation19_spill] sm:$0xff] %v6187_v31  ;;  %v1398_v34 = vrot.slane %v1385_v32, %v6173_v26  ;;  %v1246_v35 = vld [vmem:[#allocation9 + $0x2] ss:$8 sm:$0xf]  ;;  %v1390_v36 = vrot.slane %v1385_v32, %v6187_v31  ;;  %v6215_v47 = vsub.s32 3, %v175_v23 }
  0x69   :  { %9310 = vst [vmem:[#allocation20_spill] sm:$0xff] %v6189_v33  ;;  %v5470_v37 = vld [vmem:[%s9176_s1 + $0xc0] ss:$16 sps:$4 sm:$0xff]   ;;  %v5471_v38 = vld [vmem:[%s9176_s1 + $0xc8] ss:$16 sps:$4 sm:$0xff]   ;;  %v1251_v45 = vrot.slane %v1246_v35, %v6187_v31  ;;  %v1394_v46 = vrot.slane %v1385_v32, %v6189_v33  ;;  %120 = vst.msk [vmem:[#allocation2 + $0x58] sm:$0xff] %vm113_vm0, %v5970_v1  ;;  %v1259_v48 = vrot.slane %v1246_v35, %v6173_v26 }
  0x6a   :  { %361 = vmatpush1.bf16.msra.mxu0 %v5452_v16  ;;  %v5474_v40 = vld [vmem:[%s9176_s1 + $0xec] ss:$16 sps:$4 sm:$0xff]   ;;  %v5476_v41 = vld [vmem:[%s9176_s1 + $0xe0] ss:$16 sps:$4 sm:$0xff]   ;;  %v5477_v42 = vld [vmem:[%s9176_s1 + $0xe8] ss:$16 sps:$4 sm:$0xff]   ;;  %1407 = vrot.lane.b32.xlu1 %v1398_v34, %s5965_s23  ;;  %v1255_v49 = vrot.slane %v1246_v35, %v6189_v33  ;;  %v1263_v52 = vrot.slane %v1246_v35, %v6215_v47  ;;  %v1402_v53 = vrot.slane %v1385_v32, %v6215_v47 }
  0x6b   :  { %414 = vmatpush1.bf16.msra.mxu1 %v5453_v18  ;;  %362 = vmatprep.subr.bf16.mxu0 %v5454_v19  ;;  %v134_v43 = vld [vmem:[#allocation4] sm:$0xff]  ;;  %v135_v44 = vld [vmem:[#allocation4 + $0x8] sm:$0xff]  ;;  %9311 = vst [vmem:[#allocation21_spill] sm:$0xff] %v6215_v47  ;;  %126 = vst.msk [vmem:[#allocation2 + $0x88] sm:$0xff] %vm113_vm0, %v5970_v1  ;;  %s5971_s1 = smov 96   ;;  %vm132_vm1 = vcmask 253952  }
  0x6c   :  { %415 = vmatprep.subr.bf16.mxu1 %v5456_v20  ;;  %1403 = vrot.lane.b32.xlu0 %v1390_v36, %s5965_s23  ;;  %v138_v50 = vpack.c.bf16 %v135_v44, %v134_v43  ;;  %v1527_v51 = vld [vmem:[#allocation9 + $0x20] ss:$8 sm:$0xf]  ;;  %v666_v56 = vld [vmem:[#allocation9 + $0x3] ss:$8 sm:$0xf] }
  0x6d   :  { %v1532_v54 = vrot.slane %v1527_v51, %v6187_v31  ;;  %v1536_v55 = vrot.slane %v1527_v51, %v6189_v33  ;;  %v1540_v57 = vrot.slane %v1527_v51, %v6173_v26  ;;  %v1544_v58 = vrot.slane %v1527_v51, %v6215_v47  ;;  %v767_v61 = vld [vmem:[#allocation9 + $0x6] ss:$8 sm:$0xf]  ;;  %v600_v2 = vld [vmem:[#allocation9] ss:$8 sm:$0xf] }
  0x6e   :  { %363 = vmatpush1.bf16.msra.mxu0 %v5458_v21  ;;  %1264 = vrot.lane.b32.xlu1 %v1251_v45, %s5965_s23  ;;  %v675_v59 = vrot.slane %v666_v56, %v6189_v33  ;;  %v671_v60 = vrot.slane %v666_v56, %v6187_v31  ;;  %v683_v62 = vrot.slane %v666_v56, %v6215_v47  ;;  %v888_v7 = vld [vmem:[#allocation9 + $0x1] ss:$8 sm:$0xf]  ;;  %vm720_vm2 = vcmask 1046528  }
  0x6f   :  { %416 = vmatpush1.bf16.msra.mxu1 %v5459_v22  ;;  %364 = vmatprep.subr.bf16.mxu0 %v5460_v24  ;;  %v679_v63 = vrot.slane %v666_v56, %v6173_v26  ;;  %v776_v3 = vrot.slane %v767_v61, %v6189_v33  ;;  %v772_v4 = vrot.slane %v767_v61, %v6187_v31  ;;  %v1688_v18 = vld [vmem:[#allocation10] sm:$0xf]  ;;  %v1241_v34 = vld [vmem:[#allocation2 + $0x28] sm:$0xff]  ;;  %vm831_vm3 = vcmask 1045504  }
  0x70   :  { %417 = vmatprep.subr.bf16.mxu1 %v5462_v25  ;;  %1405 = vrot.lane.b32.xlu0 %v1394_v46, %s5965_s23  ;;  %v780_v5 = vrot.slane %v767_v61, %v6173_v26  ;;  %v605_v6 = vrot.slane %v600_v2, %v6187_v31  ;;  %v609_v8 = vrot.slane %v600_v2, %v6189_v33  ;;  %v1242_v36 = vld [vmem:[#allocation2 + $0x58] sm:$0xff]  ;;  %vm626_vm4 = vcmask 785408  }
  0x71   :  { %v613_v9 = vrot.slane %v600_v2, %v6173_v26  ;;  %v784_v10 = vrot.slane %v767_v61, %v6215_v47  ;;  %v617_v11 = vrot.slane %v600_v2, %v6215_v47  ;;  %v6266_v12 = vrot.slane %v888_v7, %v6189_v33  ;;  %133 = vst.msk [vmem:[#allocation2 + $0xb8] sm:$0x1] %vm132_vm1, %v5970_v1  ;;  %v137_v2 = vld [vmem:[#allocation4 + $0x18] sm:$0xff] }
  0x72   :  { %365 = vmatpush1.bf16.msra.mxu0 %v5464_v27  ;;  %1268 = vrot.lane.b32.xlu1 %v1259_v48, %s5965_s23  ;;  %v6269_v13 = vrot.slane %v888_v7, %v6187_v31  ;;  %v6272_v14 = vrot.slane %v888_v7, %v6215_v47  ;;  %v6279_v17 = vrot.slane %v888_v7, %v6173_v26  ;;  %v1243_v43 = vld [vmem:[#allocation2 + $0x88] sm:$0xff]  ;;  %vm1341_vm5 = vcmask 523264  }
  0x73   :  { %418 = vmatpush1.bf16.msra.mxu1 %v5465_v28  ;;  %366 = vmatprep.subr.bf16.mxu0 %v5466_v29  ;;  %v911_v15 = vmul.f32 0.0, %v6266_v12  ;;  %v1697_v21 = vrot.slane %v1688_v18, %v6189_v33  ;;  %v1693_v22 = vrot.slane %v1688_v18, %v6187_v31  ;;  %vm1857_vm6 = vcmask 1040384  }
  0x74   :  { %419 = vmatprep.subr.bf16.mxu1 %v5468_v30  ;;  %1266 = vrot.lane.b32.xlu0 %v1255_v49, %s5965_s23  ;;  %v910_v16 = vmul.f32 0.0, %v6269_v13  ;;  %v913_v19 = vmul.f32 0.0, %v6272_v14  ;;  %v912_v20 = vmul.f32 0.0, %v6279_v17  ;;  %vm1893_vm7 = vcmask 1048320  }
  0x75   :  { %vm2345_vm8 = vcmask 1043456   ;;  %vm2341_vm9 = vcmask 64512  }
  0x76   :  { %367 = vmatpush1.bf16.msra.mxu0 %v5470_v37  ;;  %1270 = vrot.lane.b32.xlu1 %v1263_v52, %s5965_s23 }
  0x77   :  { %420 = vmatpush1.bf16.msra.mxu1 %v5471_v38  ;;  %368 = vmatprep.subr.bf16.mxu0 %v5472_v39 }
  0x78   :  { %421 = vmatprep.subr.bf16.mxu1 %v5474_v40  ;;  %1409 = vrot.lane.b32.xlu0 %v1402_v53, %s5965_s23  ;;  %v1244_v56 = vld [vmem:[#allocation2 + $0xb8] sm:$0x1] }
  0x7a   :  { %369 = vmatpush1.bf16.msra.mxu0 %v5476_v41  ;;  %1547 = vrot.lane.b32.xlu1 %v1536_v55, %s5965_s23 }
  0x7b   :  { %422 = vmatpush1.bf16.msra.mxu1 %v5477_v42 }
  0x7c   :  { %1545 = vrot.lane.b32.xlu0 %v1532_v54, %s5965_s23 }
  0x7d   :  { %387 = vmatmul.mubr.bf16.vlgmr.msra.gmra.mrb[0].mxu0 %v138_v50 }
  0x7e   :  { %440 = vmatmul.mubr.bf16.vlgmr.msra.gmra.mrb[0].mxu1 %v138_v50  ;;  %396 = vmatprep.mubr.bf16.mxu0 %v9187_v0 }
  0x7f   :  { %449 = vmatprep.mubr.bf16.mxu1 %v9187_v0  ;;  %1551 = vrot.lane.b32.xlu1 %v1544_v58, %s5965_s23 }
  0x80   :  { %1549 = vrot.lane.b32.xlu0 %v1540_v57, %s5965_s23 }
  0x83   :  { %686 = vrot.lane.b32.xlu1 %v675_v59, %s5971_s1 }
  0x84   :  { %684 = vrot.lane.b32.xlu0 %v671_v60, %s5971_s1 }
  0x87   :  { %690 = vrot.lane.b32.xlu1 %v683_v62, %s5971_s1 }
  0x88   :  { %688 = vrot.lane.b32.xlu0 %v679_v63, %s5971_s1  ;;  %v136_v63 = vld [vmem:[#allocation4 + $0x10] sm:$0xff] }
  0x8b   :  { %787 = vrot.lane.b32.xlu1 %v776_v3, %s5971_s1  ;;  %v139_v3 = vpack.c.bf16 %v137_v2, %v136_v63 }
  0x8c   :  { %785 = vrot.lane.b32.xlu0 %v772_v4, %s5971_s1 }
  0x8d   :  { %397 = vmatmul.mubr.bf16.gmra.mrb[4].mxu0 %v139_v3  ;;  %450 = vmatmul.mubr.bf16.gmra.mrb[4].mxu1 %v139_v3 }
  0x8f   :  { %618 = vrot.lane.b32.xlu1 %v605_v6, %s5971_s1 }
  0x90   :  { %789 = vrot.lane.b32.xlu0 %v780_v5, %s5971_s1  ;;  %v172_v5 = vld [vmem:[#allocation7] sm:$0xf] }
  0x91   :  { %v6344_v6 = vrot.slane %v172_v5, %v6187_v31  ;;  %v6347_v7 = vrot.slane %v172_v5, %v6173_v26 }
  0x93   :  { %622 = vrot.lane.b32.xlu1 %v613_v9, %s5971_s1  ;;  %9317 = vst [vmem:[#allocation27_spill] sm:$0xff] %v6344_v6  ;;  %9318 = vst [vmem:[#allocation28_spill] sm:$0xff] %v6347_v7  ;;  %v6353_v9 = vrot.slane %v172_v5, %v6215_v47 }
  0x94   :  { %620 = vrot.lane.b32.xlu0 %v609_v8, %s5971_s1  ;;  %v6350_v8 = vrot.slane %v172_v5, %v6189_v33 }
  0x95   :  { %9320 = vst [vmem:[#allocation30_spill] sm:$0xff] %v6353_v9 }
  0x96   :  { %9319 = vst [vmem:[#allocation29_spill] sm:$0xff] %v6350_v8 }
  0x97   :  { %624 = vrot.lane.b32.xlu1 %v617_v11, %s5971_s1 }
  0x98   :  { %791 = vrot.lane.b32.xlu0 %v784_v10, %s5971_s1 }
  0x9b   :  { %936 = vrot.lane.b32.xlu1 %v911_v15, %s5971_s1 }
  0x9c   :  { %934 = vrot.lane.b32.xlu0 %v910_v16, %s5971_s1 }
  0x9f   :  { %940 = vrot.lane.b32.xlu1 %v913_v19, %s5971_s1 }
  0xa0   :  { %938 = vrot.lane.b32.xlu0 %v912_v20, %s5971_s1 }
  0xa3   :  { %1706 = vrot.lane.b32.xlu1 %v1693_v22, %s5971_s1 }
  0xa4   :  { %1708 = vrot.lane.b32.xlu0 %v1697_v21, %s5971_s1 }
  0xdc   :  { %v6292_v23 = vpop.permute.xlu1 %1407 }
  0xde   :  { %v6294_v24 = vpop.permute.xlu0 %1403 }
  0xe0   :  { %v6296_v25 = vpop.permute.xlu1 %1264 }
  0xe1   :  { %9312 = vst [vmem:[#allocation22_spill] sm:$0xff] %v6296_v25  ;;  %v1281_v28 = vmul.f32 0.0, %v6296_v25 }
  0xe2   :  { %v6298_v27 = vpop.permute.xlu0 %1405 }
  0xe3   :  { %1311 = vrot.lane.b32.xlu0 %v1281_v28, %s5967_s3 }
  0xe4   :  { %v1269_v29 = vpop.permute.xlu1 %1268 }
  0xe6   :  { %v1267_v30 = vpop.permute.xlu0 %1266 }
  0xe7   :  { %v6304_v32 = vsel %vm113_vm0, %v6296_v25, %v1267_v30  ;;  %v6322_v49 = vsel %vm113_vm0, %v1267_v30, %v1269_v29 }
  0xe8   :  { %9313 = vst [vmem:[#allocation23_spill] sm:$0xff] %v6304_v32  ;;  %v1282_v1 = vmul.f32 0.0, %v6304_v32  ;;  %v1271_v35 = vpop.permute.xlu1 %1270  ;;  %9315 = vst [vmem:[#allocation25_spill] sm:$0xff] %v6322_v49  ;;  %v1283_v52 = vmul.f32 0.0, %v6322_v49 }
  0xe9   :  { %v1285_v37 = vmul.f32 %v1271_v35, %v1241_v34  ;;  %v6311_v39 = vsel %vm113_vm0, %v1269_v29, %v1271_v35  ;;  %v1290_v42 = vmul.f32 %v1271_v35, %v1242_v36  ;;  %v1295_v48 = vmul.f32 %v1271_v35, %v1243_v43 }
  0xea   :  { %1313 = vrot.lane.b32.xlu1 %v1282_v1, %s5967_s3  ;;  %v6308_v38 = vpop.permute.xlu0 %1409  ;;  %9314 = vst [vmem:[#allocation24_spill] sm:$0xff] %v6311_v39  ;;  %v1284_v40 = vmul.f32 0.0, %v6311_v39 }
  0xeb   :  { %v1423_v41 = vmul.f32 %v6308_v38, %v1242_v36  ;;  %1319 = vrot.lane.b32.xlu0 %v1285_v37, %s5967_s3  ;;  %v1428_v46 = vmul.f32 %v6308_v38, %v1243_v43 }
  0xec   :  { %v6316_v44 = vpop.permute.xlu1 %1547 }
  0xed   :  { %v1443_v45 = vrot.slane %v1423_v41, 1  ;;  %v1452_v50 = vrot.slane %v1428_v46, 1 }
  0xee   :  { %1317 = vrot.lane.b32.xlu1 %v1284_v40, %s5967_s3  ;;  %v6341_v4 = vpop.permute.xlu0 %1545 }
  0xef   :  { %1329 = vrot.lane.b32.xlu0 %v1290_v42, %s5967_s3  ;;  %v1453_v55 = vsel %vm720_vm2, %v1443_v45, %v1452_v50  ;;  %9316 = vst [vmem:[#allocation26_spill] sm:$0xff] %v6341_v4 }
  0xf1   :  { %v6325_v51 = vpop.permute.xlu1 %1551 }
  0xf2   :  { %1462 = vrot.lane.b32.xlu1 %v1443_v45, %s5967_s3  ;;  %v1565_v53 = vmul.f32 %v6325_v51, %v1242_v36  ;;  %v1570_v54 = vmul.f32 %v6325_v51, %v1243_v43  ;;  %v1575_v59 = vmul.f32 %v6325_v51, %v1244_v56  ;;  %v6355_v10 = vpop.permute.xlu0 %1549 }
  0xf3   :  { %1339 = vrot.lane.b32.xlu0 %v1295_v48, %s5967_s3 }
  0xf4   :  { %v1595_v57 = vrot.slane %v1565_v53, 2  ;;  %v1604_v58 = vrot.slane %v1570_v54, 2  ;;  %v1614_v61 = vrot.slane %v1575_v59, 2 }
  0xf5   :  { %v687_v53 = vpop.permute.xlu1 %686 }
  0xf6   :  { %1482 = vrot.lane.b32.xlu1 %v1452_v50, %s5967_s3  ;;  %v1605_v60 = vsel %vm831_vm3, %v1595_v57, %v1604_v58  ;;  %v1615_v62 = vsel %vm831_vm3, %v1604_v58, %v1614_v61 }
  0xf7   :  { %1315 = vrot.lane.b32.xlu0 %v1283_v52, %s5967_s3  ;;  %v6389_v52 = vpop.permute.xlu0 %684 }
  0xf8   :  { %9321 = vst [vmem:[#allocation31_spill] sm:$0xff] %v6389_v52 }
  0xf9   :  { %v6393_v56 = vpop.permute.xlu1 %690 }
  0xfa   :  { %1472 = vrot.lane.b32.xlu1 %v1453_v55, %s5967_s3 }
  0xfb   :  { %1624 = vrot.lane.b32.xlu0 %v1595_v57, %s5967_s3  ;;  %v6391_v54 = vpop.permute.xlu0 %688 }
  0xff   :  { %1634 = vrot.lane.b32.xlu0 %v1605_v60, %s5967_s3  ;;  %v6395_v5 = vpop.permute.xlu0 %785 }
 0x100   :  { %9322 = vst [vmem:[#allocation32_spill] sm:$0xff] %v6395_v5 }
 0x103   :  { %1644 = vrot.lane.b32.xlu0 %v1615_v62, %s5967_s3 }
 0x150   :  { %v388_v11 = vpop.f32.mrb[0].mxu0 }
 0x151   :  { %v441_v15 = vpop.f32.mrb[0].mxu1  ;;  %v6358_v16 = vadd.f32 %v388_v11, %v6344_v6  ;;  %v390_v19 = vpop.f32.mrb[1].mxu0 }
 0x152   :  { %v6361_v18 = vadd.f32 %v441_v15, %v6347_v7  ;;  %v443_v20 = vpop.f32.mrb[1].mxu1  ;;  %v6364_v21 = vadd.f32 %v390_v19, %v6350_v8  ;;  %v392_v28 = vpop.f32.mrb[2].mxu0 }
 0x153   :  { %v6367_v22 = vadd.f32 %v443_v20, %v6353_v9  ;;  %v445_v29 = vpop.f32.mrb[2].mxu1  ;;  %v5052_v30 = vmul.f32 -1.442695, %v6358_v16  ;;  %v6372_v1 = vadd.f32 %v392_v28, %v6344_v6  ;;  %v394_v36 = vpop.f32.mrb[3].mxu0 }
 0x154   :  { %v5054_v34 = vmul.f32 -1.442695, %v6361_v18  ;;  %v6375_v35 = vadd.f32 %v445_v29, %v6347_v7  ;;  %v447_v37 = vpop.f32.mrb[3].mxu1  ;;  %v5053_v40 = vmul.f32 -1.442695, %v6364_v21  ;;  %v6380_v42 = vadd.f32 %v394_v36, %v6350_v8  ;;  %v788_v19 = vpop.permute.xlu1 %787 }
 0x155   :  { %v5055_v41 = vmul.f32 -1.442695, %v6367_v22  ;;  %v6383_v43 = vadd.f32 %v447_v37, %v6353_v9  ;;  %5578 = vpow2.f32 %v5052_v30  ;;  %v5056_v45 = vmul.f32 -1.442695, %v6372_v1 }
 0x156   :  { %5580 = vpow2.f32 %v5054_v34  ;;  %v5058_v46 = vmul.f32 -1.442695, %v6375_v35  ;;  %v5057_v48 = vmul.f32 -1.442695, %v6380_v42  ;;  %v6397_v34 = vpop.permute.xlu0 %789 }
 0x157   :  { %5582 = vpow2.f32 %v5053_v40  ;;  %v5059_v50 = vmul.f32 -1.442695, %v6383_v43  ;;  %v998_v37 = vld [vmem:[#allocation9 + $0x4] ss:$8 sm:$0xf] }
 0x158   :  { %5584 = vpow2.f32 %v5055_v41  ;;  %v6399_v36 = vpop.permute.xlu1 %618  ;;  %v6404_v41 = vsel %vm113_vm0, %v6298_v27, %v6292_v23 }
 0x159   :  { %5586 = vpow2.f32 %v5056_v45  ;;  %9323 = vst [vmem:[#allocation33_spill] sm:$0xff] %v6399_v36 }
 0x15a   :  { %5588 = vpow2.f32 %v5058_v46 }
 0x15b   :  { %5590 = vpow2.f32 %v5057_v48  ;;  %v6412_v48 = vsel %vm113_vm0, %v6341_v4, %v6316_v44 }
 0x15c   :  { %5592 = vpow2.f32 %v5059_v50  ;;  %9324 = vst [vmem:[#allocation34_spill] sm:$0xff] %v6412_v48  ;;  %v1112_v50 = vld [vmem:[#allocation9 + $0x7] ss:$8 sm:$0xf] }
 0x15f   :  { %v5579_v55 = vpop.eup %5578 }
 0x160   :  { %v5581_v57 = vpop.eup %5580  ;;  %v508_v58 = vadd.f32 1.0, %v5579_v55  ;;  %v6417_v55 = vsel %vm113_vm0, %v6294_v24, %v6298_v27  ;;  %v6437_v27 = vrot.slane %v998_v37, %v6173_v26 }
 0x161   :  { %v5583_v59 = vpop.eup %5582  ;;  %v510_v60 = vadd.f32 1.0, %v5581_v57  ;;  %v6422_v57 = vsel %vm113_vm0, %v6292_v23, %v6308_v38 }
 0x162   :  { %v5585_v61 = vpop.eup %5584  ;;  %5594 = vrcp.f32 %v508_v58  ;;  %v509_v62 = vadd.f32 1.0, %v5583_v59  ;;  %v6424_v58 = vld [vmem:[#allocation2 + $0x98] sm:$0x1]  ;;  %v6429_v59 = vsel %vm113_vm0, %v6316_v44, %v6355_v10 }
 0x163   :  { %v5587_v63 = vpop.eup %5586  ;;  %5596 = vrcp.f32 %v510_v60  ;;  %v511_v15 = vadd.f32 1.0, %v5585_v61  ;;  %9325 = vst [vmem:[#allocation35_spill] sm:$0xff] %v6424_v58  ;;  %9326 = vst [vmem:[#allocation36_spill] sm:$0xff] %v6429_v59  ;;  %v692_v60 = vsel %vm626_vm4, %v6389_v52, %v687_v53  ;;  %v6434_v61 = vrot.slane %v998_v37, %v6187_v31 }
 0x164   :  { %v5589_v2 = vpop.eup %5588  ;;  %5598 = vrcp.f32 %v509_v62  ;;  %v512_v3 = vadd.f32 1.0, %v5587_v63  ;;  %v6447_v62 = vsel %vm626_vm4, %v6395_v5, %v788_v19  ;;  %v6507_v5 = vrot.slane %v1112_v50, %v6189_v33 }
 0x165   :  { %v5591_v11 = vpop.eup %5590  ;;  %v514_v28 = vadd.f32 1.0, %v5589_v2  ;;  %v693_v2 = vsel %vm626_vm4, %v687_v53, %v6391_v54  ;;  %v794_v53 = vsel %vm626_vm4, %v788_v19, %v6397_v34  ;;  %v6490_v19 = vrot.slane %v998_v37, %v6189_v33 }
 0x166   :  { %v5593_v20 = vpop.eup %5592  ;;  %5600 = vrcp.f32 %v512_v3  ;;  %v513_v29 = vadd.f32 1.0, %v5591_v11  ;;  %v621_v3 = vpop.permute.xlu0 %620  ;;  %v6454_v11 = vrot.slane %v1112_v50, %v6187_v31  ;;  %v6510_v52 = vrot.slane %v1112_v50, %v6215_v47 }
 0x167   :  { %v515_v30 = vadd.f32 1.0, %v5593_v20  ;;  %v6466_v20 = vld [vmem:[#allocation2 + $0xa0] sm:$0x1] }
 0x168   :  { %5602 = vrcp.f32 %v513_v29  ;;  %9327 = vst [vmem:[#allocation37_spill] sm:$0xff] %v6454_v11  ;;  %9330 = vst [vmem:[#allocation40_spill] sm:$0xff] %v6466_v20  ;;  %v623_v29 = vpop.permute.xlu1 %622 }
 0x169   :  { %5604 = vrcp.f32 %v511_v15  ;;  %v6519_v8 = vsel %vm626_vm4, %v621_v3, %v623_v29 }
 0x16a   :  { %5606 = vrcp.f32 %v514_v28  ;;  %9338 = vst [vmem:[#allocation48_spill] sm:$0xff] %v6519_v8  ;;  %v792_v6 = vpop.permute.xlu0 %791 }
 0x16b   :  { %5608 = vrcp.f32 %v515_v30  ;;  %v6477_v30 = vsel %vm113_vm0, %v6355_v10, %v6325_v51 }
 0x16c   :  { %v5595_v40 = vpop.eup %5594  ;;  %9332 = vst [vmem:[#allocation42_spill] sm:$0xff] %v6477_v30 }
 0x16d   :  { %v5597_v45 = vpop.eup %5596  ;;  %v6407_v46 = vmul.f32 %v5595_v40, %v6358_v16 }
 0x16e   :  { %v5599_v16 = vpop.eup %5598  ;;  %v6440_v23 = vmul.f32 %v5597_v45, %v6361_v18  ;;  %v6457_v18 = vrot.slane %v1112_v50, %v6173_v26  ;;  %v6483_v45 = vmul.f32 %v794_v53, %v6466_v20  ;;  %v6541_v50 = vpop.permute.xlu1 %624 }
 0x16f   :  { %v6443_v38 = vmul.f32 %v5599_v16, %v6364_v21  ;;  %v914_v44 = vmul.f32 %v6269_v13, %v6407_v46  ;;  %v6461_v21 = vmul.f32 %v6447_v62, %v6424_v58  ;;  %v6469_v28 = vmul.f32 %v692_v60, %v6407_v46  ;;  %9342 = vst [vmem:[#allocation50_spill] sm:$0xff] %v6541_v50 }
 0x170   :  { %v5601_v63 = vpop.eup %5600  ;;  %9328 = vst [vmem:[#allocation38_spill] sm:$0xff] %v6457_v18  ;;  %9333 = vst [vmem:[#allocation43_spill] sm:$0xff] %v6483_v45  ;;  %v6487_v16 = vsel %vm626_vm4, %v6399_v36, %v621_v3  ;;  %v6504_v36 = vrot.slane %v998_v37, %v6215_v47 }
 0x171   :  { %9329 = vst [vmem:[#allocation39_spill] sm:$0xff] %v6461_v21  ;;  %v6464_v15 = vmul.f32 %v5601_v63, %v6372_v1  ;;  %9331 = vst [vmem:[#allocation41_spill] sm:$0xff] %v6469_v28  ;;  %942 = vrot.lane.b32.xlu1 %v914_v44, %s5971_s1  ;;  %v694_v1 = vsel %vm626_vm4, %v6391_v54, %v6393_v56  ;;  %v6499_v10 = vmul.f32 %v693_v2, %v6443_v38 }
 0x172   :  { %v5603_v40 = vpop.eup %5602  ;;  %9334 = vst [vmem:[#allocation44_spill] sm:$0xff] %v6487_v16  ;;  %v916_v54 = vmul.f32 %v6279_v17, %v6440_v23  ;;  %v642_v9 = vmul.f32 %v6519_v8, %v6443_v38  ;;  %v1287_v45 = vmul.f32 %v6304_v32, %v6443_v38 }
 0x173   :  { %v5605_v44 = vpop.eup %5604  ;;  %v6493_v63 = vmul.f32 %v5603_v40, %v6380_v42  ;;  %v6496_v51 = vmul.f32 %v692_v60, %v6464_v15  ;;  %9336 = vst [vmem:[#allocation46_spill] sm:$0xff] %v6499_v10  ;;  %v641_v42 = vmul.f32 %v6487_v16, %v6407_v46  ;;  %v6528_v40 = vld [vmem:[#allocation2 + $0xb0] sm:$0x1] }
 0x174   :  { %v5607_v0 = vpop.eup %5606  ;;  %v6523_v37 = vmul.f32 %v5605_v44, %v6367_v22  ;;  %9339 = vst [vmem:[#allocation49_spill] sm:$0xff] %v6528_v40  ;;  %v9341_v22 = vrot.slane %v6469_v28, 1  ;;  %v6545_v33 = vmul.f32 %v6510_v52, %v6528_v40  ;;  %v6558_v28 = vmul.f32 %v694_v1, %v6440_v23 }
 0x175   :  { %9335 = vst [vmem:[#allocation45_spill] sm:$0xff] %v6496_v51  ;;  %v5609_v60 = vpop.eup %5608  ;;  %v6516_v7 = vmul.f32 %v693_v2, %v6493_v63  ;;  %946 = vrot.lane.b32.xlu1 %v916_v54, %s5971_s1  ;;  %v6532_v2 = vmul.f32 %v6507_v5, %v6466_v20  ;;  %v9340_v54 = vrot.slane %v6496_v51, 1  ;;  %v6548_v31 = vmul.f32 %v5607_v0, %v6375_v35 }
 0x176   :  { %v6551_v26 = vmul.f32 %v5609_v60, %v6383_v43  ;;  %9343 = vst [vmem:[#allocation51_spill] sm:$0xff] %v6558_v28  ;;  %v795_v0 = vsel %vm626_vm4, %v6397_v34, %v792_v6  ;;  %v6568_v35 = vmul.f32 %v792_v6, %v6528_v40  ;;  %v6570_v43 = vld [vmem:[#allocation2 + $0xa8] sm:$0x1]  ;;  %v6587_v34 = vmul.f32 %v6447_v62, %v6464_v15 }
 0x177   :  { %9337 = vst [vmem:[#allocation47_spill] sm:$0xff] %v6516_v7  ;;  %v729_v44 = vsel %vm720_vm2, %v9341_v22, %v9340_v54  ;;  %v9344_v54 = vrot.slane %v6516_v7, 1  ;;  %v9345_v22 = vrot.slane %v6499_v10, 1  ;;  %9347 = vst [vmem:[#allocation53_spill] sm:$0xff] %v6570_v43  ;;  %v915_v10 = vmul.f32 %v6266_v12, %v6443_v38 }
 0x178   :  { %v6553_v3 = vadd.f32 %v729_v44, %v641_v42  ;;  %9346 = vst [vmem:[#allocation52_spill] sm:$0xff] %v6568_v35  ;;  %v6574_v42 = vmul.f32 %v6393_v56, %v6523_v37  ;;  %v6580_v44 = vsel %vm626_vm4, %v623_v29, %v6541_v50  ;;  %v6600_v29 = vmul.f32 %v694_v1, %v6548_v31 }
 0x179   :  { %v731_v47 = vsel %vm720_vm2, %v9345_v22, %v9344_v54  ;;  %v6583_v54 = vmul.f32 %v795_v0, %v6570_v43  ;;  %v6590_v22 = vmul.f32 %v794_v53, %v6443_v38  ;;  %v6604_v40 = vmul.f32 %v6447_v62, %v6407_v46  ;;  %944 = vrot.lane.b32.xlu0 %v915_v10, %s5971_s1 }
 0x17a   :  { %9348 = vst [vmem:[#allocation54_spill] sm:$0xff] %v6574_v42  ;;  %v6576_v60 = vadd.f32 %v731_v47, %v642_v9  ;;  %v6597_v9 = vmul.f32 %v6393_v56, %v6551_v26  ;;  %v6609_v58 = vmul.f32 %v794_v53, %v6493_v63  ;;  %v6612_v47 = vmul.f32 %v795_v0, %v6548_v31 }
 0x17b   :  { %9349 = vst [vmem:[#allocation55_spill] sm:$0xff] %v6583_v54  ;;  %9350 = vst [vmem:[#allocation56_spill] sm:$0xff] %v6590_v22  ;;  %v1286_v56 = vmul.f32 %v6296_v25, %v6407_v46  ;;  %v6619_v62 = vmul.f32 %v792_v6, %v6551_v26  ;;  %v6622_v20 = vmul.f32 %v792_v6, %v6523_v37 }
 0x17c   :  { %9351 = vst [vmem:[#allocation57_spill] sm:$0xff] %v6604_v40  ;;  %v6625_v43 = vmul.f32 %v795_v0, %v6440_v23  ;;  %v6629_v53 = vmul.f32 %v6412_v48, %v6493_v63  ;;  %v917_v1 = vmul.f32 %v6272_v14, %v6523_v37  ;;  %v6640_v0 = vmul.f32 %v6487_v16, %v6464_v15 }
 0x17d   :  { %9352 = vst [vmem:[#allocation58_spill] sm:$0xff] %v6622_v20  ;;  %1321 = vrot.lane.b32.xlu1 %v1286_v56, %s5967_s3  ;;  %v6644_v21 = vmul.f32 %v6519_v8, %v6493_v63  ;;  %v6650_v54 = vmul.f32 %v6541_v50, %v6523_v37  ;;  %v1288_v56 = vmul.f32 %v6322_v49, %v6440_v23 }
 0x17e   :  { %9353 = vst [vmem:[#allocation59_spill] sm:$0xff] %v6625_v43  ;;  %9354 = vst [vmem:[#allocation60_spill] sm:$0xff] %v6629_v53  ;;  %948 = vrot.lane.b32.xlu0 %v917_v1, %s5971_s1  ;;  %v1419_v10 = vmul.f32 %v6294_v24, %v6407_v46  ;;  %v1020_v1 = vmul.f32 %v6434_v61, %v6407_v46  ;;  %v1421_v25 = vmul.f32 %v6404_v41, %v6440_v23 }
 0x17f   :  { %9355 = vst [vmem:[#allocation61_spill] sm:$0xff] %v6640_v0  ;;  %9356 = vst [vmem:[#allocation62_spill] sm:$0xff] %v6644_v21  ;;  %v918_v6 = vmul.f32 %v6269_v13, %v6464_v15  ;;  %v6672_v8 = vmul.f32 %v6437_v27, %v6440_v23  ;;  %v6676_v16 = vmul.f32 %v6454_v11, %v6407_v46 }
 0x180   :  { %v1289_v32 = vmul.f32 %v6311_v39, %v6523_v37  ;;  %v6687_v13 = vmul.f32 %v6490_v19, %v6443_v38  ;;  %v6691_v49 = vmul.f32 %v6504_v36, %v6523_v37  ;;  %v6695_v50 = vmul.f32 %v6507_v5, %v6443_v38 }
 0x181   :  { %1325 = vrot.lane.b32.xlu1 %v1288_v56, %s5967_s3  ;;  %v6680_v56 = vmul.f32 %v6457_v18, %v6440_v23  ;;  %v920_v35 = vmul.f32 %v6279_v17, %v6548_v31  ;;  %v6703_v39 = vmul.f32 %v6341_v4, %v6407_v46  ;;  %v6707_v7 = vmul.f32 %v6510_v52, %v6523_v37 }
 0x182   :  { %1323 = vrot.lane.b32.xlu0 %v1287_v45, %s5967_s3  ;;  %v919_v45 = vmul.f32 %v6266_v12, %v6493_v63  ;;  %v1439_v21 = vrot.slane %v1419_v10, 1  ;;  %v1036_v51 = vrot.slane %v1020_v1, 1  ;;  %v1441_v0 = vrot.slane %v1421_v25, 1 }
 0x183   :  { %v6712_v53 = vmul.f32 %v6429_v59, %v6440_v23  ;;  %v1038_v17 = vrot.slane %v6672_v8, 1  ;;  %v6718_v46 = vmul.f32 %v6272_v14, %v6551_v26  ;;  %v6727_v1 = vmul.f32 %v6434_v61, %v6464_v15 }
 0x184   :  { %v6733_v14 = vmul.f32 %v6437_v27, %v6548_v31  ;;  %v6743_v61 = vmul.f32 %v6417_v55, %v6443_v38  ;;  %v6747_v8 = vmul.f32 %v6422_v57, %v6523_v37  ;;  %v6758_v10 = vmul.f32 %v6404_v41, %v6548_v31 }
 0x185   :  { %1327 = vrot.lane.b32.xlu1 %v1289_v32, %s5967_s3  ;;  %v9234_v12 = vrot.slane %v6727_v1, 1  ;;  %v6763_v32 = vmul.f32 %v6457_v18, %v6548_v31  ;;  %v6772_v27 = vmul.f32 %v6490_v19, %v6493_v63  ;;  %v6776_v25 = vmul.f32 %v6417_v55, %v6493_v63 }
 0x186   :  { %950 = vrot.lane.b32.xlu0 %v918_v6, %s5971_s1  ;;  %v6737_v6 = vmul.f32 %v6294_v24, %v6464_v15  ;;  %v6754_v24 = vmul.f32 %v6454_v11, %v6464_v15  ;;  %v6793_v55 = vmul.f32 %v6412_v48, %v6443_v38  ;;  %v6797_v19 = vmul.f32 %v6477_v30, %v6523_v37 }
 0x187   :  { %v6768_v20 = vsel %vm720_vm2, %v1036_v51, %v9234_v12  ;;  %v9360_v12 = vrot.slane %v6733_v14, 1  ;;  %v6810_v38 = vmul.f32 %v6504_v36, %v6551_v26  ;;  %v9362_v41 = vrot.slane %v6676_v16, 2 }
 0x188   :  { %9357 = vst [vmem:[#allocation63_spill] sm:$0xff] %v6768_v20  ;;  %v9358_v18 = vrot.slane %v6737_v6, 1  ;;  %v9365_v37 = vrot.slane %v6680_v56, 2 }
 0x189   :  { %1454 = vrot.lane.b32.xlu1 %v1439_v21, %s5967_s3  ;;  %v6788_v20 = vsel %vm720_vm2, %v1038_v17, %v9360_v12 }
 0x18a   :  { %954 = vrot.lane.b32.xlu0 %v920_v35, %s5971_s1  ;;  %v9235_v35 = vrot.slane %v6758_v10, 1  ;;  %v6783_v11 = vsel %vm720_vm2, %v1439_v21, %v9358_v18  ;;  %v6816_v18 = vmul.f32 %v6422_v57, %v6551_v26  ;;  %v9361_v21 = vrot.slane %v6754_v24, 2 }
 0x18b   :  { %9359 = vst [vmem:[#allocation64_spill] sm:$0xff] %v6783_v11  ;;  %v6839_v11 = vmul.f32 %v6429_v59, %v6548_v31  ;;  %v9370_v59 = vrot.slane %v6810_v38, 1 }
 0x18c   :  { %v6805_v12 = vsel %vm720_vm2, %v1441_v0, %v9235_v35  ;;  %v6827_v35 = vmul.f32 %v6341_v4, %v6464_v15  ;;  %v9371_v4 = vrot.slane %v6691_v49, 1 }
 0x18d   :  { %1458 = vrot.lane.b32.xlu1 %v1441_v0, %s5967_s3  ;;  %v6823_v0 = vsel %vm831_vm3, %v9362_v41, %v9361_v21  ;;  %v9367_v41 = vrot.slane %v6772_v27, 1  ;;  %v9368_v21 = vrot.slane %v6687_v13, 1 }
 0x18e   :  { %1048 = vrot.lane.b32.xlu0 %v1036_v51, %s5971_s1  ;;  %9363 = vst [vmem:[#allocation65_spill] sm:$0xff] %v6823_v0  ;;  %v9364_v51 = vrot.slane %v6763_v32, 2  ;;  %v9376_v0 = vrot.slane %v6743_v61, 1 }
 0x18f   :  { %v6846_v48 = vsel %vm720_vm2, %v9368_v21, %v9367_v41  ;;  %v6861_v41 = vsel %vm720_vm2, %v9371_v4, %v9370_v59  ;;  %v9374_v21 = vrot.slane %v6604_v40, 2  ;;  %v9378_v4 = vrot.slane %v6827_v35, 2 }
 0x190   :  { %v6835_v57 = vsel %vm831_vm3, %v9365_v37, %v9364_v51  ;;  %9369 = vst [vmem:[#allocation67_spill] sm:$0xff] %v6846_v48  ;;  %v1139_v37 = vmul.f32 %v6507_v5, %v6493_v63  ;;  %v1141_v51 = vmul.f32 %v6510_v52, %v6551_v26  ;;  %9372 = vst [vmem:[#allocation68_spill] sm:$0xff] %v6861_v41  ;;  %v9375_v5 = vrot.slane %v6776_v25, 1 }
 0x191   :  { %9366 = vst [vmem:[#allocation66_spill] sm:$0xff] %v6835_v57  ;;  %952 = vrot.lane.b32.xlu1 %v919_v45, %s5971_s1  ;;  %v9373_v45 = vrot.slane %v6587_v34, 2  ;;  %v6878_v57 = vmul.f32 %v6477_v30, %v6551_v26  ;;  %v9379_v59 = vrot.slane %v6703_v39, 2  ;;  %v1592_v41 = vrot.slane %v6793_v55, 2 }
 0x192   :  { %v6873_v52 = vsel %vm720_vm2, %v9376_v0, %v9375_v5  ;;  %1052 = vrot.lane.b32.xlu0 %v1038_v17, %s5971_s1  ;;  %v9380_v0 = vrot.slane %v6839_v11, 2  ;;  %v9381_v5 = vrot.slane %v6712_v53, 2  ;;  %v9384_v48 = vrot.slane %v6747_v8, 1 }
 0x193   :  { %v840_v36 = vsel %vm831_vm3, %v9374_v21, %v9373_v45  ;;  %9377 = vst [vmem:[#allocation69_spill] sm:$0xff] %v6873_v52  ;;  %v6885_v40 = vsel %vm831_vm3, %v9379_v59, %v9378_v4  ;;  %v1164_v45 = vrot.slane %v1139_v37, 2  ;;  %v1168_v21 = vrot.slane %v1141_v51, 2 }
 0x194   :  { %v6893_v17 = vsel %vm831_vm3, %v9381_v5, %v9380_v0  ;;  %v6896_v30 = vadd.f32 %v840_v36, %v6553_v3  ;;  %v9383_v52 = vrot.slane %v6816_v18, 1  ;;  %v9386_v55 = vrot.slane %v6532_v2, 2 }
 0x195   :  { %956 = vrot.lane.b32.xlu1 %v6718_v46, %s5971_s1  ;;  %v9387_v51 = vrot.slane %v6695_v50, 2  ;;  %v9389_v36 = vrot.slane %v6545_v33, 2  ;;  %v9392_v2 = vrot.slane %v6609_v58, 2  ;;  %v9393_v46 = vrot.slane %v6590_v22, 2  ;;  %v9403_v22 = vld [vmem:[#allocation58_spill] sm:$0xff] }
 0x196   :  { %9382 = vst [vmem:[#allocation70_spill] sm:$0xff] %v6896_v30  ;;  %v6903_v4 = vsel %vm720_vm2, %v9384_v48, %v9383_v52  ;;  %v6910_v37 = vsel %vm831_vm3, %v1164_v45, %v9386_v55  ;;  %v9390_v48 = vrot.slane %v6707_v7, 2  ;;  %v9394_v5 = vrot.slane %v6600_v29, 1 }
 0x197   :  { %9385 = vst [vmem:[#allocation71_spill] sm:$0xff] %v6903_v4  ;;  %v6915_v3 = vsel %vm831_vm3, %v9387_v51, %v1164_v45  ;;  %v6920_v59 = vsel %vm831_vm3, %v1168_v21, %v9389_v36  ;;  %v842_v0 = vsel %vm831_vm3, %v9393_v46, %v9392_v2  ;;  %v643_v45 = vmul.f32 %v6580_v44, %v6440_v23  ;;  %v9410_v4 = vld [vmem:[#allocation47_spill] sm:$0xff] }
 0x198   :  { %9388 = vst [vmem:[#allocation72_spill] sm:$0xff] %v6915_v3  ;;  %v6925_v52 = vsel %vm831_vm3, %v9390_v48, %v1168_v21  ;;  %v9395_v33 = vrot.slane %v6558_v28, 1  ;;  %v9396_v51 = vrot.slane %v6597_v9, 1  ;;  %v9397_v21 = vrot.slane %v6574_v42, 1 }
 0x199   :  { %9391 = vst [vmem:[#allocation73_spill] sm:$0xff] %v6925_v52  ;;  %v9398_v48 = vrot.slane %v6676_v16, 2  ;;  %v6948_v2 = vadd.f32 %v842_v0, %v6576_v60  ;;  %v9400_v46 = vrot.slane %v6612_v47, 2  ;;  %v9401_v30 = vrot.slane %v6625_v43, 2  ;;  %v9409_v43 = vld [vmem:[#allocation62_spill] sm:$0xff]  ;;  %v9412_v52 = vld [vmem:[#allocation52_spill] sm:$0xff] }
 0x19a   :  { %v733_v55 = vsel %vm720_vm2, %v9395_v33, %v9394_v5  ;;  %v735_v36 = vsel %vm720_vm2, %v9397_v21, %v9396_v51  ;;  %v9402_v33 = vrot.slane %v6619_v62, 2  ;;  %v9404_v28 = vrot.slane %v9403_v22, 2 }
 0x19b   :  { %1178 = vrot.lane.b32.xlu0 %v9398_v48, %s5971_s1  ;;  %9399 = vst [vmem:[#allocation74_spill] sm:$0xff] %v6948_v2  ;;  %v760_v23 = vadd.f32 %v735_v36, %v6650_v54  ;;  %v844_v5 = vsel %vm831_vm3, %v9401_v30, %v9400_v46  ;;  %v1594_v16 = vrot.slane %v6797_v19, 2  ;;  %v759_v21 = vadd.f32 %v733_v55, %v643_v45  ;;  %v9405_v48 = vld [vmem:[#allocation60_spill] sm:$0xff]  ;;  %v9406_v54 = vld [vmem:[#allocation61_spill] sm:$0xff]  ;;  %v9414_v45 = vld [vmem:[#allocation55_spill] sm:$0xff] }
 0x19c   :  { %v846_v51 = vsel %vm831_vm3, %v9404_v28, %v9402_v33  ;;  %v1598_v60 = vrot.slane %v9405_v48, 2  ;;  %v9245_v0 = vrot.slane %v6878_v57, 2  ;;  %v9407_v36 = vld [vmem:[#allocation45_spill] sm:$0xff]  ;;  %v9411_v30 = vrot.slane %v9410_v4, 1  ;;  %v9416_v4 = vld [vmem:[#allocation50_spill] sm:$0xff] }
 0x19d   :  { %v9408_v2 = vrot.slane %v9407_v36, 1  ;;  %v855_v3 = vrot.slane %v9412_v52, 2  ;;  %v9413_v28 = vrot.slane %v6687_v13, 1  ;;  %v6974_v19 = vadd.f32 %v846_v51, %v760_v23  ;;  %v9417_v23 = vld [vmem:[#allocation39_spill] sm:$0xff] }
 0x19e   :  { %v763_v46 = vadd.f32 %v9411_v30, %v9409_v43  ;;  %v853_v55 = vrot.slane %v9414_v45, 2  ;;  %v6977_v33 = vadd.f32 %v844_v5, %v759_v21  ;;  %v6987_v43 = vsel %vm831_vm3, %v1594_v16, %v9245_v0  ;;  %v9423_v45 = vld [vmem:[#allocation22_spill] sm:$0xff] }
 0x19f   :  { %v762_v42 = vadd.f32 %v9408_v2, %v9406_v54  ;;  %1050 = vrot.lane.b32.xlu1 %v9413_v28, %s5971_s1  ;;  %v6982_v2 = vsel %vm831_vm3, %v1592_v41, %v1598_v60  ;;  %v9415_v13 = vrot.slane %v6680_v56, 2  ;;  %v649_v52 = vmul.f32 %v9416_v4, %v6551_v26  ;;  %v9420_v54 = vld [vmem:[#allocation43_spill] sm:$0xff] }
 0x1a0   :  { %v9418_v5 = vrot.slane %v9417_v23, 2  ;;  %v9419_v51 = vrot.slane %v6587_v34, 2  ;;  %v9421_v36 = vrot.slane %v9420_v54, 2  ;;  %v9422_v30 = vrot.slane %v6609_v58, 2 }
 0x1a1   :  { %1182 = vrot.lane.b32.xlu0 %v9415_v13, %s5971_s1  ;;  %v1291_v0 = vmul.f32 %v9423_v45, %v6464_v15  ;;  %v9424_v56 = vrot.slane %v6691_v49, 1  ;;  %v648_v34 = vmul.f32 %v6580_v44, %v6548_v31  ;;  %v9428_v58 = vrot.slane %v6612_v47, 2 }
 0x1a2   :  { %v850_v21 = vsel %vm831_vm3, %v9419_v51, %v9418_v5  ;;  %v852_v28 = vsel %vm831_vm3, %v9422_v30, %v9421_v36  ;;  %v9427_v5 = vrot.slane %v6597_v9, 1  ;;  %v9429_v15 = vrot.slane %v6619_v62, 2 }
 0x1a3   :  { %1054 = vrot.lane.b32.xlu1 %v9424_v56, %s5971_s1  ;;  %v7009_v13 = vadd.f32 %v850_v21, %v762_v42  ;;  %v7011_v23 = vadd.f32 %v852_v28, %v763_v46  ;;  %v854_v54 = vsel %vm831_vm3, %v9428_v58, %v853_v55  ;;  %v9430_v49 = vrot.slane %v6600_v29, 1  ;;  %v9432_v21 = vld [vmem:[#allocation25_spill] sm:$0xff] }
 0x1a4   :  { %v765_v51 = vadd.f32 %v9427_v5, %v649_v52  ;;  %v856_v36 = vsel %vm831_vm3, %v9429_v15, %v855_v3  ;;  %v1293_v30 = vmul.f32 %v9432_v21, %v6548_v31  ;;  %v9433_v9 = vrot.slane %v6695_v50, 2  ;;  %v9437_v3 = vld [vmem:[#allocation23_spill] sm:$0xff]  ;;  %v9439_v50 = vld [vmem:[#allocation24_spill] sm:$0xff]  ;;  %v9443_v52 = vld [vmem:[#allocation37_spill] sm:$0xff] }
 0x1a5   :  { %9425 = vst [vmem:[#allocation58_spill] sm:$0xff] %v7009_v13  ;;  %9426 = vst [vmem:[#allocation60_spill] sm:$0xff] %v7011_v23  ;;  %1331 = vrot.lane.b32.xlu0 %v1291_v0, %s5967_s3  ;;  %v764_v42 = vadd.f32 %v9430_v49, %v648_v34  ;;  %v9435_v62 = vrot.slane %v6707_v7, 2  ;;  %v9436_v29 = vrot.slane %v6703_v39, 2  ;;  %v1292_v0 = vmul.f32 %v9437_v3, %v6493_v63  ;;  %v7054_v39 = vpop.permute.xlu0 %934  ;;  %v9447_v34 = vld [vmem:[#allocation38_spill] sm:$0xff]  ;;  %v9453_v21 = vld [vmem:[#allocation64_spill] sm:$0xff] }
 0x1a6   :  { %v7026_v46 = vadd.f32 %v856_v36, %v765_v51  ;;  %v9438_v31 = vrot.slane %v6712_v53, 2  ;;  %v1294_v55 = vmul.f32 %v9439_v50, %v6551_v26  ;;  %v9440_v7 = vrot.slane %v6743_v61, 1  ;;  %v9442_v53 = vld [vmem:[#allocation35_spill] sm:$0xff]  ;;  %v7068_v61 = vpop.permute.xlu1 %936 }
 0x1a7   :  { %1180 = vrot.lane.b32.xlu1 %v9433_v9, %s5971_s1  ;;  %v7033_v47 = vadd.f32 %v854_v54, %v764_v42  ;;  %v9441_v63 = vrot.slane %v6747_v8, 1  ;;  %v1142_v28 = vmul.f32 %v9443_v52, %v9442_v53  ;;  %v9444_v45 = vrot.slane %v6727_v1, 1  ;;  %v9446_v8 = vld [vmem:[#allocation53_spill] sm:$0xff] }
 0x1a8   :  { %9431 = vst [vmem:[#allocation61_spill] sm:$0xff] %v7026_v46  ;;  %v1144_v5 = vmul.f32 %v9447_v34, %v9446_v8  ;;  %v9449_v1 = vrot.slane %v6758_v10, 1  ;;  %v9450_v58 = vrot.slane %v6754_v24, 2  ;;  %v9452_v49 = vrot.slane %v6763_v32, 2 }
 0x1a9   :  { %9434 = vst [vmem:[#allocation45_spill] sm:$0xff] %v7033_v47  ;;  %1335 = vrot.lane.b32.xlu0 %v1293_v30, %s5967_s3  ;;  %v7063_v26 = vpop.permute.xlu0 %938  ;;  %v1170_v56 = vrot.slane %v1142_v28, 2  ;;  %v9454_v30 = vrot.slane %v6772_v27, 1  ;;  %v9458_v3 = vrot.slane %v6776_v25, 1  ;;  %v9461_v50 = vrot.slane %v6816_v18, 1  ;;  %v9464_v25 = vld [vmem:[#allocation66_spill] sm:$0xff] }
 0x1aa   :  { %v7086_v15 = vpop.permute.xlu1 %940  ;;  %v9467_v18 = vrot.slane %v6839_v11, 2 }
 0x1ab   :  { %1184 = vrot.lane.b32.xlu1 %v9435_v62, %s5971_s1  ;;  %v1171_v54 = vsel %vm831_vm3, %v9450_v58, %v1170_v56  ;;  %v9456_v62 = vrot.slane %v6810_v38, 1 }
 0x1ad   :  { %1616 = vrot.lane.b32.xlu0 %v9436_v29, %s5967_s3  ;;  %v7078_v51 = vpop.permute.xlu0 %1708 }
 0x1ae   :  { %v7097_v10 = vpop.permute.xlu1 %1706 }
 0x1af   :  { %1333 = vrot.lane.b32.xlu1 %v1292_v0, %s5967_s3  ;;  %v9459_v0 = vld [vmem:[#allocation65_spill] sm:$0xff] }
 0x1b1   :  { %1620 = vrot.lane.b32.xlu0 %v9438_v31, %s5967_s3  ;;  %v7089_v36 = vpop.permute.xlu0 %1311 }
 0x1b2   :  { %v7108_v9 = vpop.permute.xlu1 %1313 }
 0x1b3   :  { %1337 = vrot.lane.b32.xlu1 %v1294_v55, %s5967_s3  ;;  %v9463_v55 = vld [vmem:[#allocation36_spill] sm:$0xff] }
 0x1b5   :  { %1456 = vrot.lane.b32.xlu0 %v9440_v7, %s5967_s3  ;;  %v7101_v24 = vpop.permute.xlu0 %1319  ;;  %v1573_v7 = vmul.f32 %v9463_v55, %v9446_v8 }
 0x1b6   :  { %v7122_v27 = vpop.permute.xlu1 %1317 }
 0x1b7   :  { %1618 = vrot.lane.b32.xlu1 %v1592_v41, %s5967_s3  ;;  %v9445_v41 = vrot.slane %v6737_v6, 1  ;;  %v1174_v6 = vrot.slane %v1144_v5, 2  ;;  %v1610_v52 = vrot.slane %v1573_v7, 2  ;;  %v9473_v5 = vld [vmem:[#allocation40_spill] sm:$0xff] }
 0x1b8   :  { %v3400_v7 = vld [vmem:[#allocation9 + $0x5] ss:$8 sm:$0xf] }
 0x1b9   :  { %1460 = vrot.lane.b32.xlu0 %v9441_v63, %s5967_s3  ;;  %v1175_v42 = vsel %vm831_vm3, %v9452_v49, %v1174_v6  ;;  %v7112_v32 = vpop.permute.xlu0 %1329  ;;  %v9465_v63 = vrot.slane %v6827_v35, 2  ;;  %v9469_v35 = vld [vmem:[#allocation67_spill] sm:$0xff] }
 0x1ba   :  { %9455 = vst [vmem:[#allocation62_spill] sm:$0xff] %v7112_v32  ;;  %v7131_v38 = vpop.permute.xlu1 %1462 }
 0x1bb   :  { %1622 = vrot.lane.b32.xlu1 %v1594_v16, %s5967_s3  ;;  %v9448_v16 = vrot.slane %v6733_v14, 1  ;;  %v9451_v14 = vld [vmem:[#allocation63_spill] sm:$0xff]  ;;  %9462 = vst [vmem:[#allocation52_spill] sm:$0xff] %v7131_v38 }
 0x1bd   :  { %1064 = vrot.lane.b32.xlu0 %v9444_v45, %s5971_s1 }
 0x1be   :  { %v7143_v45 = vpop.permute.xlu1 %1482 }
 0x1bf   :  { %1474 = vrot.lane.b32.xlu1 %v9445_v41, %s5967_s3  ;;  %9466 = vst [vmem:[#allocation55_spill] sm:$0xff] %v7143_v45  ;;  %v1611_v41 = vsel %vm831_vm3, %v9467_v18, %v1610_v52 }
 0x1c1   :  { %1068 = vrot.lane.b32.xlu0 %v9448_v16, %s5971_s1 }
 0x1c2   :  { %v7157_v8 = vpop.permute.xlu1 %1472 }
 0x1c3   :  { %1478 = vrot.lane.b32.xlu1 %v9449_v1, %s5967_s3  ;;  %9470 = vst [vmem:[#allocation39_spill] sm:$0xff] %v7157_v8  ;;  %v9475_v1 = vld [vmem:[#allocation72_spill] sm:$0xff] }
 0x1c4   :  { %v2691_v8 = vld [vmem:[#allocation9 + $0x3] ss:$8 sm:$0xf] }
 0x1c5   :  { %1194 = vrot.lane.b32.xlu0 %v1171_v54, %s5971_s1 }
 0x1c7   :  { %1056 = vrot.lane.b32.xlu1 %v9451_v14, %s5971_s1  ;;  %v9478_v14 = vld [vmem:[#allocation73_spill] sm:$0xff] }
 0x1c9   :  { %1198 = vrot.lane.b32.xlu0 %v1175_v42, %s5971_s1  ;;  %v9479_v42 = vld [vmem:[#allocation49_spill] sm:$0xff] }
 0x1cb   :  { %1060 = vrot.lane.b32.xlu1 %v6788_v20, %s5971_s1  ;;  %v9457_v20 = vld [vmem:[#allocation26_spill] sm:$0xff] }
 0x1cc   :  { %v1571_v29 = vmul.f32 %v9457_v20, %v9442_v53 }
 0x1cd   :  { %1464 = vrot.lane.b32.xlu0 %v9453_v21, %s5967_s3  ;;  %v9480_v21 = vld [vmem:[#allocation42_spill] sm:$0xff] }
 0x1ce   :  { %v1606_v31 = vrot.slane %v1571_v29, 2 }
 0x1cf   :  { %1066 = vrot.lane.b32.xlu1 %v9454_v30, %s5971_s1  ;;  %v1574_v30 = vmul.f32 %v9480_v21, %v9479_v42  ;;  %v3541_v21 = vld [vmem:[#allocation9 + $0x20] ss:$8 sm:$0xf] }
 0x1d0   :  { %v1607_v53 = vsel %vm831_vm3, %v9465_v63, %v1606_v31  ;;  %v9485_v63 = vld [vmem:[#allocation18_spill] sm:$0xff] }
 0x1d1   :  { %1468 = vrot.lane.b32.xlu0 %v6805_v12, %s5967_s3  ;;  %v7126_v12 = vpop.permute.xlu0 %1339  ;;  %v1612_v48 = vrot.slane %v1574_v30, 2 }
 0x1d2   :  { %9460 = vst [vmem:[#allocation47_spill] sm:$0xff] %v7126_v12 }
 0x1d3   :  { %1070 = vrot.lane.b32.xlu1 %v9456_v62, %s5971_s1  ;;  %v9481_v62 = vld [vmem:[#allocation71_spill] sm:$0xff] }
 0x1d5   :  { %1476 = vrot.lane.b32.xlu0 %v9458_v3, %s5967_s3  ;;  %v7141_v28 = vpop.permute.xlu0 %1315  ;;  %v9482_v3 = vld [vmem:[#allocation21_spill] sm:$0xff] }
 0x1d7   :  { %1186 = vrot.lane.b32.xlu1 %v9459_v0, %s5971_s1 }
 0x1d9   :  { %1480 = vrot.lane.b32.xlu0 %v9461_v50, %s5967_s3  ;;  %v7151_v56 = vpop.permute.xlu0 %1624  ;;  %v9484_v50 = vrot.slane %v6878_v57, 2  ;;  %v9488_v57 = vld [vmem:[#allocation20_spill] sm:$0xff] }
 0x1da   :  { %9468 = vst [vmem:[#allocation50_spill] sm:$0xff] %v7151_v56 }
 0x1db   :  { %1190 = vrot.lane.b32.xlu1 %v9464_v25, %s5971_s1  ;;  %v1613_v55 = vsel %vm831_vm3, %v9484_v50, %v1612_v48  ;;  %v9492_v50 = vld [vmem:[#allocation27_spill] sm:$0xff] }
 0x1dd   :  { %1636 = vrot.lane.b32.xlu0 %v1607_v53, %s5967_s3  ;;  %v7163_v11 = vpop.permute.xlu0 %1634  ;;  %v9486_v53 = vld [vmem:[#allocation19_spill] sm:$0xff] }
 0x1de   :  { %9472 = vst [vmem:[#allocation43_spill] sm:$0xff] %v7163_v11  ;;  %v3546_v48 = vrot.slane %v3541_v21, %v9486_v53 }
 0x1df   :  { %1626 = vrot.lane.b32.xlu1 %v6885_v40, %s5967_s3  ;;  %v9471_v40 = vld [vmem:[#allocation68_spill] sm:$0xff] }
 0x1e1   :  { %1640 = vrot.lane.b32.xlu0 %v1611_v41, %s5967_s3  ;;  %v7173_v58 = vpop.permute.xlu0 %1644  ;;  %v3409_v41 = vrot.slane %v3400_v7, %v9488_v57 }
 0x1e2   :  { %9476 = vst [vmem:[#allocation22_spill] sm:$0xff] %v7173_v58  ;;  %v9494_v58 = vld [vmem:[#allocation28_spill] sm:$0xff] }
 0x1e3   :  { %1630 = vrot.lane.b32.xlu1 %v6893_v17, %s5967_s3  ;;  %v7165_v34 = vpop.permute.xlu1 %942  ;;  %v9474_v17 = vld [vmem:[#allocation34_spill] sm:$0xff] }
 0x1e4   :  { %v1572_v16 = vmul.f32 %v9474_v17, %v9473_v5  ;;  %v3264_v5 = vld [vmem:[#allocation9 + $0x2] ss:$8 sm:$0xf] }
 0x1e5   :  { %1058 = vrot.lane.b32.xlu0 %v9469_v35, %s5971_s1  ;;  %v3413_v35 = vrot.slane %v3400_v7, %v9485_v63 }
 0x1e6   :  { %v1608_v6 = vrot.slane %v1572_v16, 2  ;;  %v3269_v16 = vrot.slane %v3264_v5, %v9486_v53 }
 0x1e7   :  { %1196 = vrot.lane.b32.xlu1 %v6910_v37, %s5971_s1  ;;  %v9477_v37 = vld [vmem:[#allocation69_spill] sm:$0xff]  ;;  %v7177_v54 = vpop.permute.xlu1 %946 }
 0x1e9   :  { %1062 = vrot.lane.b32.xlu0 %v9471_v40, %s5971_s1 }
 0x1eb   :  { %1200 = vrot.lane.b32.xlu1 %v6920_v59, %s5971_s1  ;;  %v1609_v59 = vsel %vm831_vm3, %v1598_v60, %v1608_v6  ;;  %v7184_v49 = vpop.permute.xlu0 %944  ;;  %v5802_v60 = vld [vmem:[#allocation10] sm:$0xf] }
 0x1ec   :  { %v1705_v0 = vrot.slane %v5802_v60, %v9482_v3 }
 0x1ed   :  { %1188 = vrot.lane.b32.xlu0 %v9475_v1, %s5971_s1  ;;  %v3273_v1 = vrot.slane %v3264_v5, %v9488_v57 }
 0x1ef   :  { %1466 = vrot.lane.b32.xlu1 %v9477_v37, %s5967_s3  ;;  %v7191_v20 = vpop.permute.xlu1 %1321 }
 0x1f0   :  { %v7193_v29 = vpop.permute.xlu0 %948 }
 0x1f1   :  { %1192 = vrot.lane.b32.xlu0 %v9478_v14, %s5971_s1  ;;  %v3277_v14 = vrot.slane %v3264_v5, %v9485_v63 }
 0x1f3   :  { %1638 = vrot.lane.b32.xlu1 %v1609_v59, %s5967_s3  ;;  %v7200_v31 = vpop.permute.xlu1 %1325  ;;  %v3417_v59 = vrot.slane %v3400_v7, %v9482_v3 }
 0x1f4   :  { %9483 = vst [vmem:[#allocation25_spill] sm:$0xff] %v7200_v31  ;;  %v7205_v25 = vpop.permute.xlu0 %1323 }
 0x1f5   :  { %1470 = vrot.lane.b32.xlu0 %v9481_v62, %s5967_s3  ;;  %v3281_v62 = vrot.slane %v3264_v5, %v9482_v3 }
 0x1f7   :  { %1632 = vrot.lane.b32.xlu1 %v6987_v43, %s5967_s3  ;;  %v1701_v43 = vrot.slane %v5802_v60, %v9485_v63  ;;  %v7211_v52 = vpop.permute.xlu1 %1327 }
 0x1f8   :  { %9487 = vst [vmem:[#allocation23_spill] sm:$0xff] %v7211_v52  ;;  %v7213_v18 = vpop.permute.xlu0 %950  ;;  %v2627_v52 = vld [vmem:[#allocation9] ss:$8 sm:$0xf] }
 0x1f9   :  { %1628 = vrot.lane.b32.xlu0 %v6982_v2, %s5967_s3  ;;  %v3405_v2 = vrot.slane %v3400_v7, %v9486_v53 }
 0x1fb   :  { %1642 = vrot.lane.b32.xlu1 %v1613_v55, %s5967_s3  ;;  %v7219_v40 = vpop.permute.xlu1 %1454 }
 0x1fc   :  { %v7221_v17 = vpop.permute.xlu0 %954 }
 0x1fd   :  { %1712 = vrot.lane.b32.xlu0 %v1705_v0, %s5971_s1  ;;  %9489 = vst [vmem:[#allocation24_spill] sm:$0xff] %v7221_v17  ;;  %v398_v0 = vpop.f32.mrb[4].mxu0 }
 0x1fe   :  { %v7246_v55 = vadd.f32 %v398_v0, %v9492_v50 }
 0x1ff   :  { %1710 = vrot.lane.b32.xlu1 %v1701_v43, %s5971_s1  ;;  %v7227_v37 = vpop.permute.xlu1 %1458  ;;  %v3550_v43 = vrot.slane %v3541_v21, %v9488_v57 }
 0x200   :  { %9490 = vst [vmem:[#allocation35_spill] sm:$0xff] %v7227_v37  ;;  %v7229_v6 = vpop.permute.xlu0 %1048 }
 0x201   :  { %3418 = vrot.lane.b32.xlu0 %v3405_v2, %s5965_s23  ;;  %v400_v2 = vpop.f32.mrb[5].mxu0 }
 0x203   :  { %3420 = vrot.lane.b32.xlu1 %v3409_v41, %s5965_s23  ;;  %v7235_v42 = vpop.permute.xlu1 %952  ;;  %v5060_v41 = vmul.f32 -1.442695, %v7246_v55 }
 0x204   :  { %v7237_v30 = vpop.permute.xlu0 %1052 }
 0x205   :  { %3422 = vrot.lane.b32.xlu0 %v3413_v35, %s5965_s23  ;;  %v9493_v35 = vld [vmem:[#allocation29_spill] sm:$0xff]  ;;  %5610 = vpow2.f32 %v5060_v41 }
 0x206   :  { %v7254_v5 = vadd.f32 %v400_v2, %v9493_v35 }
 0x207   :  { %3282 = vrot.lane.b32.xlu1 %v3269_v16, %s5965_s23  ;;  %v7243_v60 = vpop.permute.xlu1 %956  ;;  %v402_v16 = vpop.f32.mrb[6].mxu0 }
 0x208   :  { %9491 = vst [vmem:[#allocation37_spill] sm:$0xff] %v7243_v60  ;;  %v7261_v0 = vadd.f32 %v402_v16, %v9492_v50  ;;  %v5061_v56 = vmul.f32 -1.442695, %v7254_v5 }
 0x209   :  { %3284 = vrot.lane.b32.xlu0 %v3273_v1, %s5965_s23  ;;  %v451_v1 = vpop.f32.mrb[4].mxu1 }
 0x20a   :  { %v7264_v11 = vadd.f32 %v451_v1, %v9494_v58  ;;  %v453_v45 = vpop.f32.mrb[5].mxu1  ;;  %v5064_v38 = vmul.f32 -1.442695, %v7261_v0  ;;  %v9496_v1 = vld [vmem:[#allocation30_spill] sm:$0xff]  ;;  %5612 = vpow2.f32 %v5061_v56 }
 0x20b   :  { %3286 = vrot.lane.b32.xlu1 %v3277_v14, %s5965_s23  ;;  %v3554_v14 = vrot.slane %v3541_v21, %v9485_v63  ;;  %v455_v12 = vpop.f32.mrb[6].mxu1  ;;  %v7277_v37 = vadd.f32 %v453_v45, %v9496_v1  ;;  %v2700_v45 = vrot.slane %v2691_v8, %v9488_v57 }
 0x20c   :  { %v5062_v16 = vmul.f32 -1.442695, %v7264_v11  ;;  %v457_v41 = vpop.f32.mrb[7].mxu1  ;;  %5614 = vpow2.f32 %v5064_v38  ;;  %v2704_v38 = vrot.slane %v2691_v8, %v9485_v63 }
 0x20d   :  { %3424 = vrot.lane.b32.xlu0 %v3417_v59, %s5965_s23  ;;  %v7248_v7 = vpop.permute.xlu0 %1178  ;;  %v7287_v47 = vadd.f32 %v457_v41, %v9496_v1  ;;  %v7301_v1 = vld [vmem:[#allocation9 + $0x6] ss:$8 sm:$0xf] }
 0x20e   :  { %5616 = vpow2.f32 %v5062_v16  ;;  %v2708_v16 = vrot.slane %v2691_v8, %v9482_v3 }
 0x20f   :  { %3288 = vrot.lane.b32.xlu1 %v3281_v62, %s5965_s23  ;;  %v404_v62 = vpop.f32.mrb[7].mxu0  ;;  %v5611_v41 = vpop.eup %5610 }
 0x210   :  { %v7273_v50 = vadd.f32 %v404_v62, %v9493_v35  ;;  %v516_v23 = vadd.f32 1.0, %v5611_v41 }
 0x211   :  { %3559 = vrot.lane.b32.xlu0 %v3546_v48, %s5965_s23  ;;  %v7258_v59 = vpop.permute.xlu1 %1050  ;;  %v3558_v48 = vrot.slane %v3541_v21, %v9482_v3  ;;  %v7284_v21 = vadd.f32 %v455_v12, %v9494_v58  ;;  %v5067_v12 = vmul.f32 -1.442695, %v7287_v47 }
 0x212   :  { %v5065_v35 = vmul.f32 -1.442695, %v7273_v50 }
 0x213   :  { %v7266_v2 = vpop.permute.xlu0 %1182  ;;  %3561 = vrot.lane.b32.xlu1 %v3550_v43, %s5965_s23  ;;  %v2696_v43 = vrot.slane %v2691_v8, %v9486_v53  ;;  %v5066_v56 = vmul.f32 -1.442695, %v7284_v21 }
 0x214   :  { %9495 = vst [vmem:[#allocation53_spill] sm:$0xff] %v7266_v2  ;;  %5618 = vpow2.f32 %v5065_v35  ;;  %v9502_v2 = vld [vmem:[#allocation31_spill] sm:$0xff] }
 0x215   :  { %3563 = vrot.lane.b32.xlu0 %v3554_v14, %s5965_s23  ;;  %v7281_v46 = vpop.permute.xlu1 %1054  ;;  %v5063_v14 = vmul.f32 -1.442695, %v7277_v37 }
 0x216   :  { %9497 = vst [vmem:[#allocation38_spill] sm:$0xff] %v7281_v46  ;;  %v9504_v46 = vld [vmem:[#allocation33_spill] sm:$0xff] }
 0x217   :  { %v7290_v62 = vpop.permute.xlu0 %1331  ;;  %3565 = vrot.lane.b32.xlu1 %v3558_v48, %s5965_s23  ;;  %5620 = vpow2.f32 %v5063_v14  ;;  %v5613_v14 = vpop.eup %5612 }
 0x218   :  { %5622 = vpow2.f32 %v5066_v56  ;;  %v5615_v8 = vpop.eup %5614  ;;  %v517_v56 = vadd.f32 1.0, %v5613_v14 }
 0x219   :  { %2709 = vrot.lane.b32.xlu0 %v2696_v43, %s5971_s1  ;;  %v7299_v58 = vpop.permute.xlu1 %1180  ;;  %5624 = vpow2.f32 %v5067_v12  ;;  %v2795_v43 = vrot.slane %v7301_v1, %v9486_v53  ;;  %v5617_v12 = vpop.eup %5616  ;;  %v520_v41 = vadd.f32 1.0, %v5615_v8 }
 0x21a   :  { %5626 = vrcp.f32 %v516_v23  ;;  %v2632_v23 = vrot.slane %v2627_v52, %v9486_v53  ;;  %v518_v60 = vadd.f32 1.0, %v5617_v12 }
 0x21b   :  { %v7303_v48 = vpop.permute.xlu0 %1335  ;;  %2711 = vrot.lane.b32.xlu1 %v2700_v45, %s5971_s1  ;;  %v2799_v45 = vrot.slane %v7301_v1, %v9488_v57  ;;  %5628 = vrcp.f32 %v517_v56  ;;  %v2636_v56 = vrot.slane %v2627_v52, %v9488_v57 }
 0x21c   :  { %9498 = vst [vmem:[#allocation63_spill] sm:$0xff] %v7303_v48  ;;  %5630 = vrcp.f32 %v520_v41 }
 0x21d   :  { %2713 = vrot.lane.b32.xlu0 %v2704_v38, %s5971_s1  ;;  %v7310_v35 = vpop.permute.xlu1 %1184  ;;  %v2803_v38 = vrot.slane %v7301_v1, %v9485_v63 }
 0x21e   :  { %9499 = vst [vmem:[#allocation64_spill] sm:$0xff] %v7310_v35  ;;  %v5619_v32 = vpop.eup %5618  ;;  %v7326_v35 = vld [vmem:[#allocation2 + $0x10] sm:$0xff] }
 0x21f   :  { %v7312_v13 = vpop.permute.xlu0 %1616  ;;  %2715 = vrot.lane.b32.xlu1 %v2708_v16, %s5971_s1  ;;  %v521_v14 = vadd.f32 1.0, %v5619_v32  ;;  %v2640_v32 = vrot.slane %v2627_v52, %v9485_v63  ;;  %v635_v57 = vmul.f32 %v7326_v35, %v9504_v46  ;;  %v9520_v63 = vld [vmem:[#allocation41_spill] sm:$0xff] }
 0x221   :  { %2808 = vrot.lane.b32.xlu0 %v2795_v43, %s5971_s1  ;;  %v7320_v48 = vpop.permute.xlu1 %1333  ;;  %v5621_v31 = vpop.eup %5620  ;;  %5632 = vrcp.f32 %v521_v14 }
 0x222   :  { %9500 = vst [vmem:[#allocation26_spill] sm:$0xff] %v7320_v48  ;;  %v5623_v43 = vpop.eup %5622  ;;  %v700_v48 = vmul.f32 %v7326_v35, %v9502_v2  ;;  %v519_v8 = vadd.f32 1.0, %v5621_v31  ;;  %5634 = vrcp.f32 %v518_v60  ;;  %v9503_v2 = vld [vmem:[#allocation32_spill] sm:$0xff] }
 0x223   :  { %v7322_v16 = vpop.permute.xlu0 %1620  ;;  %2810 = vrot.lane.b32.xlu1 %v2799_v45, %s5971_s1  ;;  %v5625_v17 = vpop.eup %5624  ;;  %v522_v45 = vadd.f32 1.0, %v5623_v43 }
 0x224   :  { %9501 = vst [vmem:[#allocation65_spill] sm:$0xff] %v7322_v16  ;;  %v523_v53 = vadd.f32 1.0, %v5625_v17  ;;  %v721_v12 = vrot.slane %v700_v48, 1  ;;  %5636 = vrcp.f32 %v519_v8  ;;  %v5627_v31 = vpop.eup %5626  ;;  %v2807_v17 = vrot.slane %v7301_v1, %v9482_v3  ;;  %v9522_v3 = vld [vmem:[#allocation46_spill] sm:$0xff] }
 0x225   :  { %2812 = vrot.lane.b32.xlu0 %v2803_v38, %s5971_s1  ;;  %v7332_v16 = vpop.permute.xlu1 %1337  ;;  %v806_v38 = vmul.f32 %v7326_v35, %v9503_v2  ;;  %5638 = vrcp.f32 %v522_v45  ;;  %v7348_v52 = vmul.f32 %v5627_v31, %v7246_v55  ;;  %v5629_v48 = vpop.eup %5628 }
 0x226   :  { %5640 = vrcp.f32 %v523_v53  ;;  %v5631_v46 = vpop.eup %5630  ;;  %v751_v43 = vadd.f32 %v721_v12, %v635_v57  ;;  %v7358_v8 = vmul.f32 %v5629_v48, %v7254_v5  ;;  %v595_v5 = vld [vmem:[#allocation2 + $0x90] sm:$0x1] }
 0x227   :  { %v7334_v41 = vpop.permute.xlu0 %1456  ;;  %2645 = vrot.lane.b32.xlu1 %v2632_v23, %s5971_s1  ;;  %9505 = vst [vmem:[#allocation36_spill] sm:$0xff] %v7348_v52  ;;  %2599 = vst [vmem:[#allocation2 + $0x38] sm:$0xff] %v7348_v52  ;;  %v837_v23 = vrot.slane %v806_v38, 2  ;;  %v7361_v55 = vmul.f32 %v5631_v46, %v7261_v0 }
 0x228   :  { %9507 = vst [vmem:[#allocation67_spill] sm:$0xff] %v7358_v8  ;;  %2600 = vst [vmem:[#allocation2 + $0x40] sm:$0xff] %v7358_v8 }
 0x229   :  { %2647 = vrot.lane.b32.xlu0 %v2636_v56, %s5971_s1  ;;  %v7345_v14 = vpop.permute.xlu1 %1618  ;;  %9508 = vst [vmem:[#allocation68_spill] sm:$0xff] %v7361_v55  ;;  %2603 = vst [vmem:[#allocation2 + $0x68] sm:$0xff] %v7361_v55 }
 0x22b   :  { %v7350_v60 = vpop.permute.xlu0 %1460  ;;  %2649 = vrot.lane.b32.xlu1 %v2640_v32, %s5971_s1  ;;  %v5633_v53 = vpop.eup %5632  ;;  %v872_v32 = vadd.f32 %v837_v23, %v751_v43 }
 0x22c   :  { %v7368_v45 = vmul.f32 %v5633_v53, %v7273_v50  ;;  %v5635_v57 = vpop.eup %5634  ;;  %v811_v53 = vmul.f32 %v9503_v2, %v595_v5 }
 0x22d   :  { %2814 = vrot.lane.b32.xlu0 %v2807_v17, %s5971_s1  ;;  %v7355_v1 = vpop.permute.xlu1 %1622  ;;  %v7374_v0 = vmul.f32 %v5635_v57, %v7264_v11  ;;  %v982_v55 = vadd.f32 %v7054_v39, %v872_v32 }
 0x22e   :  { %9506 = vst [vmem:[#allocation66_spill] sm:$0xff] %v7355_v1  ;;  %9509 = vst [vmem:[#allocation40_spill] sm:$0xff] %v7368_v45  ;;  %v5637_v31 = vpop.eup %5636 }
 0x22f   :  { %v7363_v56 = vpop.permute.xlu0 %1064  ;;  %2604 = vst [vmem:[#allocation2 + $0x70] sm:$0xff] %v7368_v45  ;;  %9510 = vst [vmem:[#allocation34_spill] sm:$0xff] %v7374_v0  ;;  %v5639_v38 = vpop.eup %5638  ;;  %v7379_v48 = vmul.f32 %v5637_v31, %v7277_v37  ;;  %v1096_v37 = vadd.f32 %v7229_v6, %v982_v55 }
 0x230   :  { %v5641_v46 = vpop.eup %5640  ;;  %2601 = vst [vmem:[#allocation2 + $0x48] sm:$0xff] %v7374_v0  ;;  %v7383_v50 = vmul.f32 %v5639_v38, %v7284_v21  ;;  %v847_v21 = vrot.slane %v811_v53, 2  ;;  %v9517_v38 = vld [vmem:[#allocation44_spill] sm:$0xff]  ;;  %v639_v53 = vmul.f32 %v7326_v35, %v9416_v4 }
 0x231   :  { %v7370_v12 = vpop.permute.xlu1 %1474  ;;  %9512 = vst [vmem:[#allocation69_spill] sm:$0xff] %v7379_v48  ;;  %2602 = vst [vmem:[#allocation2 + $0x50] sm:$0xff] %v7379_v48  ;;  %v7391_v11 = vmul.f32 %v5641_v46, %v7287_v47  ;;  %v1226_v2 = vadd.f32 %v7248_v7, %v1096_v37  ;;  %v636_v48 = vmul.f32 %v7326_v35, %v9517_v38  ;;  %v9518_v47 = vld [vmem:[#allocation48_spill] sm:$0xff]  ;;  %v9521_v38 = vrot.slane %v9520_v63, 1 }
 0x232   :  { %9513 = vst [vmem:[#allocation73_spill] sm:$0xff] %v7383_v50  ;;  %2605 = vst [vmem:[#allocation2 + $0x78] sm:$0xff] %v7383_v50  ;;  %v637_v46 = vmul.f32 %v7326_v35, %v9518_v47  ;;  %v848_v50 = vsel %vm831_vm3, %v837_v23, %v847_v21  ;;  %v9523_v47 = vrot.slane %v9522_v3, 1  ;;  %v9528_v3 = vld [vmem:[#allocation57_spill] sm:$0xff] }
 0x233   :  { %v7376_v17 = vpop.permute.xlu0 %1068  ;;  %9515 = vst [vmem:[#allocation42_spill] sm:$0xff] %v7391_v11  ;;  %2606 = vst [vmem:[#allocation2 + $0x80] sm:$0xff] %v7391_v11  ;;  %v1369_v55 = vadd.f32 %v7089_v36, %v1226_v2  ;;  %v638_v11 = vmul.f32 %v7326_v35, %v6580_v44  ;;  %v882_v0 = vadd.f32 %v848_v50, %v751_v43  ;;  %v9526_v44 = vld [vmem:[#allocation51_spill] sm:$0xff] }
 0x234   :  { %9511 = vst [vmem:[#allocation72_spill] sm:$0xff] %v7376_v17  ;;  %v752_v52 = vadd.f32 %v9521_v38, %v636_v48  ;;  %v9527_v35 = vrot.slane %v9526_v44, 1  ;;  %v9529_v48 = vrot.slane %v9528_v3, 2  ;;  %v961_v3 = vsel %vm626_vm4, %v7165_v34, %v7184_v49 }
 0x235   :  { %v7387_v45 = vpop.permute.xlu1 %1478  ;;  %v1511_v23 = vadd.f32 %v7219_v40, %v1369_v55  ;;  %v992_v2 = vadd.f32 %v7213_v18, %v882_v0 }
 0x236   :  { %9514 = vst [vmem:[#allocation49_spill] sm:$0xff] %v7387_v45  ;;  %v753_v45 = vadd.f32 %v9523_v47, %v637_v46  ;;  %v754_v63 = vadd.f32 %v9527_v35, %v638_v11  ;;  %v873_v50 = vadd.f32 %v9529_v48, %v752_v52  ;;  %v9530_v46 = vld [vmem:[#allocation56_spill] sm:$0xff]  ;;  %v987_v11 = vadd.f32 %v7165_v34, %v872_v32 }
 0x237   :  { %v7395_v57 = vpop.permute.xlu0 %1194  ;;  %v1673_v1 = vadd.f32 %v7312_v13, %v1511_v23  ;;  %v1106_v43 = vadd.f32 %v7363_v56, %v992_v2  ;;  %v9531_v55 = vrot.slane %v9530_v46, 2  ;;  %v9532_v52 = vrot.slane %v9403_v22, 2 }
 0x238   :  { %v1342_v22 = vsel %vm1341_vm5, %v7089_v36, %v7108_v9  ;;  %v962_v36 = vsel %vm626_vm4, %v7184_v49, %v7177_v54  ;;  %v1202_v46 = vsel %vm626_vm4, %v7248_v7, %v7299_v58  ;;  %v1343_v49 = vsel %vm1341_vm5, %v7108_v9, %v7141_v28  ;;  %v9536_v7 = vld [vmem:[#allocation74_spill] sm:$0xff] }
 0x239   :  { %v7399_v31 = vpop.permute.xlu1 %1056  ;;  %v874_v38 = vadd.f32 %v9531_v55, %v753_v45  ;;  %v1236_v47 = vadd.f32 %v7395_v57, %v1106_v43  ;;  %v960_v45 = vsel %vm626_vm4, %v7063_v26, %v7086_v15  ;;  %v7453_v2 = vadd.f32 %v7097_v10, %v1673_v1 }
 0x23a   :  { %v1101_v32 = vadd.f32 %v7399_v31, %v987_v11  ;;  %v7471_v1 = vsel %vm1341_vm5, %v7122_v27, %v7101_v24 }
 0x23b   :  { %v7401_v5 = vpop.permute.xlu0 %1198  ;;  %v1379_v48 = vadd.f32 %v7290_v62, %v1236_v47  ;;  %v5068_v34 = vmul.f32 -1.442695, %v7453_v2  ;;  %v7507_v47 = vadd.f32 %v962_v36, %v9536_v7  ;;  %v9540_v36 = vld [vmem:[#allocation64_spill] sm:$0xff] }
 0x23c   :  { %9516 = vst [vmem:[#allocation71_spill] sm:$0xff] %v7401_v5 }
 0x23d   :  { %v7409_v8 = vpop.permute.xlu1 %1060  ;;  %5642 = vpow2.f32 %v5068_v34 }
 0x23e   :  { %9519 = vst [vmem:[#allocation27_spill] sm:$0xff] %v7409_v8  ;;  %v9524_v8 = vld [vmem:[#allocation54_spill] sm:$0xff] }
 0x23f   :  { %v7413_v37 = vpop.permute.xlu0 %1464  ;;  %v9525_v4 = vrot.slane %v9524_v8, 1  ;;  %v958_v8 = vsel %vm626_vm4, %v7054_v39, %v7068_v61  ;;  %v9533_v39 = vld [vmem:[#allocation59_spill] sm:$0xff] }
 0x240   :  { %v9534_v44 = vrot.slane %v9533_v39, 2  ;;  %v7525_v39 = vsel %vm1341_vm5, %v7191_v20, %v7205_v25 }
 0x241   :  { %v7422_v21 = vpop.permute.xlu1 %1066  ;;  %v755_v5 = vadd.f32 %v9525_v4, %v639_v53  ;;  %v959_v53 = vsel %vm626_vm4, %v7068_v61, %v7063_v26  ;;  %v7462_v61 = vsel %vm626_vm4, %v7097_v10, %v7078_v51  ;;  %v983_v26 = vadd.f32 %v958_v8, %v873_v50 }
 0x242   :  { %v875_v35 = vadd.f32 %v9534_v44, %v754_v63  ;;  %v1072_v63 = vsel %vm626_vm4, %v7229_v6, %v7258_v59  ;;  %v963_v6 = vsel %vm626_vm4, %v7177_v54, %v7193_v29  ;;  %v1344_v54 = vsel %vm1341_vm5, %v7141_v28, %v7122_v27 }
 0x243   :  { %v7428_v17 = vpop.permute.xlu0 %1468  ;;  %v876_v23 = vadd.f32 %v9532_v52, %v755_v5  ;;  %v984_v5 = vadd.f32 %v959_v53, %v874_v38  ;;  %v1097_v8 = vadd.f32 %v1072_v63, %v983_v26  ;;  %v9535_v53 = vld [vmem:[#allocation70_spill] sm:$0xff]  ;;  %v7511_v52 = vadd.f32 %v7193_v29, %v6974_v19 }
 0x244   :  { %v985_v38 = vadd.f32 %v960_v45, %v875_v35  ;;  %v7504_v11 = vadd.f32 %v961_v3, %v9535_v53  ;;  %v7516_v9 = vadd.f32 %v963_v6, %v6977_v33  ;;  %v1073_v45 = vsel %vm626_vm4, %v7258_v59, %v7237_v30  ;;  %v9537_v29 = vld [vmem:[#allocation38_spill] sm:$0xff]  ;;  %v9538_v59 = vld [vmem:[#allocation24_spill] sm:$0xff] }
 0x245   :  { %v7437_v0 = vpop.permute.xlu1 %1070  ;;  %v986_v24 = vadd.f32 %v7086_v15, %v876_v23  ;;  %v1227_v27 = vadd.f32 %v1202_v46, %v1097_v8  ;;  %v1521_v28 = vadd.f32 %v7370_v12, %v1379_v48  ;;  %v964_v19 = vsel %vm626_vm4, %v7213_v18, %v7235_v42 }
 0x246   :  { %v1074_v33 = vsel %vm626_vm4, %v7237_v30, %v9537_v29  ;;  %v965_v35 = vsel %vm626_vm4, %v7235_v42, %v9538_v59  ;;  %v1098_v18 = vadd.f32 %v1073_v45, %v984_v5  ;;  %v1484_v48 = vsel %vm1341_vm5, %v7219_v40, %v7334_v41  ;;  %v9541_v5 = vld [vmem:[#allocation37_spill] sm:$0xff] }
 0x247   :  { %v7455_v4 = vpop.permute.xlu0 %1476  ;;  %v1100_v3 = vadd.f32 %v9537_v29, %v986_v24  ;;  %v1370_v6 = vadd.f32 %v1342_v22, %v1227_v27  ;;  %v966_v24 = vsel %vm626_vm4, %v9538_v59, %v9541_v5  ;;  %v1646_v40 = vsel %vm1341_vm5, %v7312_v13, %v7345_v14  ;;  %v9542_v45 = vld [vmem:[#allocation25_spill] sm:$0xff]  ;;  %v9544_v13 = vld [vmem:[#allocation62_spill] sm:$0xff] }
 0x248   :  { %v7572_v27 = vsel %vm1341_vm5, %v7205_v25, %v9542_v45  ;;  %v9545_v59 = vld [vmem:[#allocation58_spill] sm:$0xff] }
 0x249   :  { %v7476_v43 = vpop.permute.xlu1 %1186  ;;  %v1230_v8 = vadd.f32 %v9540_v36, %v1100_v3  ;;  %v1512_v22 = vadd.f32 %v1484_v48, %v1370_v6 }
 0x24a   :  { %v1231_v50 = vadd.f32 %v7476_v43, %v1101_v32  ;;  %v9539_v32 = vld [vmem:[#allocation53_spill] sm:$0xff] }
 0x24b   :  { %v7494_v55 = vpop.permute.xlu0 %1480  ;;  %v1204_v30 = vsel %vm626_vm4, %v9539_v32, %v9540_v36  ;;  %v9548_v36 = vld [vmem:[#allocation61_spill] sm:$0xff]  ;;  %v1373_v48 = vadd.f32 %v7471_v1, %v1230_v8  ;;  %v9553_v8 = vld [vmem:[#allocation72_spill] sm:$0xff] }
 0x24c   :  { %v1374_v15 = vadd.f32 %v7191_v20, %v1231_v50  ;;  %v1203_v20 = vsel %vm626_vm4, %v7299_v58, %v9539_v32  ;;  %v1099_v50 = vadd.f32 %v1074_v33, %v985_v38  ;;  %v993_v32 = vadd.f32 %v964_v19, %v9545_v59 }
 0x24d   :  { %v7513_v23 = vpop.permute.xlu1 %1190  ;;  %v1228_v34 = vadd.f32 %v1203_v20, %v1098_v18  ;;  %v9547_v18 = vld [vmem:[#allocation45_spill] sm:$0xff] }
 0x24e   :  { %v1516_v63 = vadd.f32 %v7413_v37, %v1374_v15  ;;  %v1229_v38 = vadd.f32 %v1204_v30, %v1099_v50  ;;  %v995_v3 = vadd.f32 %v966_v24, %v9547_v18  ;;  %v996_v30 = vadd.f32 %v9541_v5, %v9548_v36  ;;  %v9551_v5 = vld [vmem:[#allocation63_spill] sm:$0xff] }
 0x24f   :  { %v7533_v44 = vpop.permute.xlu0 %1636  ;;  %v1371_v50 = vadd.f32 %v1343_v49, %v1228_v34  ;;  %v7608_v49 = vsel %vm1341_vm5, %v9551_v5, %v7332_v16 }
 0x250   :  { %v1683_v26 = vadd.f32 %v7533_v44, %v1521_v28  ;;  %v9543_v28 = vld [vmem:[#allocation23_spill] sm:$0xff] }
 0x251   :  { %v7550_v42 = vpop.permute.xlu1 %1626  ;;  %v7577_v29 = vsel %vm1341_vm5, %v9542_v45, %v9543_v28  ;;  %v7582_v33 = vsel %vm1341_vm5, %v9543_v28, %v9544_v13  ;;  %v1372_v45 = vadd.f32 %v1344_v54, %v1229_v38  ;;  %v9552_v54 = vld [vmem:[#allocation47_spill] sm:$0xff]  ;;  %v1079_v38 = vsel %vm626_vm4, %v7422_v21, %v9553_v8  ;;  %v9554_v13 = vld [vmem:[#allocation52_spill] sm:$0xff] }
 0x252   :  { %v7553_v58 = vadd.f32 %v7097_v10, %v1683_v26  ;;  %v1678_v46 = vadd.f32 %v7550_v42, %v1516_v63  ;;  %v1674_v63 = vadd.f32 %v1646_v40, %v1512_v22  ;;  %v5643_v40 = vpop.eup %5642  ;;  %v9550_v22 = vld [vmem:[#allocation26_spill] sm:$0xff]  ;;  %v7616_v34 = vsel %vm1341_vm5, %v7332_v16, %v9552_v54  ;;  %v9559_v54 = vld [vmem:[#allocation27_spill] sm:$0xff] }
 0x253   :  { %v7563_v15 = vpop.permute.xlu0 %1640  ;;  %v1350_v24 = vsel %vm1341_vm5, %v7290_v62, %v9550_v22  ;;  %v1351_v1 = vsel %vm1341_vm5, %v9550_v22, %v9551_v5  ;;  %v1487_v59 = vsel %vm1341_vm5, %v7350_v60, %v9554_v13  ;;  %v9557_v22 = vld [vmem:[#allocation71_spill] sm:$0xff] }
 0x254   :  { %v5078_v53 = vmul.f32 -1.442695, %v7553_v58  ;;  %v7567_v7 = vadd.f32 %v7097_v10, %v1678_v46  ;;  %v9546_v10 = vld [vmem:[#allocation60_spill] sm:$0xff]  ;;  %v9549_v46 = vld [vmem:[#allocation35_spill] sm:$0xff]  ;;  %v7619_v62 = vadd.f32 %v7462_v61, %v1674_v63  ;;  %v1782_v63 = vadd.f32 1.0, %v5643_v40 }
 0x255   :  { %v7585_v20 = vpop.permute.xlu1 %1630  ;;  %v994_v26 = vadd.f32 %v965_v35, %v9546_v10  ;;  %v1485_v19 = vsel %vm1341_vm5, %v7334_v41, %v9549_v46  ;;  %v1078_v35 = vsel %vm626_vm4, %v7363_v56, %v7422_v21  ;;  %v1486_v41 = vsel %vm1341_vm5, %v9549_v46, %v7350_v60  ;;  %v9555_v10 = vld [vmem:[#allocation65_spill] sm:$0xff]  ;;  %v9556_v46 = vld [vmem:[#allocation66_spill] sm:$0xff] }
 0x256   :  { %5644 = vpow2.f32 %v5078_v53  ;;  %v5073_v25 = vmul.f32 -1.442695, %v7567_v7  ;;  %v1513_v28 = vadd.f32 %v1485_v19, %v1371_v50  ;;  %v1647_v16 = vsel %vm1341_vm5, %v7345_v14, %v9555_v10  ;;  %v9558_v50 = vld [vmem:[#allocation50_spill] sm:$0xff] }
 0x257   :  { %v1059_v6 = vpop.permute.xlu0 %1058  ;;  %v1514_v36 = vadd.f32 %v1486_v41, %v1372_v45  ;;  %v1648_v21 = vsel %vm1341_vm5, %v9555_v10, %v9556_v46  ;;  %v1649_v19 = vsel %vm1341_vm5, %v9556_v46, %v9558_v50  ;;  %v1108_v60 = vadd.f32 %v1079_v38, %v994_v26 }
 0x258   :  { %5646 = vpow2.f32 %v5073_v25  ;;  %v1107_v25 = vadd.f32 %v1078_v35, %v993_v32  ;;  %v1080_v14 = vsel %vm626_vm4, %v9553_v8, %v7437_v0  ;;  %v1515_v40 = vadd.f32 %v1487_v59, %v1373_v48 }
 0x259   :  { %v1197_v56 = vpop.permute.xlu1 %1196  ;;  %v7643_v45 = vadd.f32 %v1647_v16, %v1513_v28  ;;  %v5069_v5 = vmul.f32 -1.442695, %v7619_v62  ;;  %v1075_v41 = vsel %vm626_vm4, %v7399_v31, %v1059_v6  ;;  %v1076_v13 = vsel %vm626_vm4, %v1059_v6, %v9559_v54 }
 0x25a   :  { %v1208_v53 = vsel %vm626_vm4, %v7395_v57, %v1197_v56  ;;  %v1209_v57 = vsel %vm626_vm4, %v1197_v56, %v9557_v22  ;;  %v7648_v56 = vadd.f32 %v1648_v21, %v1514_v36  ;;  %5648 = vrcp.f32 %v1782_v63 }
 0x25b   :  { %v1063_v18 = vpop.permute.xlu0 %1062  ;;  %v1237_v32 = vadd.f32 %v1208_v53, %v1107_v25  ;;  %v1238_v38 = vadd.f32 %v1209_v57, %v1108_v60  ;;  %v7654_v48 = vadd.f32 %v1649_v19, %v1515_v40  ;;  %v1109_v28 = vadd.f32 %v1080_v14, %v995_v3  ;;  %v9560_v60 = vld [vmem:[#allocation49_spill] sm:$0xff] }
 0x25c   :  { %v1077_v26 = vsel %vm626_vm4, %v9559_v54, %v1063_v18  ;;  %v1110_v59 = vadd.f32 %v7437_v0, %v996_v30  ;;  %v1492_v31 = vsel %vm1341_vm5, %v7370_v12, %v7455_v4  ;;  %v1102_v16 = vadd.f32 %v1075_v41, %v7504_v11  ;;  %v9561_v41 = vld [vmem:[#allocation55_spill] sm:$0xff] }
 0x25d   :  { %v1201_v35 = vpop.permute.xlu1 %1200  ;;  %v1380_v6 = vadd.f32 %v1350_v24, %v1237_v32  ;;  %v1103_v46 = vadd.f32 %v1076_v13, %v7507_v47  ;;  %v1104_v21 = vadd.f32 %v1077_v26, %v7516_v9  ;;  %v1105_v63 = vadd.f32 %v1063_v18, %v7511_v52  ;;  %v9562_v54 = vld [vmem:[#allocation39_spill] sm:$0xff] }
 0x25e   :  { %v1381_v30 = vadd.f32 %v1351_v1, %v1238_v38  ;;  %v1210_v12 = vsel %vm626_vm4, %v9557_v22, %v1201_v35  ;;  %v1240_v57 = vadd.f32 %v1201_v35, %v1110_v59  ;;  %v1493_v14 = vsel %vm1341_vm5, %v7455_v4, %v9560_v60 }
 0x25f   :  { %v1189_v8 = vpop.permute.xlu0 %1188  ;;  %v1239_v1 = vadd.f32 %v1210_v12, %v1109_v28 }
 0x260   :  { %v5645_v53 = vpop.eup %5644  ;;  %v1205_v3 = vsel %vm626_vm4, %v7476_v43, %v1189_v8  ;;  %v1206_v11 = vsel %vm626_vm4, %v1189_v8, %v7513_v23  ;;  %v1522_v43 = vadd.f32 %v1492_v31, %v1380_v6  ;;  %v1523_v13 = vadd.f32 %v1493_v14, %v1381_v30  ;;  %v9563_v31 = vld [vmem:[#allocation43_spill] sm:$0xff] }
 0x261   :  { %v1792_v10 = vadd.f32 1.0, %v5645_v53  ;;  %v1467_v25 = vpop.permute.xlu1 %1466  ;;  %v1232_v52 = vadd.f32 %v1205_v3, %v1102_v16  ;;  %v1233_v32 = vadd.f32 %v1206_v11, %v1103_v46  ;;  %v1383_v4 = vadd.f32 %v7616_v34, %v1240_v57 }
 0x262   :  { %v5647_v36 = vpop.eup %5646 }
 0x263   :  { %v1787_v0 = vadd.f32 1.0, %v5647_v36  ;;  %v1193_v50 = vpop.permute.xlu0 %1192  ;;  %5650 = vrcp.f32 %v1792_v10  ;;  %v1375_v26 = vadd.f32 %v7525_v39, %v1232_v52  ;;  %v1376_v34 = vadd.f32 %v7572_v27, %v1233_v32 }
 0x264   :  { %v1207_v47 = vsel %vm626_vm4, %v7513_v23, %v1193_v50  ;;  %v1235_v9 = vadd.f32 %v1193_v50, %v1105_v63  ;;  %v1494_v23 = vsel %vm1341_vm5, %v9560_v60, %v7494_v55  ;;  %v5649_v28 = vpop.eup %5648  ;;  %v1489_v39 = vsel %vm1341_vm5, %v1467_v25, %v7428_v17  ;;  %v9565_v50 = vld [vmem:[#allocation22_spill] sm:$0xff] }
 0x265   :  { %5652 = vrcp.f32 %v1787_v0  ;;  %v1234_v24 = vadd.f32 %v1207_v47, %v1104_v21  ;;  %v1639_v18 = vpop.permute.xlu1 %1638  ;;  %v7712_v30 = vmul.f32 %v5649_v28, %v7453_v2  ;;  %v1518_v12 = vadd.f32 %v1489_v39, %v1376_v34 }
 0x266   :  { %5654 = vpow2.f32 %v5069_v5  ;;  %v1378_v19 = vadd.f32 %v7582_v33, %v1235_v9  ;;  %v1654_v22 = vsel %vm1341_vm5, %v7533_v44, %v1639_v18  ;;  %v1495_v5 = vsel %vm1341_vm5, %v7494_v55, %v9561_v41 }
 0x267   :  { %v1471_v35 = vpop.permute.xlu0 %1470  ;;  %v1684_v40 = vadd.f32 %v1654_v22, %v1522_v43  ;;  %v1488_v33 = vsel %vm1341_vm5, %v7413_v37, %v1467_v25  ;;  %v1377_v38 = vadd.f32 %v7577_v29, %v1234_v24  ;;  %v1382_v55 = vadd.f32 %v7608_v49, %v1239_v1  ;;  %9564 = vst [vmem:[#allocation29_spill] sm:$0xff] %v7712_v30 }
 0x268   :  { %v1491_v44 = vsel %vm1341_vm5, %v1471_v35, %v9562_v54  ;;  %v1490_v37 = vsel %vm1341_vm5, %v7428_v17, %v1471_v35  ;;  %v1517_v29 = vadd.f32 %v1488_v33, %v1375_v26  ;;  %v1655_v16 = vsel %vm1341_vm5, %v1639_v18, %v7563_v15 }
 0x269   :  { %v7692_v8 = vadd.f32 %v7462_v61, %v1684_v40  ;;  %v1633_v53 = vpop.permute.xlu1 %1632  ;;  %v1520_v59 = vadd.f32 %v1491_v44, %v1378_v19  ;;  %v1519_v63 = vadd.f32 %v1490_v37, %v1377_v38  ;;  %v1525_v25 = vadd.f32 %v1495_v5, %v1383_v4 }
 0x26a   :  { %v1653_v10 = vsel %vm1341_vm5, %v1633_v53, %v9563_v31  ;;  %v1652_v46 = vsel %vm1341_vm5, %v7585_v20, %v1633_v53  ;;  %v1524_v57 = vadd.f32 %v1494_v23, %v1382_v55  ;;  %v1685_v47 = vadd.f32 %v1655_v16, %v1523_v13 }
 0x26b   :  { %v1629_v6 = vpop.permute.xlu0 %1628  ;;  %v5079_v36 = vmul.f32 -1.442695, %v7692_v8  ;;  %v1682_v21 = vadd.f32 %v1653_v10, %v1520_v59  ;;  %v1681_v52 = vadd.f32 %v1652_v46, %v1519_v63 }
 0x26c   :  { %v1650_v49 = vsel %vm1341_vm5, %v7550_v42, %v1629_v6  ;;  %v1651_v27 = vsel %vm1341_vm5, %v1629_v6, %v7585_v20 }
 0x26d   :  { %v1679_v3 = vadd.f32 %v1650_v49, %v1517_v29  ;;  %v1643_v17 = vpop.permute.xlu1 %1642  ;;  %v5651_v0 = vpop.eup %5650  ;;  %5656 = vpow2.f32 %v5079_v36  ;;  %v1680_v43 = vadd.f32 %v1651_v27, %v1518_v12 }
 0x26e   :  { %v1657_v42 = vsel %vm1341_vm5, %v1643_v17, %v9565_v50  ;;  %v7733_v23 = vmul.f32 %v5651_v0, %v7553_v58 }
 0x26f   :  { %v5653_v11 = vpop.eup %5652  ;;  %v7717_v9 = vadd.f32 %v7462_v61, %v1679_v3  ;;  %v1713_v20 = vpop.permute.xlu0 %1712  ;;  %v1687_v24 = vadd.f32 %v1657_v42, %v1525_v25  ;;  %v1656_v61 = vsel %vm1341_vm5, %v7563_v15, %v1643_v17 }
 0x270   :  { %v5655_v18 = vpop.eup %5654  ;;  %v7720_v2 = vadd.f32 %v1713_v20, %v7654_v48  ;;  %v7722_v1 = vadd.f32 %v1713_v20, %v1682_v21  ;;  %v7725_v19 = vmul.f32 %v5653_v11, %v7567_v7  ;;  %9567 = vst [vmem:[#allocation30_spill] sm:$0xff] %v7733_v23  ;;  %v1686_v41 = vadd.f32 %v1656_v61, %v1524_v57 }
 0x271   :  { %v5074_v22 = vmul.f32 -1.442695, %v7717_v9  ;;  %v7730_v60 = vadd.f32 %v1713_v20, %v1687_v24  ;;  %v1711_v14 = vpop.permute.xlu1 %1710  ;;  %v1873_v4 = vrot.slane %v7733_v23, 7  ;;  %v1783_v21 = vadd.f32 1.0, %v5655_v18  ;;  %v5478_v18 = vld [vmem:[%s9180_s5 + $0x40] sm:$0xff]  }
 0x272   :  { %9566 = vst [vmem:[#allocation28_spill] sm:$0xff] %v7725_v19  ;;  %v5072_v32 = vmul.f32 -1.442695, %v7720_v2  ;;  %v5077_v48 = vmul.f32 -1.442695, %v7722_v1  ;;  %v1715_v35 = vsel %vm626_vm4, %v7078_v51, %v1711_v14  ;;  %v1716_v40 = vsel %vm626_vm4, %v1711_v14, %v1713_v20  ;;  %5221 = vmatprep.subr.bf16.mxu0 %v5478_v18  ;;  %v5497_v18 = vld [vmem:[%s9180_s5 + $0xe0] sm:$0xff]  }
 0x273   :  { %5658 = vpow2.f32 %v5074_v22  ;;  %v5082_v7 = vmul.f32 -1.442695, %v7730_v60  ;;  %v7742_v15 = vadd.f32 %v1715_v35, %v7643_v45  ;;  %v7745_v5 = vadd.f32 %v1716_v40, %v7648_v56 }
 0x274   :  { %v7747_v58 = vadd.f32 %v1715_v35, %v1680_v43  ;;  %v1859_v33 = vrot.slane %v7725_v19, 7  ;;  %5660 = vpow2.f32 %v5072_v32  ;;  %v7750_v54 = vadd.f32 %v1716_v40, %v1681_v52  ;;  %v5479_v43 = vld [vmem:[%s9180_s5] sm:$0xff]  }
 0x275   :  { %v7752_v51 = vadd.f32 %v1715_v35, %v1685_v47  ;;  %5662 = vpow2.f32 %v5077_v48  ;;  %v7754_v44 = vadd.f32 %v1716_v40, %v1686_v41  ;;  %v5070_v45 = vmul.f32 -1.442695, %v7742_v15  ;;  %5222 = vmatpush3.bf16.msra.mxu0 %v5479_v43  ;;  %v5480_v40 = vld [vmem:[%s9180_s5 + $0x48] sm:$0xff]   ;;  %v5481_v41 = vld [vmem:[%s9180_s5 + $0xc0] sm:$0xff]  }
 0x276   :  { %v5071_v13 = vmul.f32 -1.442695, %v7745_v5  ;;  %v1858_v56 = vrot.slane %v7712_v30, 7  ;;  %5664 = vpow2.f32 %v5082_v7  ;;  %v5075_v26 = vmul.f32 -1.442695, %v7747_v58  ;;  %5223 = vmatprep.subr.bf16.mxu0 %v5480_v40  ;;  %5243 = vmatprep.subr.bf16.mxu1 %v5481_v41 }
 0x277   :  { %5666 = vpow2.f32 %v5070_v45  ;;  %v5076_v38 = vmul.f32 -1.442695, %v7750_v54  ;;  %v5080_v53 = vmul.f32 -1.442695, %v7752_v51  ;;  %v1874_v55 = vsel %vm1857_vm6, %v1859_v33, %v1873_v4  ;;  %v5657_v37 = vpop.eup %5656 }
 0x278   :  { %5668 = vpow2.f32 %v5071_v13  ;;  %v1860_v28 = vsel %vm1857_vm6, %v1858_v56, %v1859_v33  ;;  %v5081_v59 = vmul.f32 -1.442695, %v7754_v44  ;;  %v1895_v10 = vsel %vm1893_vm7, %v1874_v55, 0.0  ;;  %v5482_v33 = vld [vmem:[%s9180_s5 + $0x8] sm:$0xff]   ;;  %v5483_v13 = vld [vmem:[%s9180_s5 + $0x80] sm:$0xff]  }
 0x279   :  { %v1894_v31 = vsel %vm1893_vm7, %v1860_v28, 0.0  ;;  %5670 = vpow2.f32 %v5075_v26  ;;  %v1793_v29 = vadd.f32 1.0, %v5657_v37  ;;  %5224 = vmatpush3.bf16.msra.mxu0 %v5482_v33  ;;  %5244 = vmatpush3.bf16.msra.mxu1 %v5483_v13  ;;  %v5486_v28 = vld [vmem:[%s9180_s5 + $0x10] sm:$0xff]  }
 0x27a   :  { %v1896_v34 = vadd.f32 %v1895_v10, %v1894_v31  ;;  %5672 = vpow2.f32 %v5076_v38  ;;  %v5484_v38 = vld [vmem:[%s9180_s5 + $0x50] sm:$0xff]  }
 0x27b   :  { %5674 = vpow2.f32 %v5080_v53  ;;  %v5485_v53 = vld [vmem:[%s9180_s5 + $0xc8] sm:$0xff]   ;;  %5225 = vmatprep.subr.bf16.mxu0 %v5484_v38  ;;  %v5500_v13 = vld [vmem:[%s9180_s5 + $0x70] sm:$0xff]  }
 0x27c   :  { %v1897_v16 = vrot.slane %v1896_v34, 4  ;;  %5676 = vpow2.f32 %v5081_v59  ;;  %5245 = vmatprep.subr.bf16.mxu1 %v5485_v53  ;;  %v5502_v38 = vld [vmem:[%s9180_s5 + $0x30] sm:$0xff]  }
 0x27d   :  { %v5659_v39 = vpop.eup %5658  ;;  %5678 = vrcp.f32 %v1793_v29  ;;  %5226 = vmatpush3.bf16.msra.mxu0 %v5486_v28  ;;  %v5489_v29 = vld [vmem:[%s9180_s5 + $0xd0] sm:$0xff]  }
 0x27e   :  { %v1788_v6 = vadd.f32 1.0, %v5659_v39  ;;  %v5661_v36 = vpop.eup %5660  ;;  %v1898_v49 = vadd.f32 %v1897_v16, %v1896_v34  ;;  %v5488_v39 = vld [vmem:[%s9180_s5 + $0x58] sm:$0xff]  }
 0x27f   :  { %v5663_v46 = vpop.eup %5662  ;;  %v1786_v17 = vadd.f32 1.0, %v5661_v36  ;;  %5227 = vmatprep.subr.bf16.mxu0 %v5488_v39 }
 0x280   :  { %v5665_v63 = vpop.eup %5664  ;;  %v1899_v27 = vrot.slane %v1898_v49, 2  ;;  %5680 = vrcp.f32 %v1788_v6  ;;  %v1791_v0 = vadd.f32 1.0, %v5663_v46  ;;  %v5491_v6 = vld [vmem:[%s9180_s5 + $0x90] sm:$0xff]  }
 0x281   :  { %v5667_v3 = vpop.eup %5666  ;;  %5682 = vrcp.f32 %v1783_v21  ;;  %v1796_v57 = vadd.f32 1.0, %v5665_v63 }
 0x282   :  { %v5669_v25 = vpop.eup %5668  ;;  %v1900_v12 = vadd.f32 %v1899_v27, %v1898_v49  ;;  %v1784_v42 = vadd.f32 1.0, %v5667_v3  ;;  %5684 = vrcp.f32 %v1786_v17 }
 0x283   :  { %v5671_v50 = vpop.eup %5670  ;;  %v1785_v52 = vadd.f32 1.0, %v5669_v25  ;;  %5686 = vrcp.f32 %v1791_v0 }
 0x284   :  { %v1901_v11 = vrot.slane %v1900_v12, 1  ;;  %v5673_v47 = vpop.eup %5672  ;;  %v1789_v24 = vadd.f32 1.0, %v5671_v50  ;;  %5688 = vrcp.f32 %v1796_v57  ;;  %v5495_v50 = vld [vmem:[%s9180_s5 + $0x98] sm:$0xff]  }
 0x285   :  { %v5675_v20 = vpop.eup %5674  ;;  %v1790_v61 = vadd.f32 1.0, %v5673_v47  ;;  %5690 = vrcp.f32 %v1784_v42 }
 0x286   :  { %v5677_v22 = vpop.eup %5676  ;;  %v1902_v14 = vadd.f32 %v1901_v11, %v1900_v12  ;;  %v1794_v32 = vadd.f32 1.0, %v5675_v20  ;;  %5692 = vrcp.f32 %v1785_v52 }
 0x287   :  { %v1795_v48 = vadd.f32 1.0, %v5677_v22  ;;  %v5679_v7 = vpop.eup %5678  ;;  %5694 = vrcp.f32 %v1789_v24 }
 0x288   :  { %v1933_v35 = vpack.c.bf16 %v1902_v14, %v1902_v14  ;;  %5696 = vrcp.f32 %v1790_v61  ;;  %v7788_v4 = vmul.f32 %v5679_v7, %v7692_v8  ;;  %v5487_v8 = vld [vmem:[%s9180_s5 + $0x88] sm:$0xff]   ;;  %v5499_v14 = vld [vmem:[%s9180_s5 + $0xa0] sm:$0xff]  }
 0x289   :  { %5698 = vrcp.f32 %v1794_v32  ;;  %5246 = vmatpush3.bf16.msra.mxu1 %v5487_v8  ;;  %v5498_v61 = vld [vmem:[%s9180_s5 + $0x28] sm:$0xff]  }
 0x28a   :  { %v5681_v45 = vpop.eup %5680  ;;  %2008 = vrot.lane.b32.xlu1 %v1933_v35, %s5965_s23  ;;  %5700 = vrcp.f32 %v1795_v48  ;;  %9568 = vst [vmem:[#allocation31_spill] sm:$0xff] %v7788_v4  ;;  %v1875_v10 = vrot.slane %v7788_v4, 7  ;;  %5247 = vmatprep.subr.bf16.mxu1 %v5489_v29  ;;  %v5504_v29 = vld [vmem:[%s9180_s5 + $0x78] sm:$0xff]  }
 0x28b   :  { %v5683_v56 = vpop.eup %5682  ;;  %v7791_v26 = vmul.f32 %v5681_v45, %v7717_v9 }
 0x28c   :  { %v5685_v55 = vpop.eup %5684  ;;  %v7806_v9 = vmul.f32 %v5683_v56, %v7619_v62  ;;  %v5490_v62 = vld [vmem:[%s9180_s5 + $0x18] sm:$0xff]   ;;  %v5501_v56 = vld [vmem:[%s9180_s5 + $0xe8] sm:$0xff]  }
 0x28d   :  { %9569 = vst [vmem:[#allocation32_spill] sm:$0xff] %v7791_v26  ;;  %v5687_v37 = vpop.eup %5686  ;;  %v1862_v34 = vrot.slane %v7791_v26, 7  ;;  %5228 = vmatpush3.bf16.msra.mxu0 %v5490_v62  ;;  %5248 = vmatpush3.bf16.msra.mxu1 %v5491_v6  ;;  %v7830_v3 = vmul.f32 %v5685_v55, %v7720_v2  ;;  %v5494_v2 = vld [vmem:[%s9180_s5 + $0x20] sm:$0xff]   ;;  %v5503_v55 = vld [vmem:[%s9180_s5 + $0xa8] sm:$0xff]   ;;  %v5505_v62 = vld [vmem:[%s9180_s5 + $0xf0] sm:$0xff]  }
 0x28e   :  { %9570 = vst [vmem:[#allocation33_spill] sm:$0xff] %v7806_v9  ;;  %v5689_v59 = vpop.eup %5688  ;;  %v1861_v49 = vrot.slane %v7806_v9, 7  ;;  %v7824_v46 = vmul.f32 %v5687_v37, %v7722_v1  ;;  %v5492_v1 = vld [vmem:[%s9180_s5 + $0x60] sm:$0xff]  }
 0x28f   :  { %v5691_v31 = vpop.eup %5690  ;;  %v7827_v21 = vmul.f32 %v5689_v59, %v7730_v60  ;;  %9573 = vst [vmem:[#allocation41_spill] sm:$0xff] %v7830_v3  ;;  %v1876_v25 = vsel %vm1857_vm6, %v1862_v34, %v1875_v10  ;;  %v5493_v60 = vld [vmem:[%s9180_s5 + $0xd8] sm:$0xff]   ;;  %5229 = vmatprep.subr.bf16.mxu0 %v5492_v1 }
 0x290   :  { %v5693_v16 = vpop.eup %5692  ;;  %9571 = vst [vmem:[#allocation44_spill] sm:$0xff] %v7824_v46  ;;  %v1863_v17 = vsel %vm1857_vm6, %v1861_v49, %v1862_v34  ;;  %v7841_v12 = vmul.f32 %v5691_v31, %v7742_v15  ;;  %v1871_v42 = vrot.slane %v7824_v46, 7  ;;  %5249 = vmatprep.subr.bf16.mxu1 %v5493_v60  ;;  %v5507_v49 = vld [vmem:[%s9180_s5 + $0xb0] sm:$0xff]  }
 0x291   :  { %v5695_v36 = vpop.eup %5694  ;;  %9572 = vst [vmem:[#allocation48_spill] sm:$0xff] %v7827_v21  ;;  %v1881_v11 = vrot.slane %v7827_v21, 7  ;;  %v1903_v15 = vadd.f32 %v1876_v25, %v1863_v17  ;;  %v7859_v52 = vmul.f32 %v5693_v16, %v7745_v5  ;;  %5230 = vmatpush3.bf16.msra.mxu0 %v5494_v2  ;;  %5250 = vmatpush3.bf16.msra.mxu1 %v5495_v50  ;;  %v5506_v16 = vld [vmem:[%s9180_s5 + $0x38] sm:$0xff]  }
 0x292   :  { %v5697_v63 = vpop.eup %5696  ;;  %9574 = vst [vmem:[#allocation46_spill] sm:$0xff] %v7841_v12  ;;  %v7844_v57 = vmul.f32 %v5695_v36, %v7747_v58  ;;  %v1870_v58 = vrot.slane %v7830_v3, 7  ;;  %v1864_v43 = vrot.slane %v7841_v12, 7  ;;  %5251 = vmatprep.subr.bf16.mxu1 %v5497_v18  ;;  %v5508_v50 = vld [vmem:[%s9180_s5 + $0xf8] sm:$0xff]  }
 0x293   :  { %v5699_v27 = vpop.eup %5698  ;;  %9577 = vst [vmem:[#allocation57_spill] sm:$0xff] %v7859_v52  ;;  %v7862_v20 = vmul.f32 %v5697_v63, %v7750_v54  ;;  %v1904_v22 = vrot.slane %v1903_v15, 4  ;;  %v1867_v40 = vrot.slane %v7859_v52, 7 }
 0x294   :  { %v5701_v0 = vpop.eup %5700  ;;  %9575 = vst [vmem:[#allocation54_spill] sm:$0xff] %v7844_v57  ;;  %v7855_v47 = vmul.f32 %v5699_v27, %v7752_v51  ;;  %v5496_v51 = vld [vmem:[%s9180_s5 + $0x68] sm:$0xff]   ;;  %v1865_v5 = vrot.slane %v7844_v57, 7  ;;  %v1872_v54 = vsel %vm1857_vm6, %v1870_v58, %v1871_v42 }
 0x295   :  { %9578 = vst [vmem:[#allocation56_spill] sm:$0xff] %v7862_v20  ;;  %v7865_v24 = vmul.f32 %v5701_v0, %v7754_v44  ;;  %v1882_v44 = vsel %vm1857_vm6, %v1871_v42, %v1881_v11  ;;  %5231 = vmatprep.subr.bf16.mxu0 %v5496_v51  ;;  %v1905_v48 = vadd.f32 %v1904_v22, %v1903_v15  ;;  %v1924_v35 = vsel %vm626_vm4, %v1872_v54, 0.0  ;;  %v5509_v42 = vld [vmem:[%s9180_s5 + $0xb8] sm:$0xff]  }
 0x296   :  { %9576 = vst [vmem:[#allocation51_spill] sm:$0xff] %v7855_v47  ;;  %v1877_v32 = vrot.slane %v7855_v47, 7  ;;  %v1925_v7 = vsel %vm626_vm4, %v1882_v44, 0.0  ;;  %v1868_v41 = vrot.slane %v7862_v20, 7  ;;  %5232 = vmatpush3.bf16.msra.mxu0 %v5498_v61  ;;  %v1866_v28 = vsel %vm1857_vm6, %v1864_v43, %v1865_v5  ;;  %5252 = vmatpush3.bf16.msra.mxu1 %v5499_v14 }
 0x297   :  { %9579 = vst [vmem:[#allocation59_spill] sm:$0xff] %v7865_v24  ;;  %v1879_v33 = vrot.slane %v7865_v24, 7  ;;  %v1926_v45 = vadd.f32 %v1925_v7, %v1924_v35  ;;  %v1906_v53 = vrot.slane %v1905_v48, 2  ;;  %5233 = vmatprep.subr.bf16.mxu0 %v5500_v13  ;;  %5253 = vmatprep.subr.bf16.mxu1 %v5501_v56  ;;  %v2909_v44 = vld [vmem:[#allocation9 + $0x1] ss:$8 sm:$0xf] }
 0x298   :  { %v1878_v59 = vsel %vm1857_vm6, %v1865_v5, %v1877_v32  ;;  %v1869_v34 = vsel %vm1857_vm6, %v1867_v40, %v1868_v41  ;;  %v5804_v14 = vld [vmem:[#allocation9] ss:$8 sm:$0xf] }
 0x299   :  { %v1927_v8 = vrot.slane %v1926_v45, 4  ;;  %v1907_v37 = vadd.f32 %v1906_v53, %v1905_v48  ;;  %v1910_v10 = vadd.f32 %v1878_v59, %v1866_v28  ;;  %v1880_v39 = vsel %vm1857_vm6, %v1868_v41, %v1879_v33  ;;  %v9580_v32 = vld [vmem:[#allocation21_spill] sm:$0xff]  ;;  %v9581_v40 = vld [vmem:[#allocation20_spill] sm:$0xff]  ;;  %v7929_v33 = vld [vmem:[#allocation2 + $0x10] sm:$0xff] }
 0x29a   :  { %5234 = vmatpush3.bf16.msra.mxu0 %v5502_v38  ;;  %v1917_v36 = vadd.f32 %v1880_v39, %v1869_v34  ;;  %5254 = vmatpush3.bf16.msra.mxu1 %v5503_v55  ;;  %v2644_v48 = vrot.slane %v5804_v14, %v9580_v32  ;;  %v2918_v41 = vrot.slane %v2909_v44, %v9581_v40  ;;  %v9582_v56 = vld [vmem:[#allocation19_spill] sm:$0xff]  ;;  %v9583_v28 = vld [vmem:[#allocation36_spill] sm:$0xff] }
 0x29b   :  { %v1928_v31 = vadd.f32 %v1927_v8, %v1926_v45  ;;  %v1908_v6 = vrot.slane %v1907_v37, 1  ;;  %v1911_v27 = vrot.slane %v1910_v10, 4  ;;  %5235 = vmatprep.subr.bf16.mxu0 %v5504_v29  ;;  %5255 = vmatprep.subr.bf16.mxu1 %v5505_v62  ;;  %v2914_v38 = vrot.slane %v2909_v44, %v9582_v56  ;;  %v9584_v8 = vld [vmem:[#allocation18_spill] sm:$0xff]  ;;  %v9586_v34 = vld [vmem:[#allocation67_spill] sm:$0xff]  ;;  %v9587_v29 = vld [vmem:[#allocation40_spill] sm:$0xff] }
 0x29c   :  { %v1918_v25 = vrot.slane %v1917_v36, 4  ;;  %v2932_v45 = vmul.f32 %v7929_v33, %v2918_v41  ;;  %v2936_v39 = vmul.f32 %v2918_v41, %v9586_v34  ;;  %v2940_v62 = vmul.f32 %v2918_v41, %v9587_v29  ;;  %v7977_v41 = vld [vmem:[#allocation2 + $0x70] sm:$0xff]  ;;  %v7994_v34 = vld [vmem:[#allocation2 + $0x80] sm:$0xff] }
 0x29d   :  { %v1929_v63 = vrot.slane %v1928_v31, 2  ;;  %v1909_v17 = vadd.f32 %v1908_v6, %v1907_v37  ;;  %v1912_v60 = vadd.f32 %v1911_v27, %v1910_v10  ;;  %v2931_v53 = vmul.f32 %v7929_v33, %v2914_v38  ;;  %v3018_v6 = vld [vmem:[#allocation9 + $0x4] ss:$8 sm:$0xf] }
 0x29e   :  { %5236 = vmatpush3.bf16.msra.mxu0 %v5506_v16  ;;  %v1919_v2 = vadd.f32 %v1918_v25, %v1917_v36  ;;  %5256 = vmatpush3.bf16.msra.mxu1 %v5507_v49  ;;  %v2935_v55 = vmul.f32 %v2914_v38, %v9583_v28  ;;  %v2922_v37 = vrot.slane %v2909_v44, %v9584_v8  ;;  %v9588_v49 = vld [vmem:[#allocation68_spill] sm:$0xff]  ;;  %v9589_v25 = vld [vmem:[#allocation73_spill] sm:$0xff]  ;;  %v7986_v28 = vpop.permute.xlu1 %3420 }
 0x29f   :  { %v1930_v1 = vadd.f32 %v1929_v63, %v1928_v31  ;;  %v1934_v0 = vpack.c.bf16 %v1909_v17, %v1909_v17  ;;  %v1913_v15 = vrot.slane %v1912_v60, 2  ;;  %5257 = vmatprep.subr.bf16.mxu1 %v5508_v50  ;;  %v9585_v31 = vld [vmem:[#allocation34_spill] sm:$0xff]  ;;  %v2926_v16 = vrot.slane %v2909_v44, %v9580_v32 }
 0x2a0   :  { %v1920_v58 = vrot.slane %v1919_v2, 2  ;;  %v2933_v59 = vmul.f32 %v7929_v33, %v2922_v37  ;;  %v2937_v10 = vmul.f32 %v2922_v37, %v9585_v31  ;;  %v2939_v63 = vmul.f32 %v2914_v38, %v9588_v49  ;;  %v7970_v44 = vld [vmem:[#allocation2 + $0x48] sm:$0xff] }
 0x2a1   :  { %v1931_v11 = vrot.slane %v1930_v1, 1  ;;  %2010 = vrot.lane.b32.xlu1 %v1934_v0, %s5965_s23  ;;  %v1914_v18 = vadd.f32 %v1913_v15, %v1912_v60  ;;  %v2934_v36 = vmul.f32 %v7929_v33, %v2926_v16  ;;  %v3027_v27 = vrot.slane %v3018_v6, %v9581_v40  ;;  %v9590_v60 = vld [vmem:[#allocation42_spill] sm:$0xff] }
 0x2a2   :  { %v1921_v43 = vadd.f32 %v1920_v58, %v1919_v2  ;;  %5258 = vmatpush3.bf16.msra.mxu1 %v5509_v42  ;;  %v3023_v17 = vrot.slane %v3018_v6, %v9582_v56  ;;  %v2942_v0 = vmul.f32 %v2926_v16, %v9590_v60  ;;  %v7957_v2 = vld [vmem:[#allocation2 + $0x40] sm:$0xff]  ;;  %v7960_v42 = vld [vmem:[#allocation2 + $0x38] sm:$0xff]  ;;  %v7963_v15 = vld [vmem:[#allocation2 + $0x68] sm:$0xff] }
 0x2a3   :  { %v1932_v51 = vadd.f32 %v1931_v11, %v1930_v1  ;;  %v1915_v22 = vrot.slane %v1914_v18, 1  ;;  %v2941_v1 = vmul.f32 %v2922_v37, %v9589_v25  ;;  %v3041_v50 = vmul.f32 %v7957_v2, %v3027_v27  ;;  %9591 = vst [vmem:[#allocation70_spill] sm:$0xff] %v7963_v15  ;;  %v3131_v31 = vld [vmem:[#allocation9 + $0x7] ss:$8 sm:$0xf] }
 0x2a4   :  { %v1922_v54 = vrot.slane %v1921_v43, 1  ;;  %v3040_v11 = vmul.f32 %v7960_v42, %v3023_v17  ;;  %v3044_v58 = vmul.f32 %v7963_v15, %v3023_v17  ;;  %v3140_v29 = vrot.slane %v3131_v31, %v9581_v40 }
 0x2a5   :  { %v1937_v5 = vpack.c.bf16 %v1932_v51, %v1932_v51  ;;  %v1916_v61 = vadd.f32 %v1915_v22, %v1914_v18  ;;  %v3031_v51 = vrot.slane %v3018_v6, %v9584_v8  ;;  %v9592_v18 = vld [vmem:[#allocation69_spill] sm:$0xff]  ;;  %v3144_v17 = vrot.slane %v3131_v31, %v9584_v8 }
 0x2a6   :  { %v1923_v7 = vadd.f32 %v1922_v54, %v1921_v43  ;;  %v2938_v43 = vmul.f32 %v2926_v16, %v9592_v18  ;;  %v3056_v22 = vrot.slane %v3040_v11, 1  ;;  %v3060_v54 = vrot.slane %v3044_v58, 1  ;;  %v7999_v16 = vpop.permute.xlu0 %3418 }
 0x2a7   :  { %2016 = vrot.lane.b32.xlu1 %v1937_v5, %s5965_s23  ;;  %v1935_v35 = vpack.c.bf16 %v1916_v61, %v1916_v61  ;;  %v3057_v5 = vrot.slane %v3041_v50, 1  ;;  %v3042_v61 = vmul.f32 %v7970_v44, %v3031_v51  ;;  %v3046_v14 = vmul.f32 %v3031_v51, %v9589_v25  ;;  %v8017_v51 = vld [vmem:[#allocation2 + $0x78] sm:$0xff] }
 0x2a8   :  { %v1936_v13 = vpack.c.bf16 %v1923_v7, %v1923_v7  ;;  %v3154_v49 = vmul.f32 %v7957_v2, %v3140_v29  ;;  %v3155_v58 = vmul.f32 %v7970_v44, %v3144_v17  ;;  %v3159_v18 = vmul.f32 %v8017_v51, %v3144_v17 }
 0x2a9   :  { %2012 = vrot.lane.b32.xlu0 %v1935_v35, %s5965_s23  ;;  %v3058_v35 = vrot.slane %v3042_v61, 1  ;;  %v3064_v7 = vrot.slane %v3046_v14, 1 }
 0x2aa   :  { %v8011_v25 = vpop.permute.xlu0 %3422  ;;  %v3185_v61 = vrot.slane %v3159_v18, 2 }
 0x2ab   :  { %2651 = vrot.lane.b32.xlu1 %v2644_v48, %s5971_s1  ;;  %v3061_v48 = vsel %vm720_vm2, %v3056_v22, %v3060_v54  ;;  %v3065_v38 = vsel %vm720_vm2, %v3058_v35, %v3064_v7 }
 0x2ad   :  { %2014 = vrot.lane.b32.xlu0 %v1936_v13, %s5965_s23  ;;  %v3035_v13 = vrot.slane %v3018_v6, %v9580_v32  ;;  %v8001_v6 = vpop.permute.xlu1 %3282 }
 0x2af   :  { %2957 = vrot.lane.b32.xlu1 %v2932_v45, %s5971_s1  ;;  %v3045_v45 = vmul.f32 %v7977_v41, %v3027_v27 }
 0x2b1   :  { %2955 = vrot.lane.b32.xlu0 %v2931_v53, %s5971_s1  ;;  %v3062_v53 = vrot.slane %v3045_v45, 1 }
 0x2b3   :  { %2963 = vrot.lane.b32.xlu1 %v2935_v55, %s5971_s1  ;;  %v7988_v55 = vld [vmem:[#allocation2 + $0x50] sm:$0xff] }
 0x2b4   :  { %v3043_v37 = vmul.f32 %v7988_v55, %v3035_v13 }
 0x2b5   :  { %2959 = vrot.lane.b32.xlu0 %v2933_v59, %s5971_s1  ;;  %v3063_v59 = vsel %vm720_vm2, %v3057_v5, %v3062_v53 }
 0x2b7   :  { %2967 = vrot.lane.b32.xlu1 %v2937_v10, %s5971_s1  ;;  %v3059_v10 = vrot.slane %v3043_v37, 1 }
 0x2b9   :  { %2965 = vrot.lane.b32.xlu0 %v2936_v39, %s5971_s1  ;;  %v3047_v39 = vmul.f32 %v7994_v34, %v3035_v13  ;;  %v3148_v13 = vrot.slane %v3131_v31, %v9580_v32 }
 0x2bb   :  { %2973 = vrot.lane.b32.xlu1 %v2940_v62, %s5971_s1  ;;  %v3136_v62 = vrot.slane %v3131_v31, %v9582_v56  ;;  %v3156_v31 = vmul.f32 %v7988_v55, %v3148_v13 }
 0x2bd   :  { %2971 = vrot.lane.b32.xlu0 %v2939_v63, %s5971_s1  ;;  %v3153_v63 = vmul.f32 %v7960_v42, %v3136_v62  ;;  %v3157_v27 = vmul.f32 %v7963_v15, %v3136_v62 }
 0x2bf   :  { %2961 = vrot.lane.b32.xlu1 %v2934_v36, %s5971_s1  ;;  %v3066_v36 = vrot.slane %v3047_v39, 1  ;;  %v3177_v50 = vrot.slane %v3153_v63, 2  ;;  %v3181_v11 = vrot.slane %v3157_v27, 2 }
 0x2c1   :  { %2975 = vrot.lane.b32.xlu0 %v2941_v1, %s5971_s1  ;;  %v8013_v1 = vpop.permute.xlu1 %3286  ;;  %v3067_v60 = vsel %vm720_vm2, %v3059_v10, %v3066_v36 }
 0x2c3   :  { %2977 = vrot.lane.b32.xlu1 %v2942_v0, %s5971_s1  ;;  %v3178_v0 = vrot.slane %v3154_v49, 2 }
 0x2c5   :  { %2969 = vrot.lane.b32.xlu0 %v2938_v43, %s5971_s1  ;;  %v8020_v43 = vld [vmem:[#allocation2 + $0xa0] sm:$0x1] }
 0x2c6   :  { %v3162_v14 = vmul.f32 %v3140_v29, %v8020_v43 }
 0x2c7   :  { %3070 = vrot.lane.b32.xlu1 %v3057_v5, %s5971_s1  ;;  %v3158_v5 = vmul.f32 %v7977_v41, %v3140_v29 }
 0x2c8   :  { %v3191_v37 = vrot.slane %v3162_v14, 2 }
 0x2c9   :  { %3068 = vrot.lane.b32.xlu0 %v3056_v22, %s5971_s1  ;;  %v3182_v22 = vsel %vm831_vm3, %v3177_v50, %v3181_v11  ;;  %v3183_v45 = vrot.slane %v3158_v5, 2 }
 0x2cb   :  { %3076 = vrot.lane.b32.xlu1 %v3061_v48, %s5971_s1  ;;  %v3285_v48 = vpop.permute.xlu0 %3284  ;;  %v3192_v63 = vsel %vm831_vm3, %v3183_v45, %v3191_v37 }
 0x2cd   :  { %3072 = vrot.lane.b32.xlu0 %v3058_v35, %s5971_s1  ;;  %v8027_v35 = vpop.permute.xlu1 %3288 }
 0x2cf   :  { %3080 = vrot.lane.b32.xlu1 %v3065_v38, %s5971_s1  ;;  %v8034_v38 = vld [vmem:[#allocation2 + $0xa8] sm:$0x1]  ;;  %v8042_v39 = vpop.permute.xlu0 %3424 }
 0x2d0   :  { %v3163_v49 = vmul.f32 %v3144_v17, %v8034_v38 }
 0x2d1   :  { %3078 = vrot.lane.b32.xlu0 %v3063_v59, %s5971_s1  ;;  %v8044_v29 = vpop.permute.xlu1 %3561 }
 0x2d2   :  { %v3193_v18 = vrot.slane %v3163_v49, 2 }
 0x2d3   :  { %3086 = vrot.lane.b32.xlu1 %v3062_v53, %s5971_s1 }
 0x2d5   :  { %3084 = vrot.lane.b32.xlu0 %v3060_v54, %s5971_s1  ;;  %v3179_v54 = vrot.slane %v3155_v58, 2  ;;  %v8057_v17 = vpop.permute.xlu1 %3565 }
 0x2d7   :  { %3074 = vrot.lane.b32.xlu1 %v3059_v10, %s5971_s1  ;;  %v3186_v53 = vsel %vm831_vm3, %v3179_v54, %v3185_v61  ;;  %v8038_v10 = vld [vmem:[#allocation2 + $0xb0] sm:$0x1] }
 0x2d9   :  { %3088 = vrot.lane.b32.xlu0 %v3064_v7, %s5971_s1  ;;  %v8029_v7 = vld [vmem:[#allocation2 + $0x98] sm:$0x1] }
 0x2da   :  { %v3161_v59 = vmul.f32 %v3136_v62, %v8029_v7  ;;  %v3160_v62 = vmul.f32 %v7994_v34, %v3148_v13 }
 0x2db   :  { %3090 = vrot.lane.b32.xlu1 %v3066_v36, %s5971_s1  ;;  %v3184_v36 = vsel %vm831_vm3, %v3178_v0, %v3183_v45 }
 0x2dc   :  { %v3189_v27 = vrot.slane %v3161_v59, 2  ;;  %v3303_v59 = vmul.f32 %v7960_v42, %v8001_v6 }
 0x2dd   :  { %3082 = vrot.lane.b32.xlu0 %v3067_v60, %s5971_s1  ;;  %v3164_v60 = vmul.f32 %v3148_v13, %v8038_v10  ;;  %v8069_v13 = vpop.permute.xlu1 %2711 }
 0x2de   :  { %v3190_v58 = vsel %vm831_vm3, %v3181_v11, %v3189_v27  ;;  %v3290_v11 = vsel %vm113_vm0, %v8001_v6, %v3285_v48 }
 0x2df   :  { %3199 = vrot.lane.b32.xlu1 %v3178_v0, %s5971_s1  ;;  %v3187_v0 = vrot.slane %v3160_v62, 2  ;;  %v3195_v5 = vrot.slane %v3164_v60, 2 }
 0x2e1   :  { %3197 = vrot.lane.b32.xlu0 %v3177_v50, %s5971_s1  ;;  %v3180_v50 = vrot.slane %v3156_v31, 2  ;;  %v3196_v14 = vsel %vm831_vm3, %v3187_v0, %v3195_v5  ;;  %v8083_v49 = vpop.permute.xlu1 %2715 }
 0x2e3   :  { %3205 = vrot.lane.b32.xlu1 %v3182_v22, %s5971_s1  ;;  %v8055_v22 = vpop.permute.xlu0 %3559  ;;  %v3188_v37 = vsel %vm831_vm3, %v3180_v50, %v3187_v0 }
 0x2e4   :  { %v3575_v47 = vmul.f32 %v7960_v42, %v8055_v22  ;;  %v8248_v26 = vmul.f32 %v7963_v15, %v8055_v22  ;;  %v3585_v32 = vmul.f32 %v8055_v22, %v8029_v7 }
 0x2e5   :  { %3201 = vrot.lane.b32.xlu0 %v3179_v54, %s5971_s1  ;;  %v3194_v54 = vsel %vm831_vm3, %v3185_v61, %v3193_v18  ;;  %v3298_v61 = vmul.f32 %v7929_v33, %v8001_v6  ;;  %v8093_v60 = vpop.permute.xlu1 %2810  ;;  %v3308_v18 = vmul.f32 %v7963_v15, %v8001_v6 }
 0x2e7   :  { %3209 = vrot.lane.b32.xlu1 %v3186_v53, %s5971_s1  ;;  %v8067_v45 = vpop.permute.xlu0 %3563  ;;  %v3299_v53 = vmul.f32 %v7929_v33, %v3290_v11 }
 0x2e9   :  { %3207 = vrot.lane.b32.xlu0 %v3184_v36, %s5971_s1  ;;  %v3291_v36 = vsel %vm113_vm0, %v3285_v48, %v8013_v1  ;;  %v3304_v48 = vmul.f32 %v7957_v2, %v3290_v11 }
 0x2ea   :  { %v3305_v27 = vmul.f32 %v7970_v44, %v3291_v36 }
 0x2eb   :  { %3215 = vrot.lane.b32.xlu1 %v3192_v63, %s5971_s1  ;;  %v8081_v31 = vpop.permute.xlu0 %2709  ;;  %v3300_v63 = vmul.f32 %v7929_v33, %v3291_v36 }
 0x2ed   :  { %3213 = vrot.lane.b32.xlu0 %v3190_v58, %s5971_s1  ;;  %v3292_v58 = vsel %vm113_vm0, %v8013_v1, %v8027_v35 }
 0x2ee   :  { %v3301_v0 = vmul.f32 %v7929_v33, %v3292_v58 }
 0x2ef   :  { %3203 = vrot.lane.b32.xlu1 %v3180_v50, %s5971_s1  ;;  %v8091_v62 = vpop.permute.xlu0 %2713  ;;  %v3309_v50 = vmul.f32 %v7977_v41, %v3290_v11  ;;  %v3306_v11 = vmul.f32 %v7988_v55, %v3292_v58 }
 0x2f1   :  { %3217 = vrot.lane.b32.xlu0 %v3194_v54, %s5971_s1  ;;  %v8107_v54 = vpop.permute.xlu1 %2645 }
 0x2f3   :  { %3219 = vrot.lane.b32.xlu1 %v3196_v14, %s5971_s1  ;;  %v8105_v5 = vpop.permute.xlu0 %2808  ;;  %v3310_v14 = vmul.f32 %v8017_v51, %v3291_v36  ;;  %v3427_v36 = vsel %vm113_vm0, %v7986_v28, %v8011_v25 }
 0x2f4   :  { %v8257_v19 = vmul.f32 %v7929_v33, %v8105_v5 }
 0x2f5   :  { %3211 = vrot.lane.b32.xlu0 %v3188_v37, %s5971_s1  ;;  %v8117_v1 = vpop.permute.xlu1 %2649 }
 0x2f7   :  { %3330 = vrot.lane.b32.xlu1 %v3299_v53, %s5967_s3  ;;  %v3260_v53 = vld [vmem:[#allocation2 + $0x28] sm:$0xff]  ;;  %v8115_v6 = vpop.permute.xlu0 %2812 }
 0x2f8   :  { %v3302_v37 = vmul.f32 %v8027_v35, %v3260_v53  ;;  %v2817_v12 = vsel %vm626_vm4, %v8093_v60, %v8115_v6 }
 0x2f9   :  { %3328 = vrot.lane.b32.xlu0 %v3298_v61, %s5967_s3  ;;  %v3311_v61 = vmul.f32 %v7994_v34, %v3292_v58 }
 0x2fb   :  { %3338 = vrot.lane.b32.xlu1 %v3303_v59, %s5967_s3  ;;  %v3434_v59 = vmul.f32 %v7960_v42, %v7999_v16  ;;  %v8140_v53 = vpop.permute.xlu0 %2647 }
 0x2fd   :  { %3332 = vrot.lane.b32.xlu0 %v3300_v63, %s5967_s3  ;;  %v8126_v63 = vld [vmem:[#allocation2 + $0x58] sm:$0xff]  ;;  %v3454_v58 = vrot.slane %v3434_v59, 1  ;;  %v3439_v59 = vmul.f32 %v7963_v15, %v7999_v16 }
 0x2ff   :  { %3342 = vrot.lane.b32.xlu1 %v3305_v27, %s5967_s3  ;;  %v3426_v27 = vsel %vm113_vm0, %v7999_v16, %v7986_v28  ;;  %v8151_v46 = vpop.permute.xlu0 %2814  ;;  %v3459_v20 = vrot.slane %v3439_v59, 1  ;;  %v9593_v59 = vmov 0  }
 0x301   :  { %3340 = vrot.lane.b32.xlu0 %v3304_v48, %s5967_s3  ;;  %v2009_v48 = vpop.permute.xlu1 %2008 }
 0x303   :  { %3350 = vrot.lane.b32.xlu1 %v3309_v50, %s5967_s3  ;;  %v3307_v50 = vmul.f32 %v8027_v35, %v8126_v63 }
 0x305   :  { %3348 = vrot.lane.b32.xlu0 %v3308_v18, %s5967_s3  ;;  %v3436_v18 = vmul.f32 %v7970_v44, %v3427_v36 }
 0x307   :  { %3334 = vrot.lane.b32.xlu1 %v3301_v0, %s5967_s3  ;;  %v3440_v0 = vmul.f32 %v7977_v41, %v3426_v27 }
 0x309   :  { %3352 = vrot.lane.b32.xlu0 %v3310_v14, %s5967_s3  ;;  %v8137_v14 = vld [vmem:[#allocation2 + $0x88] sm:$0xff]  ;;  %v3461_v21 = vrot.slane %v3440_v0, 1  ;;  %v3460_v0 = vsel %vm720_vm2, %v3454_v58, %v3459_v20 }
 0x30b   :  { %3344 = vrot.lane.b32.xlu1 %v3306_v11, %s5967_s3  ;;  %v3435_v11 = vmul.f32 %v7957_v2, %v3426_v27  ;;  %v3441_v27 = vmul.f32 %v8017_v51, %v3427_v36 }
 0x30d   :  { %3336 = vrot.lane.b32.xlu0 %v3302_v37, %s5967_s3  ;;  %v3312_v37 = vmul.f32 %v8027_v35, %v8137_v14  ;;  %v3455_v24 = vrot.slane %v3435_v11, 1  ;;  %v3463_v35 = vrot.slane %v3441_v27, 1 }
 0x30f   :  { %3354 = vrot.lane.b32.xlu1 %v3311_v61, %s5967_s3  ;;  %v3456_v61 = vrot.slane %v3436_v18, 1  ;;  %v3462_v3 = vsel %vm720_vm2, %v3455_v24, %v3461_v21 }
 0x311   :  { %3346 = vrot.lane.b32.xlu0 %v3307_v50, %s5967_s3 }
 0x313   :  { %3469 = vrot.lane.b32.xlu1 %v3454_v58, %s5967_s3  ;;  %v2011_v28 = vpop.permute.xlu1 %2010 }
 0x314   :  { %v2019_v36 = vsel %vm113_vm0, %v2009_v48, %v2011_v28  ;;  %v3438_v48 = vmul.f32 %v8042_v39, %v8126_v63 }
 0x315   :  { %3356 = vrot.lane.b32.xlu0 %v3312_v37, %s5967_s3 }
 0x317   :  { %3473 = vrot.lane.b32.xlu1 %v3456_v61, %s5967_s3 }
 0x319   :  { %v2017_v50 = vpop.permute.xlu1 %2016  ;;  %3471 = vrot.lane.b32.xlu0 %v3455_v24, %s5967_s3  ;;  %v3464_v24 = vsel %vm720_vm2, %v3456_v61, %v3463_v35 }
 0x31b   :  { %3481 = vrot.lane.b32.xlu1 %v3462_v3, %s5967_s3  ;;  %v2013_v16 = vpop.permute.xlu0 %2012 }
 0x31c   :  { %v2020_v11 = vsel %vm113_vm0, %v2011_v28, %v2013_v16  ;;  %v3428_v28 = vsel %vm113_vm0, %v8011_v25, %v8042_v39 }
 0x31d   :  { %v8156_v18 = vpop.permute.xlu1 %2651  ;;  %3479 = vrot.lane.b32.xlu0 %v3460_v0, %s5967_s3  ;;  %2251 = vmatprep.mubr.bf16.mxu0 %v2020_v11  ;;  %v3458_v0 = vrot.slane %v3438_v48, 1  ;;  %v3442_v25 = vmul.f32 %v7994_v34, %v3428_v28 }
 0x31e   :  { %2252 = vmatmul.mubr.bf16.vlgmr.msra.gmra.mrb[8].mxu0 %v2019_v36 }
 0x31f   :  { %3489 = vrot.lane.b32.xlu1 %v3459_v20, %s5967_s3  ;;  %v2015_v37 = vpop.permute.xlu0 %2014  ;;  %2390 = vmatprep.mubr.bf16.mxu0 %v9593_v59  ;;  %v3443_v20 = vmul.f32 %v8042_v39, %v8137_v14 }
 0x320   :  { %v2021_v27 = vsel %vm113_vm0, %v2013_v16, %v2015_v37  ;;  %v2022_v58 = vsel %vm113_vm0, %v2015_v37, %v2017_v50  ;;  %v3437_v50 = vmul.f32 %v7988_v55, %v3428_v28  ;;  %v2718_v28 = vsel %vm626_vm4, %v8069_v13, %v8091_v62 }
 0x321   :  { %v8164_v3 = vpop.permute.xlu1 %2957  ;;  %3483 = vrot.lane.b32.xlu0 %v3464_v24, %s5967_s3  ;;  %2291 = vmatprep.mubr.bf16.mxu1 %v2022_v58  ;;  %v3467_v39 = vrot.slane %v3443_v20, 1  ;;  %v3567_v24 = vsel %vm113_vm0, %v8055_v22, %v8044_v29  ;;  %v8202_v58 = vmul.f32 %v7929_v33, %v8081_v31  ;;  %v8241_v30 = vmul.f32 %v7957_v2, %v2718_v28 }
 0x322   :  { %2292 = vmatmul.mubr.bf16.vlgmr.msra.gmra.mrb[8].mxu1 %v2021_v27  ;;  %v3457_v36 = vrot.slane %v3437_v50, 1  ;;  %v3465_v27 = vrot.slane %v3442_v25, 1  ;;  %v8237_v23 = vmul.f32 %v7957_v2, %v3567_v24 }
 0x323   :  { %3493 = vrot.lane.b32.xlu1 %v3463_v35, %s5967_s3  ;;  %v8178_v61 = vpop.permute.xlu0 %2955  ;;  %2431 = vmatprep.mubr.bf16.mxu1 %v9593_v59  ;;  %v2717_v35 = vsel %vm626_vm4, %v8081_v31, %v8069_v13  ;;  %v3468_v48 = vsel %vm720_vm2, %v3458_v0, %v3467_v39 }
 0x324   :  { %v8210_v20 = vmul.f32 %v7960_v42, %v2717_v35  ;;  %v8213_v50 = vmul.f32 %v7963_v15, %v2717_v35  ;;  %v2622_v35 = vld [vmem:[#allocation2 + $0x90] sm:$0x1]  ;;  %v3466_v4 = vsel %vm720_vm2, %v3457_v36, %v3465_v27  ;;  %v3606_v59 = vrot.slane %v8237_v23, 2 }
 0x325   :  { %v8180_v16 = vpop.permute.xlu1 %2963  ;;  %3491 = vrot.lane.b32.xlu0 %v3461_v21, %s5967_s3  ;;  %v3568_v21 = vsel %vm113_vm0, %v8044_v29, %v8067_v45  ;;  %v8217_v29 = vmul.f32 %v7977_v41, %v3567_v24  ;;  %v2654_v23 = vsel %vm626_vm4, %v8140_v53, %v8117_v1 }
 0x326   :  { %9594 = vst [vmem:[#allocation74_spill] sm:$0xff] %v8180_v16  ;;  %9596 = vst [vmem:[#allocation24_spill] sm:$0xff] %v8213_v50  ;;  %v8220_v31 = vmul.f32 %v8017_v51, %v3568_v21  ;;  %v8230_v52 = vmul.f32 %v3568_v21, %v8034_v38  ;;  %v2661_v16 = vmul.f32 %v7929_v33, %v8107_v54 }
 0x327   :  { %3477 = vrot.lane.b32.xlu1 %v3458_v0, %s5967_s3  ;;  %v8190_v11 = vpop.permute.xlu0 %2959  ;;  %v8223_v0 = vmul.f32 %v3567_v24, %v8020_v43  ;;  %v2816_v24 = vsel %vm626_vm4, %v8105_v5, %v8093_v60  ;;  %v8304_v60 = vmul.f32 %v7957_v2, %v2817_v12 }
 0x328   :  { %9595 = vst [vmem:[#allocation38_spill] sm:$0xff] %v8190_v11  ;;  %v9305_v40 = vrot.slane %v8220_v31, 2 }
 0x329   :  { %v8192_v37 = vpop.permute.xlu1 %2967  ;;  %3475 = vrot.lane.b32.xlu0 %v3457_v36, %s5967_s3 }
 0x32b   :  { %3487 = vrot.lane.b32.xlu1 %v3468_v48, %s5967_s3  ;;  %v8225_v25 = vpop.permute.xlu0 %2965  ;;  %v2719_v48 = vsel %vm626_vm4, %v8091_v62, %v8083_v49  ;;  %v8251_v62 = vmul.f32 %v7977_v41, %v2718_v28  ;;  %v8268_v28 = vmul.f32 %v7988_v55, %v8083_v49 }
 0x32c   :  { %9597 = vst [vmem:[#allocation53_spill] sm:$0xff] %v8225_v25  ;;  %v8264_v9 = vmul.f32 %v7970_v44, %v2719_v48  ;;  %v8295_v25 = vmul.f32 %v7960_v42, %v2816_v24 }
 0x32d   :  { %v8227_v13 = vpop.permute.xlu1 %2973  ;;  %3485 = vrot.lane.b32.xlu0 %v3466_v4, %s5967_s3  ;;  %9599 = vst [vmem:[#allocation37_spill] sm:$0xff] %v8251_v62  ;;  %v8261_v4 = vmul.f32 %v8105_v5, %v2622_v35  ;;  %v8282_v35 = vmul.f32 %v7994_v34, %v8083_v49  ;;  %v3605_v5 = vrot.slane %v3575_v47, 2  ;;  %v2663_v47 = vmul.f32 %v7929_v33, %v2654_v23 }
 0x32e   :  { %9598 = vst [vmem:[#allocation64_spill] sm:$0xff] %v8227_v13  ;;  %v2747_v13 = vrot.slane %v8241_v30, 1  ;;  %v8317_v30 = vmul.f32 %v7977_v41, %v2817_v12 }
 0x32f   :  { %3497 = vrot.lane.b32.xlu1 %v3467_v39, %s5967_s3  ;;  %9600 = vst [vmem:[#allocation25_spill] sm:$0xff] %v8261_v4  ;;  %v8273_v36 = vpop.permute.xlu0 %2971  ;;  %v8278_v39 = vmul.f32 %v8017_v51, %v2719_v48  ;;  %v3577_v48 = vmul.f32 %v7970_v44, %v3568_v21  ;;  %v8307_v21 = vmul.f32 %v7963_v15, %v2816_v24  ;;  %v9604_v4 = vrot.slane %v8248_v26, 2 }
 0x330   :  { %9601 = vst [vmem:[#allocation23_spill] sm:$0xff] %v8273_v36  ;;  %v8326_v36 = vmul.f32 %v2816_v24, %v8029_v7  ;;  %v2668_v24 = vmul.f32 %v7957_v2, %v2654_v23  ;;  %v2777_v50 = vadd.f32 %v2747_v13, %v2663_v47  ;;  %v9608_v7 = vrot.slane %v8251_v62, 1 }
 0x331   :  { %v8275_v57 = vpop.permute.xlu1 %2961  ;;  %3495 = vrot.lane.b32.xlu0 %v3465_v27, %s5967_s3  ;;  %9603 = vst [vmem:[#allocation58_spill] sm:$0xff] %v8307_v21  ;;  %v3611_v15 = vsel %vm831_vm3, %v3605_v5, %v9604_v4  ;;  %v3607_v11 = vrot.slane %v3577_v48, 2  ;;  %v3612_v4 = vrot.slane %v8217_v29, 2  ;;  %v8367_v21 = vmul.f32 %v7977_v41, %v2654_v23 }
 0x332   :  { %9602 = vst [vmem:[#allocation62_spill] sm:$0xff] %v8275_v57  ;;  %9605 = vst [vmem:[#allocation60_spill] sm:$0xff] %v8326_v36  ;;  %v8329_v57 = vmul.f32 %v2817_v12, %v8020_v43  ;;  %v8347_v43 = vsel %vm626_vm4, %v8107_v54, %v8140_v53  ;;  %v3569_v54 = vsel %vm113_vm0, %v8067_v45, %v8057_v17 }
 0x333   :  { %3632 = vrot.lane.b32.xlu1 %v3606_v59, %s5967_s3  ;;  %v8309_v27 = vpop.permute.xlu0 %2975  ;;  %v3615_v2 = vsel %vm831_vm3, %v3607_v11, %v9305_v40  ;;  %9607 = vst [vmem:[#allocation61_spill] sm:$0xff] %v8367_v21  ;;  %v2755_v22 = vsel %vm720_vm2, %v2747_v13, %v9608_v7  ;;  %v2662_v47 = vmul.f32 %v7929_v33, %v8347_v43 }
 0x334   :  { %9606 = vst [vmem:[#allocation45_spill] sm:$0xff] %v8329_v57  ;;  %v3622_v57 = vrot.slane %v8223_v0, 2  ;;  %v8377_v45 = vadd.f32 %v2755_v22, %v2668_v24  ;;  %v3613_v23 = vsel %vm831_vm3, %v3606_v59, %v3612_v4  ;;  %v9609_v24 = vrot.slane %v8304_v60, 2 }
 0x335   :  { %v8311_v49 = vpop.permute.xlu1 %2977  ;;  %3630 = vrot.lane.b32.xlu0 %v3605_v5, %s5967_s3  ;;  %v8339_v5 = vmul.f32 %v7994_v34, %v8151_v46  ;;  %v3583_v0 = vmul.f32 %v7994_v34, %v3569_v54  ;;  %v8402_v40 = vsel %vm626_vm4, %v8117_v1, %v8156_v18  ;;  %v2675_v36 = vmul.f32 %v7994_v34, %v8156_v18 }
 0x336   :  { %v8394_v22 = vadd.f32 %v9609_v24, %v2777_v50  ;;  %v3623_v53 = vsel %vm831_vm3, %v3612_v4, %v3622_v57  ;;  %v9610_v50 = vrot.slane %v8210_v20, 1  ;;  %v8416_v57 = vmul.f32 %v7988_v55, %v8151_v46 }
 0x337   :  { %3640 = vrot.lane.b32.xlu1 %v3611_v15, %s5967_s3  ;;  %v8342_v48 = vpop.permute.xlu0 %2969  ;;  %v8351_v15 = vmul.f32 %v8151_v46, %v8038_v10  ;;  %v3624_v24 = vrot.slane %v8230_v52, 2  ;;  %v2674_v62 = vmul.f32 %v8017_v51, %v8402_v40  ;;  %v3616_v52 = vrot.slane %v3583_v0, 2 }
 0x338   :  { %v3588_v34 = vmul.f32 %v3569_v54, %v8038_v10  ;;  %v3584_v0 = vmul.f32 %v8057_v17, %v8137_v14  ;;  %v9614_v10 = vrot.slane %v8282_v35, 1  ;;  %v2669_v14 = vmul.f32 %v7970_v44, %v8402_v40 }
 0x339   :  { %v3071_v12 = vpop.permute.xlu1 %3070  ;;  %3634 = vrot.lane.b32.xlu0 %v3607_v11, %s5967_s3  ;;  %v2818_v11 = vsel %vm626_vm4, %v8115_v6, %v8151_v46  ;;  %v3578_v6 = vmul.f32 %v7988_v55, %v3569_v54  ;;  %v2877_v7 = vrot.slane %v8351_v15, 2 }
 0x33a   :  { %v2832_v59 = vmul.f32 %v8017_v51, %v2818_v11  ;;  %v2837_v15 = vmul.f32 %v2818_v11, %v8034_v38  ;;  %v3579_v51 = vmul.f32 %v8057_v17, %v8126_v63  ;;  %v2789_v54 = vadd.f32 %v9614_v10, %v2675_v36 }
 0x33b   :  { %3644 = vrot.lane.b32.xlu1 %v3615_v2, %s5967_s3  ;;  %v8381_v29 = vpop.permute.xlu0 %3068  ;;  %v3620_v2 = vrot.slane %v3585_v32, 2  ;;  %v8405_v32 = vmul.f32 %v7970_v44, %v2818_v11  ;;  %v9616_v63 = vrot.slane %v8278_v39, 1  ;;  %v9621_v44 = vrot.slane %v8268_v28, 1  ;;  %v8484_v39 = vld [vmem:[#allocation10] sm:$0xf] }
 0x33c   :  { %v8387_v13 = vsel %vm626_vm4, %v8381_v29, %v3071_v12  ;;  %v2865_v21 = vrot.slane %v2832_v59, 2 }
 0x33d   :  { %v8383_v41 = vpop.permute.xlu1 %3076  ;;  %3642 = vrot.lane.b32.xlu0 %v3613_v23, %s5967_s3  ;;  %v8412_v23 = vadd.f32 %v9610_v50, %v2662_v47  ;;  %v3608_v47 = vrot.slane %v3578_v6, 2  ;;  %v9613_v50 = vrot.slane %v8202_v58, 1 }
 0x33f   :  { %3652 = vrot.lane.b32.xlu1 %v3623_v53, %s5967_s3  ;;  %v3073_v4 = vpop.permute.xlu0 %3072  ;;  %v9612_v53 = vrot.slane %v8248_v26, 2  ;;  %v8431_v46 = vadd.f32 %v9613_v50, %v2661_v16  ;;  %v2670_v16 = vmul.f32 %v7988_v55, %v8156_v18  ;;  %v9615_v55 = vrot.slane %v8220_v31, 2 }
 0x340   :  { %v8424_v38 = vsel %vm626_vm4, %v3071_v12, %v3073_v4  ;;  %v2857_v12 = vrot.slane %v8405_v32, 2  ;;  %v3617_v36 = vsel %vm831_vm3, %v3608_v47, %v3616_v52  ;;  %v3626_v50 = vrot.slane %v3588_v34, 2 }
 0x341   :  { %v8418_v1 = vpop.permute.xlu1 %3080  ;;  %9611 = vst [vmem:[#allocation35_spill] sm:$0xff] %v8424_v38  ;;  %v3621_v11 = vsel %vm831_vm3, %v9612_v53, %v3620_v2  ;;  %v2875_v38 = vrot.slane %v2837_v15, 2  ;;  %v3625_v15 = vsel %vm831_vm3, %v9615_v55, %v3624_v24  ;;  %v3263_v53 = vld [vmem:[#allocation2 + $0xb8] sm:$0x1]  ;;  %v9618_v24 = vmov %v9616_v63 }
 0x342   :  { %3650 = vrot.lane.b32.xlu0 %v3621_v11, %s5967_s3  ;;  %v2788_v11 = vadd.f32 %v9616_v63, %v2674_v62  ;;  %v9619_v55 = vrot.slane %v8264_v9, 1  ;;  %v9620_v63 = vrot.slane %v8282_v35, 1  ;;  %v3609_v34 = vrot.slane %v3579_v51, 2 }
 0x343   :  { %3636 = vrot.lane.b32.xlu1 %v3608_v47, %s5967_s3  ;;  %v3079_v58 = vpop.permute.xlu0 %3078  ;;  %v2876_v10 = vsel %vm831_vm3, %v2865_v21, %v2875_v38  ;;  %v2987_v35 = vsel %vm626_vm4, %v8309_v27, %v8311_v49  ;;  %v9658_v32 = vrot.slane %v8317_v30, 2 }
 0x344   :  { %v8450_v6 = vsel %vm626_vm4, %v8383_v41, %v3079_v58  ;;  %v8454_v59 = vsel %vm626_vm4, %v3079_v58, %v8418_v1  ;;  %v9617_v58 = vrot.slane %v8339_v5, 2  ;;  %v2757_v62 = vsel %vm720_vm2, %v9619_v55, %v9618_v24 }
 0x345   :  { %v3087_v2 = vpop.permute.xlu1 %3086  ;;  %v2907_v51 = vadd.f32 %v2876_v10, %v2788_v11 }
 0x346   :  { %3654 = vrot.lane.b32.xlu0 %v3625_v15, %s5967_s3  ;;  %v2878_v31 = vsel %vm831_vm3, %v9617_v58, %v2877_v7  ;;  %v2759_v15 = vsel %vm720_vm2, %v9621_v44, %v9620_v63  ;;  %v3618_v7 = vrot.slane %v3584_v0, 2  ;;  %v3589_v58 = vmul.f32 %v8057_v17, %v3263_v53 }
 0x347   :  { %3646 = vrot.lane.b32.xlu1 %v3617_v36, %s5967_s3  ;;  %v2784_v47 = vadd.f32 %v2759_v15, %v2670_v16  ;;  %v8480_v38 = vpop.permute.xlu0 %3084  ;;  %v2908_v24 = vadd.f32 %v2878_v31, %v2789_v54  ;;  %v2783_v36 = vadd.f32 %v2757_v62, %v2669_v14  ;;  %v3627_v0 = vsel %vm831_vm3, %v3616_v52, %v3626_v50 }
 0x348   :  { %v8492_v55 = vsel %vm626_vm4, %v8480_v38, %v3087_v2  ;;  %v2866_v54 = vsel %vm831_vm3, %v2857_v12, %v2865_v21  ;;  %v9622_v53 = vrot.slane %v8339_v5, 2  ;;  %v9623_v31 = vrot.slane %v8416_v57, 2 }
 0x349   :  { %v8482_v26 = vpop.permute.xlu1 %3074  ;;  %v3017_v17 = vadd.f32 %v8311_v49, %v2908_v24  ;;  %v3016_v11 = vadd.f32 %v2987_v35, %v2907_v51  ;;  %v3619_v49 = vsel %vm831_vm3, %v3609_v34, %v3618_v7  ;;  %v3628_v10 = vrot.slane %v3589_v58, 2 }
 0x34a   :  { %v8496_v16 = vsel %vm626_vm4, %v3073_v4, %v8482_v26  ;;  %3638 = vrot.lane.b32.xlu0 %v3609_v34, %s5967_s3  ;;  %v2868_v63 = vsel %vm831_vm3, %v9623_v31, %v9622_v53  ;;  %v3707_v4 = vrot.slane %v8484_v39, %v9582_v56  ;;  %v2984_v21 = vsel %vm626_vm4, %v8192_v37, %v8342_v48 }
 0x34b   :  { %3656 = vrot.lane.b32.xlu1 %v3627_v0, %s5967_s3  ;;  %v2903_v14 = vadd.f32 %v2868_v63, %v2784_v47  ;;  %v3089_v52 = vpop.permute.xlu0 %3088  ;;  %v9624_v15 = vrot.slane %v8257_v19, 2  ;;  %v2667_v34 = vmul.f32 %v7960_v42, %v8347_v43  ;;  %v2902_v24 = vadd.f32 %v2866_v54, %v2783_v36  ;;  %v9626_v36 = vld [vmem:[#allocation24_spill] sm:$0xff] }
 0x34c   :  { %v8517_v5 = vsel %vm626_vm4, %v3087_v2, %v3089_v52  ;;  %v2979_v2 = vsel %vm626_vm4, %v8178_v61, %v8164_v3  ;;  %v3715_v51 = vrot.slane %v8484_v39, %v9584_v8  ;;  %v9625_v0 = vrot.slane %v8295_v25, 2 }
 0x34d   :  { %v3091_v50 = vpop.permute.xlu1 %3090  ;;  %v2894_v47 = vadd.f32 %v9624_v15, %v8431_v46  ;;  %v3012_v35 = vadd.f32 %v8342_v48, %v2903_v14  ;;  %v9628_v54 = vrot.slane %v8210_v20, 1  ;;  %v3011_v31 = vadd.f32 %v2984_v21, %v2902_v24  ;;  %v9629_v14 = vld [vmem:[#allocation74_spill] sm:$0xff]  ;;  %v9630_v20 = vld [vmem:[#allocation20_spill] sm:$0xff] }
 0x34e   :  { %v3100_v62 = vsel %vm626_vm4, %v3089_v52, %v3091_v50  ;;  %v8520_v44 = vadd.f32 %v3091_v50, %v3017_v17  ;;  %3648 = vrot.lane.b32.xlu0 %v3619_v49, %s5967_s3  ;;  %v2895_v42 = vadd.f32 %v9625_v0, %v8412_v23  ;;  %v9627_v17 = vrot.slane %v9626_v36, 1 }
 0x34f   :  { %v8528_v58 = vadd.f32 %v3100_v62, %v3016_v11  ;;  %3720 = vrot.lane.b32.xlu1 %v3707_v4, %s5971_s1  ;;  %v3083_v63 = vpop.permute.xlu0 %3082  ;;  %v3629_v11 = vsel %vm831_vm3, %v3618_v7, %v3628_v10  ;;  %v3003_v4 = vadd.f32 %v8178_v61, %v2894_v47  ;;  %v3008_v52 = vadd.f32 %v9629_v14, %v2894_v47  ;;  %v9631_v61 = vld [vmem:[#allocation38_spill] sm:$0xff] }
 0x350   :  { %v2753_v53 = vsel %vm720_vm2, %v9628_v54, %v9627_v17  ;;  %v3097_v49 = vsel %vm626_vm4, %v8418_v1, %v3083_v63  ;;  %v8550_v50 = vadd.f32 %v3083_v63, %v3012_v35  ;;  %v3004_v23 = vadd.f32 %v2979_v2, %v2895_v42 }
 0x351   :  { %v3200_v48 = vpop.permute.xlu1 %3199  ;;  %v2781_v62 = vadd.f32 %v2753_v53, %v2667_v34  ;;  %v8552_v15 = vadd.f32 %v3097_v49, %v3011_v31  ;;  %v3711_v21 = vrot.slane %v8484_v39, %v9630_v20  ;;  %v2665_v7 = vmul.f32 %v7929_v33, %v8156_v18  ;;  %v9632_v34 = vld [vmem:[#allocation58_spill] sm:$0xff] }
 0x352   :  { %3658 = vrot.lane.b32.xlu0 %v3629_v11, %s5967_s3  ;;  %v2980_v10 = vsel %vm626_vm4, %v8164_v3, %v9631_v61  ;;  %v3116_v1 = vadd.f32 %v8381_v29, %v3003_v4  ;;  %v3121_v47 = vadd.f32 %v8383_v41, %v3008_v52  ;;  %v9633_v24 = vrot.slane %v9632_v34, 2  ;;  %v9639_v11 = vld [vmem:[#allocation53_spill] sm:$0xff] }
 0x353   :  { %3724 = vrot.lane.b32.xlu1 %v3715_v51, %s5971_s1  ;;  %v9634_v2 = vmov %v9625_v0  ;;  %v9635_v0 = vld [vmem:[#allocation70_spill] sm:$0xff]  ;;  %v2664_v18 = vmul.f32 %v7929_v33, %v8402_v40  ;;  %v3117_v3 = vadd.f32 %v8387_v13, %v3004_v23  ;;  %v3198_v17 = vpop.permute.xlu0 %3197  ;;  %v9636_v41 = vrot.slane %v8317_v30, 2  ;;  %v9638_v33 = vld [vmem:[#allocation21_spill] sm:$0xff] }
 0x354   :  { %v2862_v35 = vsel %vm831_vm3, %v9634_v2, %v9633_v24  ;;  %v2672_v42 = vmul.f32 %v9635_v0, %v8347_v43  ;;  %v9637_v51 = vrot.slane %v8304_v60, 2  ;;  %v3221_v25 = vsel %vm626_vm4, %v3198_v17, %v3200_v48 }
 0x355   :  { %v3206_v29 = vpop.permute.xlu1 %3205  ;;  %v8581_v53 = vadd.f32 %v3198_v17, %v3116_v1  ;;  %v3005_v43 = vadd.f32 %v2980_v10, %v8394_v22  ;;  %v2900_v63 = vadd.f32 %v2862_v35, %v2781_v62  ;;  %v8586_v40 = vadd.f32 %v3221_v25, %v3117_v3 }
 0x356   :  { %v2864_v54 = vsel %vm831_vm3, %v9637_v51, %v9636_v41  ;;  %v8583_v31 = vadd.f32 %v3206_v29, %v3121_v47  ;;  %3722 = vrot.lane.b32.xlu0 %v3711_v21, %s5971_s1  ;;  %v3719_v13 = vrot.slane %v8484_v39, %v9638_v33  ;;  %v2982_v4 = vsel %vm626_vm4, %v9629_v14, %v9639_v11  ;;  %v9642_v21 = vld [vmem:[#allocation25_spill] sm:$0xff]  ;;  %v9646_v14 = vld [vmem:[#allocation35_spill] sm:$0xff] }
 0x357   :  { %v2901_v60 = vadd.f32 %v2864_v54, %v8377_v45  ;;  %v2983_v52 = vsel %vm626_vm4, %v9639_v11, %v8192_v37  ;;  %v9640_v22 = vrot.slane %v8268_v28, 1  ;;  %v9641_v23 = vrot.slane %v9626_v36, 1  ;;  %v3202_v2 = vpop.permute.xlu0 %3201  ;;  %v9647_v37 = vld [vmem:[#allocation45_spill] sm:$0xff]  ;;  %v9655_v11 = vld [vmem:[#allocation23_spill] sm:$0xff] }
 0x358   :  { %v9643_v10 = vrot.slane %v9642_v21, 2  ;;  %v9644_v39 = vrot.slane %v8257_v19, 2  ;;  %v9645_v1 = vrot.slane %v8264_v9, 1  ;;  %v3118_v24 = vadd.f32 %v9646_v14, %v3005_v43  ;;  %v9648_v28 = vld [vmem:[#allocation61_spill] sm:$0xff]  ;;  %v9651_v19 = vld [vmem:[#allocation60_spill] sm:$0xff] }
 0x359   :  { %v2779_v49 = vadd.f32 %v9640_v22, %v2665_v7  ;;  %v2786_v62 = vadd.f32 %v9641_v23, %v2672_v42  ;;  %v3210_v35 = vpop.permute.xlu1 %3209  ;;  %v2873_v0 = vrot.slane %v9647_v37, 2  ;;  %v9649_v7 = vld [vmem:[#allocation37_spill] sm:$0xff]  ;;  %v3222_v42 = vsel %vm626_vm4, %v3200_v48, %v3202_v2  ;;  %v9654_v43 = vld [vmem:[#allocation64_spill] sm:$0xff] }
 0x35a   :  { %v2870_v45 = vsel %vm831_vm3, %v9644_v39, %v9643_v10  ;;  %v2778_v47 = vadd.f32 %v9645_v1, %v2664_v18  ;;  %v9650_v3 = vrot.slane %v9649_v7, 1  ;;  %v3009_v17 = vadd.f32 %v2982_v4, %v2900_v63  ;;  %3726 = vrot.lane.b32.xlu0 %v3719_v13, %s5971_s1  ;;  %v9657_v63 = vld [vmem:[#allocation62_spill] sm:$0xff] }
 0x35b   :  { %v3010_v41 = vadd.f32 %v2983_v52, %v2901_v60  ;;  %v9652_v51 = vrot.slane %v9651_v19, 2  ;;  %v9653_v54 = vrot.slane %v9632_v34, 2  ;;  %v3247_v18 = vadd.f32 %v3222_v42, %v3118_v24 }
 0x35c   :  { %v2787_v36 = vadd.f32 %v9650_v3, %v9648_v28  ;;  %v2904_v25 = vadd.f32 %v2870_v45, %v8431_v46  ;;  %v2985_v22 = vsel %vm626_vm4, %v9655_v11, %v9654_v43  ;;  %v9656_v23 = vrot.slane %v8416_v57, 2  ;;  %v3208_v46 = vpop.permute.xlu0 %3207 }
 0x35d   :  { %v2872_v9 = vsel %vm831_vm3, %v9653_v54, %v9652_v51  ;;  %v2981_v60 = vsel %vm626_vm4, %v9631_v61, %v9657_v63  ;;  %v2897_v34 = vadd.f32 %v2857_v12, %v2778_v47  ;;  %v3122_v52 = vadd.f32 %v8450_v6, %v3009_v17  ;;  %v3216_v21 = vpop.permute.xlu1 %3215 }
 0x35e   :  { %v2898_v48 = vadd.f32 %v9656_v23, %v2779_v49  ;;  %v2905_v4 = vadd.f32 %v2872_v9, %v2786_v62  ;;  %v3123_v13 = vadd.f32 %v8454_v59, %v3010_v41  ;;  %v3013_v10 = vadd.f32 %v9655_v11, %v2904_v25 }
 0x35f   :  { %v3224_v57 = vsel %vm626_vm4, %v3206_v29, %v3208_v46  ;;  %v3225_v49 = vsel %vm626_vm4, %v3208_v46, %v3210_v35  ;;  %v3006_v61 = vadd.f32 %v2981_v60, %v2897_v34  ;;  %v2874_v12 = vsel %vm831_vm3, %v9658_v32, %v2873_v0 }
 0x360   :  { %v3007_v39 = vadd.f32 %v9657_v63, %v2898_v48  ;;  %v3014_v45 = vadd.f32 %v2985_v22, %v2905_v4  ;;  %v3251_v62 = vadd.f32 %v3224_v57, %v3122_v52  ;;  %v3252_v1 = vadd.f32 %v3225_v49, %v3123_v13  ;;  %v3214_v37 = vpop.permute.xlu0 %3213 }
 0x361   :  { %v2986_v6 = vsel %vm626_vm4, %v9654_v43, %v8309_v27  ;;  %v3126_v59 = vadd.f32 %v8480_v38, %v3013_v10  ;;  %v2906_v14 = vadd.f32 %v2874_v12, %v2787_v36  ;;  %v3119_v24 = vadd.f32 %v8496_v16, %v3006_v61  ;;  %v3204_v28 = vpop.permute.xlu1 %3203 }
 0x362   :  { %v3120_v47 = vadd.f32 %v8482_v26, %v3007_v39  ;;  %v3127_v29 = vadd.f32 %v8492_v55, %v3014_v45  ;;  %v3227_v7 = vsel %vm626_vm4, %v3214_v37, %v3216_v21  ;;  %v3223_v0 = vsel %vm626_vm4, %v3202_v2, %v3204_v28 }
 0x363   :  { %v3255_v30 = vadd.f32 %v3214_v37, %v3126_v59  ;;  %v3015_v42 = vadd.f32 %v2986_v6, %v2906_v14  ;;  %v3248_v27 = vadd.f32 %v3223_v0, %v3119_v24 }
 0x364   :  { %v3249_v3 = vadd.f32 %v3204_v28, %v3120_v47  ;;  %v3256_v17 = vadd.f32 %v3227_v7, %v3127_v29  ;;  %v3218_v41 = vpop.permute.xlu0 %3217 }
 0x365   :  { %v3128_v38 = vadd.f32 %v8517_v5, %v3015_v42  ;;  %v3220_v26 = vpop.permute.xlu1 %3219  ;;  %v3228_v36 = vsel %vm626_vm4, %v3216_v21, %v3218_v41 }
 0x366   :  { %v3229_v55 = vsel %vm626_vm4, %v3218_v41, %v3220_v26  ;;  %v3259_v16 = vadd.f32 %v3220_v26, %v8520_v44 }
 0x367   :  { %v3257_v19 = vadd.f32 %v3228_v36, %v3128_v38  ;;  %v3258_v51 = vadd.f32 %v3229_v55, %v8528_v58 }
 0x368   :  { %v3212_v54 = vpop.permute.xlu0 %3211 }
 0x369   :  { %v3331_v9 = vpop.permute.xlu1 %3330  ;;  %v3226_v2 = vsel %vm626_vm4, %v3210_v35, %v3212_v54  ;;  %v3254_v25 = vadd.f32 %v3212_v54, %v8550_v50 }
 0x36a   :  { %v3253_v43 = vadd.f32 %v3226_v2, %v8552_v15 }
 0x36c   :  { %v3329_v5 = vpop.permute.xlu0 %3328 }
 0x36d   :  { %v3339_v11 = vpop.permute.xlu1 %3338  ;;  %v3358_v22 = vsel %vm1341_vm5, %v3329_v5, %v3331_v9  ;;  %v8660_v23 = vadd.f32 %v3329_v5, %v8581_v53 }
 0x36e   :  { %v8663_v44 = vadd.f32 %v3339_v11, %v8583_v31  ;;  %v8666_v58 = vadd.f32 %v3358_v22, %v8586_v40 }
 0x370   :  { %v3333_v48 = vpop.permute.xlu0 %3332 }
 0x371   :  { %v3343_v63 = vpop.permute.xlu1 %3342  ;;  %v3359_v35 = vsel %vm1341_vm5, %v3331_v9, %v3333_v48 }
 0x372   :  { %v3387_v50 = vadd.f32 %v3359_v35, %v3247_v18 }
 0x374   :  { %v3341_v60 = vpop.permute.xlu0 %3340 }
 0x375   :  { %v3351_v15 = vpop.permute.xlu1 %3350  ;;  %v3362_v4 = vsel %vm1341_vm5, %v3339_v11, %v3341_v60  ;;  %v3363_v34 = vsel %vm1341_vm5, %v3341_v60, %v3343_v63 }
 0x376   :  { %v8671_v52 = vadd.f32 %v3362_v4, %v3251_v62  ;;  %v8673_v53 = vadd.f32 %v3363_v34, %v3252_v1 }
 0x378   :  { %v3349_v31 = vpop.permute.xlu0 %3348 }
 0x379   :  { %v3335_v13 = vpop.permute.xlu1 %3334  ;;  %v3366_v40 = vsel %vm1341_vm5, %v3349_v31, %v3351_v15  ;;  %v8676_v46 = vadd.f32 %v3349_v31, %v3255_v30 }
 0x37a   :  { %v3360_v21 = vsel %vm1341_vm5, %v3333_v48, %v3335_v13  ;;  %v8679_v10 = vadd.f32 %v3366_v40, %v3256_v17  ;;  %v5517_v48 = vld [vmem:[%s9180_s5 + $0xc0] sm:$0xff]  }
 0x37b   :  { %v3388_v18 = vadd.f32 %v3360_v21, %v3248_v27 }
 0x37c   :  { %v3353_v39 = vpop.permute.xlu0 %3352 }
 0x37d   :  { %v3345_v57 = vpop.permute.xlu1 %3344  ;;  %v3367_v49 = vsel %vm1341_vm5, %v3351_v15, %v3353_v39 }
 0x37e   :  { %v3364_v45 = vsel %vm1341_vm5, %v3343_v63, %v3345_v57  ;;  %v8683_v61 = vadd.f32 %v3367_v49, %v3257_v19  ;;  %v2307_v19 = vld [vmem:[%s9182_s7] sm:$0xff] }
 0x37f   :  { %v3393_v62 = vadd.f32 %v3364_v45, %v3253_v43  ;;  %v8708_v54 = vcombine.high %v2307_v19, %v2307_v19  ;;  %v5116_v2 = vcombine.low %v2307_v19, %v2307_v19  ;;  %v5514_v43 = vld [vmem:[%s9180_s5 + $0x40] sm:$0xff]  }
 0x380   :  { %v3337_v1 = vpop.permute.xlu0 %3336 }
 0x381   :  { %v3355_v32 = vpop.permute.xlu1 %3354  ;;  %v3361_v12 = vsel %vm1341_vm5, %v3335_v13, %v3337_v1  ;;  %5120 = vmatprep.subr.msk.bf16.mxu0 %vm2345_vm8, %v8708_v54  ;;  %v8720_v11 = vsel %vm2345_vm8, %v5116_v2, 0 }
 0x382   :  { %v3368_v6 = vsel %vm1341_vm5, %v3353_v39, %v3355_v32  ;;  %v8687_v59 = vadd.f32 %v3361_v12, %v3249_v3  ;;  %2359 = vmatpush1.bf16.msra.mxu0 %v8720_v11 }
 0x383   :  { %v8689_v47 = vadd.f32 %v3368_v6, %v3258_v51  ;;  %5265 = vmatprep.subr.bf16.mxu0 %v5514_v43 }
 0x384   :  { %v3347_v14 = vpop.permute.xlu0 %3346 }
 0x385   :  { %v3470_v29 = vpop.permute.xlu1 %3469  ;;  %v3365_v24 = vsel %vm1341_vm5, %v3345_v57, %v3347_v14 }
 0x386   :  { %v8692_v37 = vadd.f32 %v3365_v24, %v3254_v25 }
 0x388   :  { %v3357_v28 = vpop.permute.xlu0 %3356 }
 0x389   :  { %v3474_v7 = vpop.permute.xlu1 %3473  ;;  %v3369_v30 = vsel %vm1341_vm5, %v3355_v32, %v3357_v28 }
 0x38a   :  { %v8695_v0 = vadd.f32 %v3369_v30, %v3259_v16  ;;  %v2308_v16 = vld [vmem:[%s9182_s7 + $0x8] sm:$0xff] }
 0x38b   :  { %v8710_v9 = vcombine.high %v2308_v16, %v2308_v16  ;;  %v5118_v25 = vcombine.low %v2308_v16, %v2308_v16 }
 0x38c   :  { %v3472_v42 = vpop.permute.xlu0 %3471 }
 0x38d   :  { %v3482_v17 = vpop.permute.xlu1 %3481  ;;  %v3500_v27 = vsel %vm1341_vm5, %v3472_v42, %v3474_v7  ;;  %5122 = vmatprep.subr.msk.bf16.mxu1 %vm2345_vm8, %v8710_v9  ;;  %v8723_v22 = vsel %vm2345_vm8, %v5118_v25, 0  ;;  %v3499_v24 = vsel %vm1341_vm5, %v3470_v29, %v3472_v42 }
 0x38e   :  { %v8698_v3 = vadd.f32 %v3500_v27, %v3387_v50  ;;  %2400 = vmatpush1.bf16.msra.mxu1 %v8723_v22  ;;  %v3527_v25 = vadd.f32 %v3499_v24, %v8666_v58 }
 0x38f   :  { %5287 = vmatprep.subr.bf16.mxu1 %v5517_v48 }
 0x390   :  { %v3480_v38 = vpop.permute.xlu0 %3479 }
 0x391   :  { %v3490_v41 = vpop.permute.xlu1 %3489  ;;  %v3531_v28 = vadd.f32 %v3480_v38, %v8663_v44  ;;  %v3503_v30 = vsel %vm1341_vm5, %v3480_v38, %v3482_v17 }
 0x394   :  { %v3484_v26 = vpop.permute.xlu0 %3483 }
 0x395   :  { %v8700_v36 = vpop.permute.xlu1 %3493  ;;  %v3504_v43 = vsel %vm1341_vm5, %v3482_v17, %v3484_v26 }
 0x396   :  { %v3533_v24 = vadd.f32 %v3504_v43, %v8673_v53 }
 0x398   :  { %v3492_v55 = vpop.permute.xlu0 %3491 }
 0x399   :  { %v3478_v51 = vpop.permute.xlu1 %3477  ;;  %v3508_v42 = vsel %vm1341_vm5, %v3492_v55, %v8700_v36 }
 0x39c   :  { %v3476_v5 = vpop.permute.xlu0 %3475 }
 0x39d   :  { %v3501_v63 = vsel %vm1341_vm5, %v3474_v7, %v3476_v5  ;;  %v3488_v35 = vpop.permute.xlu1 %3487  ;;  %v3536_v7 = vadd.f32 %v3490_v41, %v8676_v46  ;;  %v3532_v46 = vadd.f32 %v3503_v30, %v8671_v52  ;;  %v3502_v38 = vsel %vm1341_vm5, %v3476_v5, %v3478_v51 }
 0x39e   :  { %v8731_v50 = vadd.f32 %v3501_v63, %v3388_v18  ;;  %v3507_v63 = vsel %vm1341_vm5, %v3490_v41, %v3492_v55  ;;  %v3538_v5 = vadd.f32 %v3508_v42, %v8683_v61 }
 0x39f   :  { %v3537_v52 = vadd.f32 %v3507_v63, %v8679_v10 }
 0x3a0   :  { %v3486_v60 = vpop.permute.xlu0 %3485 }
 0x3a1   :  { %v3505_v15 = vsel %vm1341_vm5, %v3484_v26, %v3486_v60  ;;  %v8734_v4 = vpop.permute.xlu1 %3497 }
 0x3a2   :  { %v8736_v34 = vadd.f32 %v3505_v15, %v3393_v62  ;;  %v3526_v62 = vadd.f32 %v3470_v29, %v8660_v23 }
 0x3a4   :  { %v8738_v31 = vpop.permute.xlu0 %3495 }
 0x3a5   :  { %v3633_v13 = vpop.permute.xlu1 %3632 }
 0x3a8   :  { %v3631_v40 = vpop.permute.xlu0 %3630 }
 0x3a9   :  { %v3641_v21 = vpop.permute.xlu1 %3640  ;;  %v3687_v27 = vadd.f32 %v3631_v40, %v3526_v62  ;;  %v3660_v58 = vsel %vm1341_vm5, %v3631_v40, %v3633_v13 }
 0x3aa   :  { %v3692_v19 = vadd.f32 %v3641_v21, %v3531_v28  ;;  %v3688_v30 = vadd.f32 %v3660_v58, %v3527_v25 }
 0x3ac   :  { %v3635_v39 = vpop.permute.xlu0 %3634 }
 0x3ad   :  { %v8740_v57 = vpop.permute.xlu1 %3644  ;;  %v3661_v17 = vsel %vm1341_vm5, %v3633_v13, %v3635_v39  ;;  %v3530_v13 = vadd.f32 %v3502_v38, %v8687_v59 }
 0x3ae   :  { %v3689_v53 = vadd.f32 %v3661_v17, %v8698_v3 }
 0x3b0   :  { %v3643_v49 = vpop.permute.xlu0 %3642 }
 0x3b1   :  { %v3653_v18 = vpop.permute.xlu1 %3652  ;;  %v3664_v55 = vsel %vm1341_vm5, %v3641_v21, %v3643_v49  ;;  %v3665_v40 = vsel %vm1341_vm5, %v3643_v49, %v8740_v57 }
 0x3b2   :  { %v3693_v10 = vadd.f32 %v3664_v55, %v3532_v46  ;;  %v3510_v55 = vsel %vm1341_vm5, %v8738_v31, %v8734_v4 }
 0x3b4   :  { %v3651_v45 = vpop.permute.xlu0 %3650 }
 0x3b5   :  { %v3637_v1 = vpop.permute.xlu1 %3636  ;;  %v3697_v16 = vadd.f32 %v3651_v45, %v3536_v7  ;;  %v3668_v51 = vsel %vm1341_vm5, %v3651_v45, %v3653_v18  ;;  %v3506_v7 = vsel %vm1341_vm5, %v3486_v60, %v3488_v35  ;;  %v3694_v45 = vadd.f32 %v3665_v40, %v3533_v24 }
 0x3b6   :  { %v3662_v59 = vsel %vm1341_vm5, %v3635_v39, %v3637_v1  ;;  %v3535_v25 = vadd.f32 %v3506_v7, %v8692_v37 }
 0x3b7   :  { %v3690_v58 = vadd.f32 %v3662_v59, %v8731_v50  ;;  %v3509_v50 = vsel %vm1341_vm5, %v8700_v36, %v8738_v31 }
 0x3b8   :  { %v8742_v32 = vpop.permute.xlu0 %3654  ;;  %v3539_v4 = vadd.f32 %v3509_v50, %v8689_v47 }
 0x3b9   :  { %v8744_v12 = vpop.permute.xlu1 %3646  ;;  %v3669_v21 = vsel %vm1341_vm5, %v3653_v18, %v8742_v32 }
 0x3ba   :  { %v3699_v18 = vadd.f32 %v3669_v21, %v3538_v5  ;;  %v3666_v39 = vsel %vm1341_vm5, %v8740_v57, %v8744_v12 }
 0x3bc   :  { %v3639_v6 = vpop.permute.xlu0 %3638 }
 0x3bd   :  { %v8746_v14 = vpop.permute.xlu1 %3656  ;;  %v3663_v43 = vsel %vm1341_vm5, %v3637_v1, %v3639_v6 }
 0x3be   :  { %v3691_v17 = vadd.f32 %v3663_v43, %v3530_v13  ;;  %v3670_v36 = vsel %vm1341_vm5, %v8742_v32, %v8746_v14 }
 0x3bf   :  { %v3700_v21 = vadd.f32 %v3670_v36, %v3539_v4 }
 0x3c0   :  { %v3649_v2 = vpop.permute.xlu0 %3648 }
 0x3c1   :  { %v3721_v48 = vpop.permute.xlu1 %3720  ;;  %v3667_v37 = vsel %vm1341_vm5, %v8744_v12, %v3649_v2 }
 0x3c2   :  { %v8756_v23 = vadd.f32 %v3721_v48, %v3687_v27  ;;  %v8758_v29 = vadd.f32 %v3721_v48, %v3692_v19  ;;  %v8760_v44 = vadd.f32 %v3721_v48, %v3697_v16  ;;  %v3698_v27 = vadd.f32 %v3668_v51, %v3537_v52 }
 0x3c3   :  { %v3696_v12 = vadd.f32 %v3667_v37, %v3535_v25 }
 0x3c4   :  { %v5128_v26 = vmul.f32 -1.442695, %v8756_v23  ;;  %v5133_v41 = vmul.f32 -1.442695, %v8758_v29  ;;  %v5138_v15 = vmul.f32 -1.442695, %v8760_v44  ;;  %v8771_v62 = vpop.permute.xlu0 %3658 }
 0x3c5   :  { %v3725_v28 = vpop.permute.xlu1 %3724  ;;  %v3671_v31 = vsel %vm1341_vm5, %v8746_v14, %v8771_v62 }
 0x3c6   :  { %5702 = vpow2.f32 %v5128_v26 }
 0x3c7   :  { %5704 = vpow2.f32 %v5133_v41  ;;  %v3695_v41 = vadd.f32 %v3666_v39, %v8736_v34 }
 0x3c8   :  { %5706 = vpow2.f32 %v5138_v15  ;;  %v3723_v61 = vpop.permute.xlu0 %3722 }
 0x3c9   :  { %v3728_v49 = vsel %vm626_vm4, %v3721_v48, %v3723_v61  ;;  %v3729_v19 = vsel %vm626_vm4, %v3723_v61, %v3725_v28 }
 0x3ca   :  { %v8788_v16 = vadd.f32 %v3728_v49, %v3688_v30  ;;  %v8790_v35 = vadd.f32 %v3728_v49, %v3693_v10  ;;  %v8792_v3 = vadd.f32 %v3728_v49, %v3698_v27  ;;  %v8794_v60 = vadd.f32 %v3729_v19, %v3689_v53 }
 0x3cb   :  { %v8798_v63 = vadd.f32 %v3729_v19, %v3694_v45  ;;  %v8811_v26 = vadd.f32 %v3729_v19, %v3699_v18  ;;  %v3540_v10 = vadd.f32 %v3510_v55, %v8695_v0 }
 0x3cc   :  { %v5129_v48 = vmul.f32 -1.442695, %v8788_v16  ;;  %v5134_v46 = vmul.f32 -1.442695, %v8790_v35  ;;  %v5139_v42 = vmul.f32 -1.442695, %v8792_v3  ;;  %v3727_v38 = vpop.permute.xlu0 %3726 }
 0x3cd   :  { %v5130_v1 = vmul.f32 -1.442695, %v8794_v60  ;;  %v3730_v6 = vsel %vm626_vm4, %v3725_v28, %v3727_v38  ;;  %v5135_v57 = vmul.f32 -1.442695, %v8798_v63  ;;  %v8820_v2 = vadd.f32 %v3727_v38, %v3691_v17 }
 0x3ce   :  { %5708 = vpow2.f32 %v5129_v48  ;;  %v8815_v15 = vadd.f32 %v3730_v6, %v3690_v58  ;;  %v8825_v34 = vadd.f32 %v3730_v6, %v3695_v41  ;;  %v5140_v40 = vmul.f32 -1.442695, %v8811_v26 }
 0x3cf   :  { %5710 = vpow2.f32 %v5134_v46  ;;  %v8828_v28 = vadd.f32 %v3727_v38, %v3696_v12  ;;  %v5132_v53 = vmul.f32 -1.442695, %v8820_v2  ;;  %v3701_v61 = vadd.f32 %v3671_v31, %v3540_v10 }
 0x3d0   :  { %v5703_v24 = vpop.eup %5702  ;;  %5712 = vpow2.f32 %v5139_v42  ;;  %v5131_v30 = vmul.f32 -1.442695, %v8815_v15  ;;  %v5136_v27 = vmul.f32 -1.442695, %v8825_v34  ;;  %v8842_v47 = vadd.f32 %v3730_v6, %v3700_v21 }
 0x3d1   :  { %v5705_v52 = vpop.eup %5704  ;;  %v3796_v51 = vadd.f32 1.0, %v5703_v24  ;;  %5714 = vpow2.f32 %v5130_v1  ;;  %v5137_v32 = vmul.f32 -1.442695, %v8828_v28  ;;  %v8844_v14 = vadd.f32 %v3727_v38, %v3701_v61 }
 0x3d2   :  { %v5707_v5 = vpop.eup %5706  ;;  %v3801_v13 = vadd.f32 1.0, %v5705_v52  ;;  %5716 = vpow2.f32 %v5135_v57  ;;  %v5141_v39 = vmul.f32 -1.442695, %v8842_v47 }
 0x3d3   :  { %v3806_v7 = vadd.f32 1.0, %v5707_v5  ;;  %5718 = vrcp.f32 %v3796_v51  ;;  %v5142_v42 = vmul.f32 -1.442695, %v8844_v14 }
 0x3d4   :  { %5720 = vrcp.f32 %v3801_v13 }
 0x3d5   :  { %5722 = vrcp.f32 %v3806_v7 }
 0x3d6   :  { %5724 = vpow2.f32 %v5140_v40 }
 0x3d7   :  { %5726 = vpow2.f32 %v5131_v30 }
 0x3d8   :  { %v5709_v45 = vpop.eup %5708  ;;  %5728 = vpow2.f32 %v5132_v53 }
 0x3d9   :  { %v5711_v59 = vpop.eup %5710  ;;  %v3797_v49 = vadd.f32 1.0, %v5709_v45  ;;  %5730 = vpow2.f32 %v5136_v27 }
 0x3da   :  { %v5713_v62 = vpop.eup %5712  ;;  %v3802_v0 = vadd.f32 1.0, %v5711_v59  ;;  %5732 = vpow2.f32 %v5137_v32 }
 0x3db   :  { %v5715_v19 = vpop.eup %5714  ;;  %v3807_v25 = vadd.f32 1.0, %v5713_v62  ;;  %5734 = vrcp.f32 %v3797_v49 }
 0x3dc   :  { %v5717_v18 = vpop.eup %5716  ;;  %5736 = vrcp.f32 %v3802_v0  ;;  %v3798_v43 = vadd.f32 1.0, %v5715_v19 }
 0x3dd   :  { %v5719_v48 = vpop.eup %5718  ;;  %5738 = vrcp.f32 %v3807_v25  ;;  %v3803_v46 = vadd.f32 1.0, %v5717_v18 }
 0x3de   :  { %v5721_v58 = vpop.eup %5720  ;;  %v8849_v38 = vmul.f32 %v5719_v48, %v8756_v23  ;;  %5740 = vrcp.f32 %v3798_v43 }
 0x3df   :  { %v5723_v37 = vpop.eup %5722  ;;  %v8852_v1 = vmul.f32 %v5721_v58, %v8758_v29  ;;  %5742 = vrcp.f32 %v3803_v46 }
 0x3e0   :  { %v5725_v6 = vpop.eup %5724  ;;  %v8855_v17 = vmul.f32 %v5723_v37, %v8760_v44  ;;  %v3871_v57 = vrot.slane %v8849_v38, 7  ;;  %5744 = vpow2.f32 %v5141_v39 }
 0x3e1   :  { %v5727_v41 = vpop.eup %5726  ;;  %v3872_v24 = vrot.slane %v8852_v1, 7  ;;  %v3808_v50 = vadd.f32 1.0, %v5725_v6  ;;  %5746 = vpow2.f32 %v5142_v42 }
 0x3e2   :  { %v5729_v23 = vpop.eup %5728  ;;  %v3886_v12 = vrot.slane %v8855_v17, 7  ;;  %v3799_v52 = vadd.f32 1.0, %v5727_v41 }
 0x3e3   :  { %v5731_v55 = vpop.eup %5730  ;;  %5748 = vrcp.f32 %v3808_v50  ;;  %v3800_v29 = vadd.f32 1.0, %v5729_v23  ;;  %v3873_v51 = vsel %vm1857_vm6, %v3871_v57, %v3872_v24 }
 0x3e4   :  { %v5733_v5 = vpop.eup %5732  ;;  %v3804_v44 = vadd.f32 1.0, %v5731_v55  ;;  %5750 = vrcp.f32 %v3799_v52  ;;  %v3887_v13 = vsel %vm1857_vm6, %v3872_v24, %v3886_v12  ;;  %v3906_v40 = vsel %vm1893_vm7, %v3873_v51, 0.0 }
 0x3e5   :  { %v5735_v36 = vpop.eup %5734  ;;  %v3805_v7 = vadd.f32 1.0, %v5733_v5  ;;  %5752 = vrcp.f32 %v3800_v29  ;;  %v3907_v30 = vsel %vm1893_vm7, %v3887_v13, 0.0 }
 0x3e6   :  { %v5737_v4 = vpop.eup %5736  ;;  %v8865_v31 = vmul.f32 %v5735_v36, %v8788_v16  ;;  %5754 = vrcp.f32 %v3804_v44  ;;  %v3908_v53 = vadd.f32 %v3907_v30, %v3906_v40 }
 0x3e7   :  { %v5739_v10 = vpop.eup %5738  ;;  %v8868_v27 = vmul.f32 %v5737_v4, %v8790_v35  ;;  %5756 = vrcp.f32 %v3805_v7 }
 0x3e8   :  { %v5741_v21 = vpop.eup %5740  ;;  %v8871_v32 = vmul.f32 %v5739_v10, %v8792_v3  ;;  %v3874_v61 = vrot.slane %v8865_v31, 7  ;;  %v3909_v45 = vrot.slane %v3908_v53, 4 }
 0x3e9   :  { %v5743_v59 = vpop.eup %5742  ;;  %v3875_v49 = vrot.slane %v8868_v27, 7  ;;  %v8876_v16 = vmul.f32 %v5741_v21, %v8794_v60 }
 0x3ea   :  { %v5745_v62 = vpop.eup %5744  ;;  %v3888_v0 = vrot.slane %v8871_v32, 7  ;;  %v8880_v35 = vmul.f32 %v5743_v59, %v8798_v63  ;;  %v3910_v19 = vadd.f32 %v3909_v45, %v3908_v53 }
 0x3eb   :  { %v5747_v25 = vpop.eup %5746  ;;  %v3877_v3 = vrot.slane %v8876_v16, 7  ;;  %v3809_v18 = vadd.f32 1.0, %v5745_v62  ;;  %v3876_v43 = vsel %vm1857_vm6, %v3874_v61, %v3875_v49 }
 0x3ec   :  { %v3878_v39 = vrot.slane %v8880_v35, 7  ;;  %v3810_v48 = vadd.f32 1.0, %v5747_v25  ;;  %v3911_v46 = vrot.slane %v3910_v19, 2  ;;  %v3889_v60 = vsel %vm1857_vm6, %v3875_v49, %v3888_v0 }
 0x3ed   :  { %v5749_v42 = vpop.eup %5748  ;;  %5758 = vrcp.f32 %v3809_v18  ;;  %v3915_v58 = vadd.f32 %v3889_v60, %v3876_v43 }
 0x3ee   :  { %v5751_v37 = vpop.eup %5750  ;;  %v8887_v63 = vmul.f32 %v5749_v42, %v8811_v26  ;;  %5760 = vrcp.f32 %v3810_v48  ;;  %v3912_v6 = vadd.f32 %v3911_v46, %v3910_v19  ;;  %v3879_v12 = vsel %vm1857_vm6, %v3877_v3, %v3878_v39 }
 0x3ef   :  { %v5753_v57 = vpop.eup %5752  ;;  %v3916_v41 = vrot.slane %v3915_v58, 4  ;;  %v8892_v55 = vmul.f32 %v5751_v37, %v8815_v15 }
 0x3f0   :  { %v5755_v24 = vpop.eup %5754  ;;  %v3890_v50 = vrot.slane %v8887_v63, 7  ;;  %v3913_v23 = vrot.slane %v3912_v6, 1  ;;  %v8895_v29 = vmul.f32 %v5753_v57, %v8820_v2 }
 0x3f1   :  { %v5757_v52 = vpop.eup %5756  ;;  %v3917_v51 = vadd.f32 %v3916_v41, %v3915_v58  ;;  %v8898_v26 = vmul.f32 %v5755_v24, %v8825_v34  ;;  %v5237_v44 = vpop.f32.mrb[8].mxu0  ;;  %v2002_v34 = vld [vmem:[%s9181_s6] sm:$0x1]  ;;  %v3880_v45 = vrot.slane %v8892_v55, 7 }
 0x3f2   :  { %v8901_v5 = vmul.f32 %v5757_v52, %v8828_v28  ;;  %v3914_v13 = vadd.f32 %v3913_v23, %v3912_v6  ;;  %v3891_v40 = vsel %vm1857_vm6, %v3878_v39, %v3890_v50  ;;  %v5238_v36 = vpop.f32.mrb[9].mxu0  ;;  %v3883_v2 = vrot.slane %v8895_v29, 7 }
 0x3f3   :  { %v3918_v7 = vrot.slane %v3917_v51, 2  ;;  %v3922_v30 = vadd.f32 %v3891_v40, %v3879_v12  ;;  %v5239_v4 = vadd.f32 %v5238_v36, %v5237_v44  ;;  %v5240_v15 = vpop.f32.mrb[10].mxu0  ;;  %v3881_v59 = vrot.slane %v8898_v26, 7 }
 0x3f4   :  { %v3945_v53 = vpack.c.bf16 %v3914_v13, %v3914_v13  ;;  %v3884_v10 = vrot.slane %v8901_v5, 7  ;;  %v5241_v28 = vpop.f32.mrb[11].mxu0 }
 0x3f5   :  { %v3919_v21 = vadd.f32 %v3918_v7, %v3917_v51  ;;  %v3923_v61 = vrot.slane %v3922_v30, 4  ;;  %v5259_v49 = vpop.f32.mrb[8].mxu1  ;;  %v2254_v43 = vadd.f32 %v5239_v4, %v2002_v34  ;;  %v3882_v41 = vsel %vm1857_vm6, %v3880_v45, %v3881_v59 }
 0x3f6   :  { %4020 = vrot.lane.b32.xlu1 %v3945_v53, %s5965_s23  ;;  %v5260_v0 = vpop.f32.mrb[9].mxu1  ;;  %v3885_v37 = vsel %vm1857_vm6, %v3883_v2, %v3884_v10 }
 0x3f7   :  { %v5759_v62 = vpop.eup %5758  ;;  %v3920_v19 = vrot.slane %v3919_v21, 1  ;;  %v3924_v25 = vadd.f32 %v3923_v61, %v3922_v30  ;;  %v5261_v39 = vadd.f32 %v5260_v0, %v5259_v49  ;;  %v5262_v48 = vpop.f32.mrb[10].mxu1  ;;  %v3936_v12 = vsel %vm626_vm4, %v3885_v37, 0.0  ;;  %v5523_v37 = vld [vmem:[%s9180_s5 + $0x88] sm:$0xff]  }
 0x3f8   :  { %v5761_v3 = vpop.eup %5760  ;;  %v8913_v18 = vmul.f32 %v5759_v62, %v8842_v47  ;;  %v5263_v60 = vpop.f32.mrb[11].mxu1 }
 0x3f9   :  { %v8916_v46 = vmul.f32 %v5761_v3, %v8844_v14  ;;  %v3921_v42 = vadd.f32 %v3920_v19, %v3919_v21  ;;  %v3925_v58 = vrot.slane %v3924_v25, 2  ;;  %v2294_v57 = vadd.f32 %v5261_v39, %v2254_v43  ;;  %v5515_v43 = vld [vmem:[%s9180_s5] sm:$0xff]   ;;  %v5516_v60 = vld [vmem:[%s9180_s5 + $0x48] sm:$0xff]  }
 0x3fa   :  { %v3892_v6 = vrot.slane %v8913_v18, 7  ;;  %v5519_v39 = vld [vmem:[%s9180_s5 + $0x80] sm:$0xff]  }
 0x3fb   :  { %v3894_v24 = vrot.slane %v8916_v46, 7  ;;  %v3946_v47 = vpack.c.bf16 %v3921_v42, %v3921_v42  ;;  %v3926_v50 = vadd.f32 %v3925_v58, %v3924_v25  ;;  %v5115_v23 = vmul.f32 -1.442695, %v2294_v57  ;;  %v5521_v42 = vld [vmem:[%s9180_s5 + $0xc8] sm:$0xff]  }
 0x3fc   :  { %v3893_v14 = vsel %vm1857_vm6, %v3881_v59, %v3892_v6  ;;  %v5518_v58 = vld [vmem:[%s9180_s5 + $0x8] sm:$0xff]   ;;  %v5520_v6 = vld [vmem:[%s9180_s5 + $0x50] sm:$0xff]  }
 0x3fd   :  { %4022 = vrot.lane.b32.xlu1 %v3946_v47, %s5965_s23  ;;  %v3927_v52 = vrot.slane %v3926_v50, 1  ;;  %v3895_v51 = vsel %vm1857_vm6, %v3884_v10, %v3894_v24  ;;  %v3929_v44 = vadd.f32 %v3893_v14, %v3882_v41  ;;  %5762 = vpow2.f32 %v5115_v23  ;;  %v5522_v41 = vld [vmem:[%s9180_s5 + $0x10] sm:$0xff]   ;;  %v5524_v47 = vld [vmem:[%s9180_s5 + $0x58] sm:$0xff]   ;;  %v5528_v14 = vld [vmem:[%s9180_s5 + $0x60] sm:$0xff]  }
 0x3fe   :  { %v3937_v13 = vsel %vm626_vm4, %v3895_v51, 0.0  ;;  %v5527_v24 = vld [vmem:[%s9180_s5 + $0x90] sm:$0xff]   ;;  %v5526_v23 = vld [vmem:[%s9180_s5 + $0x18] sm:$0xff]   ;;  %v5530_v51 = vld [vmem:[%s9180_s5 + $0x20] sm:$0xff]  }
 0x3ff   :  { %v3928_v40 = vadd.f32 %v3927_v52, %v3926_v50  ;;  %v3938_v36 = vadd.f32 %v3937_v13, %v3936_v12  ;;  %v3930_v7 = vrot.slane %v3929_v44, 4  ;;  %v5529_v50 = vld [vmem:[%s9180_s5 + $0xd8] sm:$0xff]   ;;  %v5533_v52 = vld [vmem:[%s9180_s5 + $0xe0] sm:$0xff]   ;;  %v5532_v13 = vld [vmem:[%s9180_s5 + $0x68] sm:$0xff]  }
 0x400   :  { %v5531_v12 = vld [vmem:[%s9180_s5 + $0x98] sm:$0xff]  }
 0x401   :  { %v3947_v30 = vpack.c.bf16 %v3928_v40, %v3928_v40  ;;  %v3939_v4 = vrot.slane %v3938_v36, 4  ;;  %v3931_v15 = vadd.f32 %v3930_v7, %v3929_v44  ;;  %v5535_v44 = vld [vmem:[%s9180_s5 + $0xa0] sm:$0xff]   ;;  %v5537_v40 = vld [vmem:[%s9180_s5 + $0xe8] sm:$0xff]  }
 0x402   :  { %v5539_v7 = vld [vmem:[%s9180_s5 + $0xa8] sm:$0xff]  }
 0x403   :  { %4024 = vrot.lane.b32.xlu0 %v3947_v30, %s5965_s23  ;;  %v3940_v53 = vadd.f32 %v3939_v4, %v3938_v36  ;;  %v3932_v2 = vrot.slane %v3931_v15, 2  ;;  %v5534_v36 = vld [vmem:[%s9180_s5 + $0x28] sm:$0xff]   ;;  %v5536_v30 = vld [vmem:[%s9180_s5 + $0x70] sm:$0xff]  }
 0x404   :  { %v5541_v4 = vld [vmem:[%s9180_s5 + $0xf0] sm:$0xff]  }
 0x405   :  { %v3941_v34 = vrot.slane %v3940_v53, 2  ;;  %v3933_v28 = vadd.f32 %v3932_v2, %v3931_v15  ;;  %v5538_v15 = vld [vmem:[%s9180_s5 + $0x30] sm:$0xff]   ;;  %v5540_v2 = vld [vmem:[%s9180_s5 + $0x78] sm:$0xff]  }
 0x407   :  { %v3942_v21 = vadd.f32 %v3941_v34, %v3940_v53  ;;  %v3934_v61 = vrot.slane %v3933_v28, 1  ;;  %v5763_v45 = vpop.eup %5762  ;;  %v5543_v53 = vld [vmem:[%s9180_s5 + $0xb0] sm:$0xff]   ;;  %v5544_v34 = vld [vmem:[%s9180_s5 + $0xf8] sm:$0xff]  }
 0x408   :  { %v2302_v10 = vadd.f32 1.0, %v5763_v45 }
 0x409   :  { %v3943_v59 = vrot.slane %v3942_v21, 1  ;;  %v3935_v49 = vadd.f32 %v3934_v61, %v3933_v28  ;;  %v5542_v28 = vld [vmem:[%s9180_s5 + $0x38] sm:$0xff]  }
 0x40a   :  { %5764 = vrcp.f32 %v2302_v10 }
 0x40b   :  { %v3944_v62 = vadd.f32 %v3943_v59, %v3942_v21  ;;  %v3948_v0 = vpack.c.bf16 %v3935_v49, %v3935_v49  ;;  %v5545_v21 = vld [vmem:[%s9180_s5 + $0xb8] sm:$0xff]  }
 0x40d   :  { %v3949_v19 = vpack.c.bf16 %v3944_v62, %v3944_v62  ;;  %4026 = vrot.lane.b32.xlu0 %v3948_v0, %s5965_s23  ;;  %v9659_v62 = vmov 0  }
 0x40f   :  { %4028 = vrot.lane.b32.xlu1 %v3949_v19, %s5965_s23 }
 0x414   :  { %v5765_v25 = vpop.eup %5764 }
 0x415   :  { %v2305_v3 = vmul.f32 %v5765_v25, %v2294_v57  ;;  %v5525_v57 = vld [vmem:[%s9180_s5 + $0xd0] sm:$0xff]  }
 0x417   :  { %v2306_v48 = vpack.c.bf16 %v2305_v3, %v2305_v3 }
 0x419   :  { %5121 = vmatmul.mubr.msk.bf16.vlgmr.msra.gmra.mrb[12].mxu0 %vm2341_vm9, %v2306_v48  ;;  %5123 = vmatmul.mubr.msk.bf16.vlgmr.msra.gmra.mrb[12].mxu1 %vm2341_vm9, %v2306_v48 }
 0x41a   :  { %5266 = vmatpush3.bf16.msra.mxu0 %v5515_v43  ;;  %5288 = vmatpush3.bf16.msra.mxu1 %v5519_v39 }
 0x41b   :  { %5267 = vmatprep.subr.bf16.mxu0 %v5516_v60  ;;  %5289 = vmatprep.subr.bf16.mxu1 %v5521_v42 }
 0x41e   :  { %5268 = vmatpush3.bf16.msra.mxu0 %v5518_v58  ;;  %5290 = vmatpush3.bf16.msra.mxu1 %v5523_v37 }
 0x41f   :  { %5269 = vmatprep.subr.bf16.mxu0 %v5520_v6  ;;  %5291 = vmatprep.subr.bf16.mxu1 %v5525_v57 }
 0x422   :  { %5270 = vmatpush3.bf16.msra.mxu0 %v5522_v41  ;;  %5292 = vmatpush3.bf16.msra.mxu1 %v5527_v24 }
 0x423   :  { %5271 = vmatprep.subr.bf16.mxu0 %v5524_v47  ;;  %5293 = vmatprep.subr.bf16.mxu1 %v5529_v50 }
 0x426   :  { %5272 = vmatpush3.bf16.msra.mxu0 %v5526_v23  ;;  %5294 = vmatpush3.bf16.msra.mxu1 %v5531_v12 }
 0x427   :  { %5273 = vmatprep.subr.bf16.mxu0 %v5528_v14  ;;  %5295 = vmatprep.subr.bf16.mxu1 %v5533_v52 }
 0x42a   :  { %5274 = vmatpush3.bf16.msra.mxu0 %v5530_v51  ;;  %5296 = vmatpush3.bf16.msra.mxu1 %v5535_v44 }
 0x42b   :  { %5275 = vmatprep.subr.bf16.mxu0 %v5532_v13  ;;  %5297 = vmatprep.subr.bf16.mxu1 %v5537_v40 }
 0x42e   :  { %5276 = vmatpush3.bf16.msra.mxu0 %v5534_v36  ;;  %5298 = vmatpush3.bf16.msra.mxu1 %v5539_v7 }
 0x42f   :  { %5277 = vmatprep.subr.bf16.mxu0 %v5536_v30  ;;  %5299 = vmatprep.subr.bf16.mxu1 %v5541_v4 }
 0x432   :  { %5278 = vmatpush3.bf16.msra.mxu0 %v5538_v15  ;;  %5300 = vmatpush3.bf16.msra.mxu1 %v5543_v53 }
 0x433   :  { %5279 = vmatprep.subr.bf16.mxu0 %v5540_v2  ;;  %5301 = vmatprep.subr.bf16.mxu1 %v5544_v34 }
 0x436   :  { %5280 = vmatpush3.bf16.msra.mxu0 %v5542_v28  ;;  %5302 = vmatpush3.bf16.msra.mxu1 %v5545_v21 }
 0x437   :  { %5180 = vmatprep.subr.msk.bf16.mxu0 %vm2345_vm8, %v8708_v54  ;;  %5182 = vmatprep.subr.msk.bf16.mxu1 %vm2345_vm8, %v8710_v9  ;;  %v2309_v9 = vld [vmem:[%s9183_s8] sm:$0xf] }
 0x438   :  { %v2332_v3 = vrot.slane %v2309_v9, %v9584_v8  ;;  %v2328_v43 = vrot.slane %v2309_v9, %v9630_v20  ;;  %v2336_v39 = vrot.slane %v2309_v9, %v9638_v33 }
 0x468   :  { %v4021_v61 = vpop.permute.xlu1 %4020 }
 0x46f   :  { %v4023_v45 = vpop.permute.xlu1 %4022 }
 0x470   :  { %v4030_v59 = vsel %vm113_vm0, %v4021_v61, %v4023_v45 }
 0x475   :  { %v4025_v10 = vpop.permute.xlu0 %4024 }
 0x476   :  { %v4031_v49 = vsel %vm113_vm0, %v4023_v45, %v4025_v10 }
 0x477   :  { %4262 = vmatprep.mubr.bf16.mxu0 %v4031_v49 }
 0x478   :  { %4263 = vmatmul.mubr.bf16.vlgmr.msra.gmra.mrb[16].mxu0 %v4030_v59 }
 0x479   :  { %4368 = vmatpush1.bf16.msra.mxu0 %v8720_v11  ;;  %4399 = vmatprep.mubr.bf16.mxu0 %v9659_v62  ;;  %v2324_v11 = vrot.slane %v2309_v9, %v9582_v56 }
 0x47f   :  { %v4027_v0 = vpop.permute.xlu0 %4026 }
 0x480   :  { %v4032_v19 = vsel %vm113_vm0, %v4025_v10, %v4027_v0 }
 0x481   :  { %v4029_v54 = vpop.permute.xlu1 %4028 }
 0x482   :  { %v4033_v25 = vsel %vm113_vm0, %v4027_v0, %v4029_v54 }
 0x483   :  { %4302 = vmatprep.mubr.bf16.mxu1 %v4033_v25 }
 0x484   :  { %4303 = vmatmul.mubr.bf16.vlgmr.msra.gmra.mrb[16].mxu1 %v4032_v19  ;;  %v4014_v19 = vld [vmem:[%s9181_s6] sm:$0x1] }
 0x485   :  { %4409 = vmatpush1.bf16.msra.mxu1 %v8723_v22  ;;  %4440 = vmatprep.mubr.bf16.mxu1 %v9659_v62 }
 0x4ec   :  { %v2392_v48 = vpop.f32.mrb[12].mxu0  ;;  %v2433_v60 = vpop.f32.mrb[12].mxu1 }
 0x4ed   :  { %v2393_v42 = vadd.f32 %v2392_v48, %v2324_v11  ;;  %v2434_v58 = vadd.f32 %v2433_v60, %v2332_v3  ;;  %v2394_v37 = vpop.f32.mrb[13].mxu0  ;;  %v2435_v22 = vpop.f32.mrb[13].mxu1 }
 0x4ee   :  { %v2395_v6 = vadd.f32 %v2394_v37, %v2328_v43  ;;  %v2436_v57 = vadd.f32 %v2435_v22, %v2336_v39  ;;  %v2396_v41 = vpop.f32.mrb[14].mxu0  ;;  %v2437_v24 = vpop.f32.mrb[14].mxu1 }
 0x4ef   :  { %v5124_v47 = vmul.f32 -1.442695, %v2393_v42  ;;  %v5126_v50 = vmul.f32 -1.442695, %v2434_v58  ;;  %v2397_v23 = vpop.f32.mrb[15].mxu0  ;;  %v2438_v12 = vpop.f32.mrb[15].mxu1 }
 0x4f0   :  { %v5125_v14 = vmul.f32 -1.442695, %v2395_v6  ;;  %v5127_v52 = vmul.f32 -1.442695, %v2436_v57  ;;  %v5546_v6 = vld [vmem:[#allocation12 + $0x40] sm:$0xff]   ;;  %v5548_v41 = vld [vmem:[#allocation12 + $0x48] sm:$0xff]  }
 0x4f1   :  { %5766 = vpow2.f32 %v5124_v47  ;;  %v5547_v57 = vld [vmem:[#allocation12] sm:$0xff]   ;;  %5309 = vmatprep.subr.bf16.mxu0 %v5546_v6  ;;  %v5549_v23 = vld [vmem:[#allocation12 + $0x8] sm:$0xff]   ;;  %v5552_v12 = vld [vmem:[#allocation12 + $0x50] sm:$0xff]  }
 0x4f2   :  { %5768 = vpow2.f32 %v5126_v50  ;;  %v5550_v24 = vld [vmem:[#allocation12 + $0xc0] sm:$0xff]   ;;  %v5554_v50 = vld [vmem:[#allocation12 + $0xc8] sm:$0xff]  }
 0x4f3   :  { %5770 = vpow2.f32 %v5125_v14  ;;  %v5551_v47 = vld [vmem:[#allocation12 + $0x80] sm:$0xff]   ;;  %5337 = vmatprep.subr.bf16.mxu1 %v5550_v24  ;;  %v5555_v14 = vld [vmem:[#allocation12 + $0x88] sm:$0xff]   ;;  %v5563_v24 = vld [vmem:[#allocation12 + $0x98] sm:$0xff]  }
 0x4f4   :  { %5772 = vpow2.f32 %v5127_v52  ;;  %v5558_v52 = vld [vmem:[#allocation12 + $0xd0] sm:$0xff]   ;;  %v5561_v6 = vld [vmem:[#allocation12 + $0x20] sm:$0xff]  }
 0x4fb   :  { %v5767_v51 = vpop.eup %5766 }
 0x4fc   :  { %v5769_v44 = vpop.eup %5768  ;;  %v2452_v13 = vadd.f32 1.0, %v5767_v51  ;;  %v5553_v51 = vld [vmem:[#allocation12 + $0x10] sm:$0xff]  }
 0x4fd   :  { %v5771_v40 = vpop.eup %5770  ;;  %v2454_v36 = vadd.f32 1.0, %v5769_v44  ;;  %v5556_v44 = vld [vmem:[#allocation12 + $0x58] sm:$0xff]  }
 0x4fe   :  { %v5773_v7 = vpop.eup %5772  ;;  %5774 = vrcp.f32 %v2452_v13  ;;  %v2453_v30 = vadd.f32 1.0, %v5771_v40  ;;  %v5559_v13 = vld [vmem:[#allocation12 + $0x90] sm:$0xff]   ;;  %v5557_v40 = vld [vmem:[#allocation12 + $0x18] sm:$0xff]  }
 0x4ff   :  { %5776 = vrcp.f32 %v2454_v36  ;;  %v2455_v4 = vadd.f32 1.0, %v5773_v7  ;;  %v4320_v36 = vld [vmem:[%s9183_s8] sm:$0xf] }
 0x500   :  { %5778 = vrcp.f32 %v2453_v30  ;;  %v4335_v7 = vrot.slane %v4320_v36, %v9582_v56  ;;  %v4343_v30 = vrot.slane %v4320_v36, %v9584_v8 }
 0x501   :  { %5780 = vrcp.f32 %v2455_v4  ;;  %v4339_v4 = vrot.slane %v4320_v36, %v9630_v20 }
 0x508   :  { %v5775_v15 = vpop.eup %5774 }
 0x509   :  { %v5777_v53 = vpop.eup %5776  ;;  %v2467_v2 = vrot.slane %v5775_v15, %v9582_v56  ;;  %v4347_v15 = vrot.slane %v4320_v36, %v9638_v33  ;;  %v9664_v36 = vld [vmem:[#allocation51_spill] sm:$0xff] }
 0x50a   :  { %v5779_v34 = vpop.eup %5778  ;;  %v2475_v61 = vrot.slane %v5777_v53, %v9582_v56 }
 0x50b   :  { %2484 = vrot.lane.b32.xlu0 %v2467_v2, %s5971_s1  ;;  %v2471_v28 = vrot.slane %v5779_v34, %v9582_v56  ;;  %v5781_v21 = vpop.eup %5780 }
 0x50c   :  { %v2479_v45 = vrot.slane %v5781_v21, %v9582_v56 }
 0x50d   :  { %2486 = vrot.lane.b32.xlu1 %v2471_v28, %s5971_s1 }
 0x50f   :  { %2488 = vrot.lane.b32.xlu0 %v2475_v61, %s5971_s1 }
 0x511   :  { %2490 = vrot.lane.b32.xlu1 %v2479_v45, %s5971_s1 }
 0x54b   :  { %v5281_v10 = vpop.f32.mrb[16].mxu0 }
 0x54c   :  { %v5282_v59 = vpop.f32.mrb[17].mxu0 }
 0x54d   :  { %v5283_v49 = vadd.f32 %v5282_v59, %v5281_v10  ;;  %v5284_v62 = vpop.f32.mrb[18].mxu0 }
 0x54e   :  { %v5285_v0 = vpop.f32.mrb[19].mxu0 }
 0x54f   :  { %v4265_v9 = vadd.f32 %v5283_v49, %v4014_v19 }
 0x557   :  { %v5303_v54 = vpop.f32.mrb[16].mxu1 }
 0x558   :  { %v5304_v25 = vpop.f32.mrb[17].mxu1 }
 0x559   :  { %v5305_v11 = vadd.f32 %v5304_v25, %v5303_v54  ;;  %v5306_v3 = vpop.f32.mrb[18].mxu1 }
 0x55a   :  { %v5307_v43 = vpop.f32.mrb[19].mxu1 }
 0x55b   :  { %v4305_v39 = vadd.f32 %v5305_v11, %v4265_v9 }
 0x55d   :  { %v5175_v48 = vmul.f32 -1.442695, %v4305_v39 }
 0x55f   :  { %5782 = vpow2.f32 %v5175_v48 }
 0x569   :  { %v5783_v60 = vpop.eup %5782 }
 0x56a   :  { %v4313_v42 = vadd.f32 1.0, %v5783_v60 }
 0x56c   :  { %5784 = vrcp.f32 %v4313_v42 }
 0x576   :  { %v5785_v58 = vpop.eup %5784 }
 0x577   :  { %v4316_v37 = vmul.f32 %v5785_v58, %v4305_v39 }
 0x579   :  { %v4317_v22 = vpack.c.bf16 %v4316_v37, %v4316_v37 }
 0x57b   :  { %5181 = vmatmul.mubr.msk.bf16.vlgmr.msra.gmra.mrb[20].mxu0 %vm2341_vm9, %v4317_v22  ;;  %5183 = vmatmul.mubr.msk.bf16.vlgmr.msra.gmra.mrb[20].mxu1 %vm2341_vm9, %v4317_v22  ;;  %v5560_v22 = vld [vmem:[#allocation12 + $0x60] sm:$0xff]  }
 0x57c   :  { %5310 = vmatpush3.bf16.msra.mxu0 %v5547_v57  ;;  %5338 = vmatpush3.bf16.msra.mxu1 %v5551_v47  ;;  %v5562_v57 = vld [vmem:[#allocation12 + $0xd8] sm:$0xff]  }
 0x57d   :  { %5311 = vmatprep.subr.bf16.mxu0 %v5548_v41  ;;  %5339 = vmatprep.subr.bf16.mxu1 %v5554_v50  ;;  %v2485_v20 = vpop.permute.xlu0 %2484  ;;  %v9660_v50 = vld [vmem:[#allocation46_spill] sm:$0xff] }
 0x57f   :  { %v2487_v60 = vpop.permute.xlu1 %2486 }
 0x580   :  { %5312 = vmatpush3.bf16.msra.mxu0 %v5549_v23  ;;  %5340 = vmatpush3.bf16.msra.mxu1 %v5555_v14  ;;  %v2492_v41 = vsel %vm626_vm4, %v2485_v20, %v2487_v60 }
 0x581   :  { %5313 = vmatprep.subr.bf16.mxu0 %v5552_v12  ;;  %5341 = vmatprep.subr.bf16.mxu1 %v5558_v52  ;;  %v2489_v58 = vpop.permute.xlu0 %2488  ;;  %v9661_v12 = vld [vmem:[#allocation54_spill] sm:$0xff]  ;;  %v9662_v52 = vld [vmem:[#allocation33_spill] sm:$0xff] }
 0x582   :  { %v2493_v37 = vsel %vm626_vm4, %v2487_v60, %v2489_v58 }
 0x583   :  { %v2491_v47 = vpop.permute.xlu1 %2490  ;;  %v2502_v23 = vmul.f32 %v2493_v37, %v9660_v50  ;;  %v9065_v14 = vmul.f32 %v2493_v37, %v9661_v12 }
 0x584   :  { %5314 = vmatpush3.bf16.msra.mxu0 %v5553_v51  ;;  %5342 = vmatpush3.bf16.msra.mxu1 %v5559_v13  ;;  %v2501_v51 = vmul.f32 %v2492_v41, %v9662_v52  ;;  %v9663_v13 = vld [vmem:[#allocation32_spill] sm:$0xff]  ;;  %v9673_v52 = vld [vmem:[#allocation59_spill] sm:$0xff] }
 0x585   :  { %5315 = vmatprep.subr.bf16.mxu0 %v5556_v44  ;;  %5343 = vmatprep.subr.bf16.mxu1 %v5562_v57 }
 0x588   :  { %5316 = vmatpush3.bf16.msra.mxu0 %v5557_v40  ;;  %5344 = vmatpush3.bf16.msra.mxu1 %v5563_v24  ;;  %v9069_v40 = vmul.f32 %v2492_v41, %v9663_v13 }
 0x589   :  { %5317 = vmatprep.subr.bf16.mxu0 %v5560_v22 }
 0x58c   :  { %5318 = vmatpush3.bf16.msra.mxu0 %v5561_v6  ;;  %v9672_v6 = vld [vmem:[#allocation44_spill] sm:$0xff] }
 0x58d   :  { %v2509_v57 = vmul.f32 %v2491_v47, %v9672_v6 }
 0x64e   :  { %v4401_v53 = vpop.f32.mrb[20].mxu0  ;;  %v4442_v2 = vpop.f32.mrb[20].mxu1 }
 0x64f   :  { %v4402_v34 = vadd.f32 %v4401_v53, %v4335_v7  ;;  %v4443_v28 = vadd.f32 %v4442_v2, %v4343_v30  ;;  %v4403_v21 = vpop.f32.mrb[21].mxu0  ;;  %v4444_v61 = vpop.f32.mrb[21].mxu1  ;;  %v2512_v7 = vmul.f32 %v2493_v37, %v9664_v36  ;;  %v2494_v30 = vsel %vm626_vm4, %v2489_v58, %v2491_v47  ;;  %v5566_v53 = vld [vmem:[#allocation12 + $0xe0] sm:$0xff]   ;;  %v9671_v37 = vld [vmem:[#allocation41_spill] sm:$0xff] }
 0x650   :  { %v4404_v45 = vadd.f32 %v4403_v21, %v4339_v4  ;;  %v4445_v10 = vadd.f32 %v4444_v61, %v4347_v15  ;;  %v4405_v59 = vpop.f32.mrb[22].mxu0  ;;  %v4446_v49 = vpop.f32.mrb[22].mxu1  ;;  %v5564_v4 = vld [vmem:[#allocation12 + $0x68] sm:$0xff]   ;;  %v9666_v21 = vld [vmem:[#allocation28_spill] sm:$0xff]  ;;  %5345 = vmatprep.subr.bf16.mxu1 %v5566_v53  ;;  %v2504_v22 = vmul.f32 %v2491_v47, %v9671_v37  ;;  %v5573_v53 = vld [vmem:[#allocation12 + $0x38] sm:$0xff]  }
 0x651   :  { %v5184_v62 = vmul.f32 -1.442695, %v4402_v34  ;;  %v5186_v0 = vmul.f32 -1.442695, %v4443_v28  ;;  %v4406_v19 = vpop.f32.mrb[23].mxu0  ;;  %v4447_v54 = vpop.f32.mrb[23].mxu1  ;;  %v2505_v61 = vmul.f32 %v2485_v20, %v9666_v21  ;;  %5319 = vmatprep.subr.bf16.mxu0 %v5564_v4 }
 0x652   :  { %v5185_v25 = vmul.f32 -1.442695, %v4404_v45  ;;  %v5187_v8 = vmul.f32 -1.442695, %v4445_v10  ;;  %v5565_v15 = vld [vmem:[#allocation12 + $0x28] sm:$0xff]   ;;  %v9665_v34 = vld [vmem:[#allocation29_spill] sm:$0xff] }
 0x653   :  { %5786 = vpow2.f32 %v5184_v62  ;;  %v2500_v28 = vmul.f32 %v2485_v20, %v9665_v34  ;;  %v9667_v45 = vld [vmem:[#allocation30_spill] sm:$0xff]  ;;  %v2536_v54 = vrot.slane %v2502_v23, 7  ;;  %5320 = vmatpush3.bf16.msra.mxu0 %v5565_v15  ;;  %v2549_v58 = vrot.slane %v2512_v7, 7  ;;  %v5572_v15 = vld [vmem:[#allocation12 + $0x78] sm:$0xff]   ;;  %v5574_v34 = vld [vmem:[#allocation12 + $0xf0] sm:$0xff]  }
 0x654   :  { %5788 = vpow2.f32 %v5186_v0  ;;  %v2510_v10 = vmul.f32 %v2485_v20, %v9667_v45  ;;  %v5567_v49 = vld [vmem:[#allocation12 + $0xa0] sm:$0xff]   ;;  %v9668_v0 = vld [vmem:[#allocation31_spill] sm:$0xff]  ;;  %v2531_v50 = vrot.slane %v2505_v61, 7 }
 0x655   :  { %5790 = vpow2.f32 %v5185_v25  ;;  %v2511_v19 = vmul.f32 %v2492_v41, %v9668_v0  ;;  %v2537_v25 = vrot.slane %v9065_v14, 7  ;;  %5346 = vmatpush3.bf16.msra.mxu1 %v5567_v49  ;;  %v5571_v41 = vld [vmem:[#allocation12 + $0xa8] sm:$0xff]   ;;  %v2530_v24 = vrot.slane %v2500_v28, 7  ;;  %v5576_v0 = vld [vmem:[#allocation12 + $0xf8] sm:$0xff]  }
 0x656   :  { %5792 = vpow2.f32 %v5187_v8  ;;  %v2533_v8 = vrot.slane %v2501_v51, 7  ;;  %v2545_v23 = vrot.slane %v2510_v10, 7  ;;  %v2513_v51 = vmul.f32 %v2494_v30, %v9673_v52 }
 0x657   :  { %v2547_v14 = vrot.slane %v2511_v19, 7  ;;  %v2543_v28 = vrot.slane %v2509_v57, 7  ;;  %v2532_v45 = vsel %vm1857_vm6, %v2530_v24, %v2531_v50 }
 0x658   :  { %v2551_v10 = vrot.slane %v2513_v51, 7  ;;  %v2546_v49 = vsel %vm1857_vm6, %v2531_v50, %v2545_v23 }
 0x65d   :  { %v5787_v33 = vpop.eup %5786 }
 0x65e   :  { %v5789_v9 = vpop.eup %5788  ;;  %v4461_v11 = vadd.f32 1.0, %v5787_v33  ;;  %v9669_v33 = vld [vmem:[#allocation57_spill] sm:$0xff] }
 0x65f   :  { %v5791_v3 = vpop.eup %5790  ;;  %v4463_v43 = vadd.f32 1.0, %v5789_v9  ;;  %v2503_v9 = vmul.f32 %v2494_v30, %v9669_v33 }
 0x660   :  { %v5793_v39 = vpop.eup %5792  ;;  %5794 = vrcp.f32 %v4461_v11  ;;  %v4462_v48 = vadd.f32 1.0, %v5791_v3  ;;  %v9670_v11 = vld [vmem:[#allocation56_spill] sm:$0xff] }
 0x661   :  { %5796 = vrcp.f32 %v4463_v43  ;;  %v4464_v42 = vadd.f32 1.0, %v5793_v39  ;;  %v2508_v3 = vmul.f32 %v2494_v30, %v9670_v11  ;;  %v5568_v43 = vld [vmem:[#allocation12 + $0x70] sm:$0xff]   ;;  %v2539_v36 = vrot.slane %v2503_v9, 7 }
 0x662   :  { %5798 = vrcp.f32 %v4462_v48  ;;  %v5569_v39 = vld [vmem:[#allocation12 + $0x30] sm:$0xff]   ;;  %v5570_v48 = vld [vmem:[#allocation12 + $0xe8] sm:$0xff]   ;;  %5321 = vmatprep.subr.bf16.mxu0 %v5568_v43  ;;  %v2550_v30 = vsel %vm1857_vm6, %v2537_v25, %v2549_v58 }
 0x663   :  { %5800 = vrcp.f32 %v4464_v42  ;;  %v2534_v42 = vrot.slane %v9069_v40, 7  ;;  %v2538_v40 = vsel %vm1857_vm6, %v2536_v54, %v2537_v25  ;;  %5347 = vmatprep.subr.bf16.mxu1 %v5570_v48  ;;  %v2540_v7 = vrot.slane %v2508_v3, 7  ;;  %5322 = vmatpush3.bf16.msra.mxu0 %v5569_v39  ;;  %v5577_v25 = vld [vmem:[#allocation12 + $0xb8] sm:$0xff]  }
 0x664   :  { %5348 = vmatpush3.bf16.msra.mxu1 %v5571_v41  ;;  %5323 = vmatprep.subr.bf16.mxu0 %v5572_v15 }
 0x665   :  { %v2535_v21 = vsel %vm1857_vm6, %v2533_v8, %v2534_v42  ;;  %5349 = vmatprep.subr.bf16.mxu1 %v5574_v34  ;;  %v2541_v19 = vsel %vm1857_vm6, %v2539_v36, %v2540_v7  ;;  %v5390_v8 = vpack.i.bf16 %v2546_v49, %v2532_v45  ;;  %v2552_v33 = vsel %vm1857_vm6, %v2540_v7, %v2551_v10 }
 0x666   :  { %v5380_v61 = vpack.i.bf16 %v2538_v40, %v2535_v21 }
 0x667   :  { %5324 = vmatpush3.bf16.msra.mxu0 %v5573_v53 }
 0x66a   :  { %v5795_v44 = vpop.eup %5794 }
 0x66b   :  { %v5797_v2 = vpop.eup %5796  ;;  %v4476_v59 = vrot.slane %v5795_v44, %v9582_v56  ;;  %v9674_v44 = vld [vmem:[#allocation48_spill] sm:$0xff] }
 0x66c   :  { %v5799_v62 = vpop.eup %5798  ;;  %v4484_v12 = vrot.slane %v5797_v2, %v9582_v56  ;;  %v2514_v13 = vmul.f32 %v2491_v47, %v9674_v44  ;;  %v2542_v2 = vrot.slane %v2504_v22, 7  ;;  %v5575_v47 = vld [vmem:[#allocation12 + $0xb0] sm:$0xff]  }
 0x66d   :  { %4493 = vrot.lane.b32.xlu0 %v4476_v59, %s5971_s1  ;;  %v4480_v20 = vrot.slane %v5799_v62, %v9582_v56  ;;  %v5801_v60 = vpop.eup %5800  ;;  %v2548_v59 = vsel %vm1857_vm6, %v2534_v42, %v2547_v14  ;;  %5350 = vmatpush3.bf16.msra.mxu1 %v5575_v47 }
 0x66e   :  { %v4488_v4 = vrot.slane %v5801_v60, %v9582_v56  ;;  %v2553_v56 = vrot.slane %v2514_v13, 7  ;;  %v5385_v62 = vpack.i.bf16 %v2550_v30, %v2548_v59  ;;  %v2544_v54 = vsel %vm1857_vm6, %v2542_v2, %v2543_v28  ;;  %5351 = vmatprep.subr.bf16.mxu1 %v5576_v0 }
 0x66f   :  { %4495 = vrot.lane.b32.xlu1 %v4480_v20, %s5971_s1  ;;  %v5395_v11 = vpack.i.bf16 %v2544_v54, %v2541_v19 }
 0x670   :  { %v2554_v9 = vsel %vm1857_vm6, %v2543_v28, %v2553_v56 }
 0x671   :  { %4497 = vrot.lane.b32.xlu0 %v4484_v12, %s5971_s1  ;;  %5352 = vmatpush3.bf16.msra.mxu1 %v5577_v25  ;;  %v5400_v3 = vpack.i.bf16 %v2554_v9, %v2552_v33 }
 0x673   :  { %4499 = vrot.lane.b32.xlu1 %v4488_v4, %s5971_s1 }
 0x675   :  { %5381 = vrot.lane.b32.xlu0 %v5380_v61, %s5965_s23 }
 0x677   :  { %5386 = vrot.lane.b32.xlu1 %v5385_v62, %s5965_s23 }
 0x679   :  { %5391 = vrot.lane.b32.xlu0 %v5390_v8, %s5965_s23 }
 0x67b   :  { %5396 = vrot.lane.b32.xlu1 %v5395_v11, %s5965_s23 }
 0x67d   :  { %5401 = vrot.lane.b32.xlu0 %v5400_v3, %s5965_s23 }
 0x6df   :  { %v4494_v20 = vpop.permute.xlu0 %4493 }
 0x6e0   :  { %v4509_v43 = vmul.f32 %v4494_v20, %v8849_v38  ;;  %v4514_v39 = vmul.f32 %v4494_v20, %v8852_v1  ;;  %v4519_v48 = vmul.f32 %v4494_v20, %v8855_v17 }
 0x6e1   :  { %v4496_v60 = vpop.permute.xlu1 %4495 }
 0x6e2   :  { %v4539_v42 = vrot.slane %v4509_v43, 7  ;;  %v4540_v58 = vrot.slane %v4514_v39, 7  ;;  %v4554_v37 = vrot.slane %v4519_v48, 7  ;;  %v4501_v22 = vsel %vm626_vm4, %v4494_v20, %v4496_v60 }
 0x6e3   :  { %v4510_v6 = vmul.f32 %v4501_v22, %v8865_v31  ;;  %v4515_v57 = vmul.f32 %v4501_v22, %v8868_v27  ;;  %v4520_v41 = vmul.f32 %v4501_v22, %v8871_v32  ;;  %v4498_v24 = vpop.permute.xlu0 %4497 }
 0x6e4   :  { %v4502_v50 = vsel %vm626_vm4, %v4496_v60, %v4498_v24  ;;  %v4541_v38 = vsel %vm1857_vm6, %v4539_v42, %v4540_v58  ;;  %v4555_v1 = vsel %vm1857_vm6, %v4540_v58, %v4554_v37 }
 0x6e5   :  { %v4542_v17 = vrot.slane %v4510_v6, 7  ;;  %v4543_v23 = vrot.slane %v4515_v57, 7  ;;  %v4556_v12 = vrot.slane %v4520_v41, 7  ;;  %v4511_v14 = vmul.f32 %v4502_v50, %v8876_v16  ;;  %v4500_v52 = vpop.permute.xlu1 %4499 }
 0x6e6   :  { %v4516_v51 = vmul.f32 %v4502_v50, %v8880_v35  ;;  %v4521_v31 = vmul.f32 %v4502_v50, %v8887_v63  ;;  %v4503_v27 = vsel %vm626_vm4, %v4498_v24, %v4500_v52  ;;  %v4513_v32 = vmul.f32 %v4500_v52, %v8895_v29 }
 0x6e7   :  { %v4545_v44 = vrot.slane %v4511_v14, 7  ;;  %v4512_v13 = vmul.f32 %v4503_v27, %v8892_v55  ;;  %v4517_v40 = vmul.f32 %v4503_v27, %v8898_v26  ;;  %v4518_v36 = vmul.f32 %v4500_v52, %v8901_v5  ;;  %v5382_v7 = vpop.permute.xlu0 %5381 }
 0x6e8   :  { %v4546_v4 = vrot.slane %v4516_v51, 7  ;;  %v4558_v15 = vrot.slane %v4521_v31, 7  ;;  %v4522_v16 = vmul.f32 %v4503_v27, %v8913_v18  ;;  %v4523_v35 = vmul.f32 %v4500_v52, %v8916_v46 }
 0x6e9   :  { %v4548_v53 = vrot.slane %v4512_v13, 7  ;;  %v4549_v63 = vrot.slane %v4517_v40, 7  ;;  %v4551_v34 = vrot.slane %v4513_v32, 7  ;;  %v4552_v2 = vrot.slane %v4518_v36, 7  ;;  %v5387_v28 = vpop.permute.xlu1 %5386 }
 0x6ea   :  { %v4560_v29 = vrot.slane %v4522_v16, 7  ;;  %v4562_v21 = vrot.slane %v4523_v35, 7  ;;  %v5384_v30 = vunpack.i.h.bf16 %v5382_v7  ;;  %v5383_v55 = vunpack.i.l.bf16 %v5382_v7 }
 0x6eb   :  { %v5405_v47 = vpack.i.bf16 %v4555_v1, %v4541_v38  ;;  %v5389_v26 = vunpack.i.h.bf16 %v5387_v28  ;;  %v5388_v61 = vunpack.i.l.bf16 %v5387_v28  ;;  %v5392_v5 = vpop.permute.xlu0 %5391  ;;  %v4557_v45 = vsel %vm1857_vm6, %v4543_v23, %v4556_v12 }
 0x6ec   :  { %v5394_v10 = vunpack.i.h.bf16 %v5392_v5  ;;  %v5393_v56 = vunpack.i.l.bf16 %v5392_v5  ;;  %v4559_v18 = vsel %vm1857_vm6, %v4546_v4, %v4558_v15  ;;  %v4544_v46 = vsel %vm1857_vm6, %v4542_v17, %v4543_v23  ;;  %v5188_v5 = vld [vmem:[%s9185_s10] ss:$0 sm:$0xff]  ;;  %s5972_s10 = smov [#allocation13]  }
 0x6ed   :  { %5406 = vrot.lane.b32.xlu1 %v5405_v47, %s5965_s23  ;;  %v5415_v59 = vpack.i.bf16 %v4559_v18, %v4557_v45  ;;  %v4547_v49 = vsel %vm1857_vm6, %v4545_v44, %v4546_v4  ;;  %v5397_v62 = vpop.permute.xlu1 %5396  ;;  %v2576_v0 = vsel %vm113_vm0, %v5383_v55, %v5384_v30  ;;  %v2580_v19 = vsel %vm113_vm0, %v5388_v61, %v5389_v26  ;;  %s5006_s1 = sshll.u32 %s5972_s10, 4  ;;  %s5007_s1 = int_to_ptr.vmem [resolvable:$true] %s5006_s1 }
 0x6ee   :  { %v2575_v54 = vsel %vm113_vm0, %v5393_v56, %v5383_v55  ;;  %v2579_v25 = vsel %vm113_vm0, %v5394_v10, %v5388_v61  ;;  %v5410_v8 = vpack.i.bf16 %v4547_v49, %v4544_v46  ;;  %v5399_v33 = vunpack.i.h.bf16 %v5397_v62  ;;  %s5928_s17 = scalar_lea.vmem %s5007_s1, 512  ;;  %p5933_p13 = scmp.lt.s32.totalorder %s5007_s1, %s5007_s1 }
 0x6ef   :  { %v4624_v9 = vpack.c.bf16 %v2579_v25, %v2575_v54  ;;  %5416 = vrot.lane.b32.xlu0 %v5415_v59, %s5965_s23  ;;  %v5398_v11 = vunpack.i.l.bf16 %v5397_v62  ;;  %v4625_v3 = vpack.c.bf16 %v2580_v19, %v2576_v0  ;;  %v5402_v20 = vpop.permute.xlu0 %5401  ;;  %v4561_v43 = vsel %vm1857_vm6, %v4549_v63, %v4560_v29  ;;  %v5814_v25 = vld [vmem:[#allocation4] sm:$0xff]  ;;  %p5929_p12 = scmp.ne.s32.totalorder %s5007_s1, %s5928_s17  ;;  %p5934_p0 = scmp.lt.s32.totalorder %s5928_s17, %s5928_s17 }
 0x6f0   :  { %v5404_v39 = vunpack.i.h.bf16 %v5402_v20  ;;  %v5403_v48 = vunpack.i.l.bf16 %v5402_v20  ;;  %v4563_v60 = vsel %vm1857_vm6, %v4552_v2, %v4562_v21  ;;  %v4550_v42 = vsel %vm1857_vm6, %v4548_v53, %v4549_v63 }
 0x6f1   :  { %5411 = vrot.lane.b32.xlu1 %v5410_v8, %s5965_s23  ;;  %v2577_v58 = vsel %vm113_vm0, %v5384_v30, %v5398_v11  ;;  %4927 = vmatprep.mubr.bf16.mxu0 %v4625_v3  ;;  %v4553_v37 = vsel %vm1857_vm6, %v4551_v34, %v4552_v2  ;;  %v2578_v57 = vsel %vm113_vm0, %v5398_v11, %v5399_v33  ;;  %p5935_p1 = por %p5934_p0, %p5933_p13 }
 0x6f2   :  { %v2581_v22 = vsel %vm113_vm0, %v5389_v26, %v5403_v48  ;;  %v5420_v6 = vpack.i.bf16 %v4553_v37, %v4550_v42  ;;  %4928 = vmatmul.mubr.bf16.vlgmr.msra.gmra.mrb[24].mxu0 %v4624_v9  ;;  %v2582_v41 = vsel %vm113_vm0, %v5403_v48, %v5404_v39  ;;  %v5425_v50 = vpack.i.bf16 %v4563_v60, %v4561_v43  ;;  %v5815_v9 = vld [vmem:[#allocation4 + $0x8] sm:$0xff] }
 0x6f3   :  { %v4626_v24 = vpack.c.bf16 %v2581_v22, %v2577_v58  ;;  %v4627_v38 = vpack.c.bf16 %v2582_v41, %v2578_v57  ;;  %p5936_p2 = pnand %p5935_p1, %p5929_p12 }
 0x6f4   :  { %5421 = vrot.lane.b32.xlu0 %v5420_v6, %s5965_s23 }
 0x6f5   :  { %5426 = vrot.lane.b32.xlu1 %v5425_v50, %s5965_s23  ;;  %4976 = vmatprep.mubr.bf16.mxu1 %v4627_v38  ;;  %v5816_v38 = vld [vmem:[#allocation4 + $0x10] sm:$0xff] }
 0x6f6   :  { %4977 = vmatmul.mubr.bf16.vlgmr.msra.gmra.mrb[24].mxu1 %v4626_v24 }
 0x75f   :  { %v5407_v1 = vpop.permute.xlu1 %5406 }
 0x760   :  { %v5409_v23 = vunpack.i.h.bf16 %v5407_v1  ;;  %v5408_v52 = vunpack.i.l.bf16 %v5407_v1 }
 0x761   :  { %v5417_v17 = vpop.permute.xlu0 %5416 }
 0x762   :  { %v5419_v12 = vunpack.i.h.bf16 %v5417_v17  ;;  %v5418_v14 = vunpack.i.l.bf16 %v5417_v17 }
 0x763   :  { %v5412_v51 = vpop.permute.xlu1 %5411 }
 0x764   :  { %v5414_v31 = vunpack.i.h.bf16 %v5412_v51  ;;  %v5413_v27 = vunpack.i.l.bf16 %v5412_v51  ;;  %v4589_v32 = vsel %vm113_vm0, %v5418_v14, %v5419_v12  ;;  %v4588_v44 = vsel %vm113_vm0, %v5409_v23, %v5418_v14  ;;  %v5817_v23 = vld [vmem:[#allocation4 + $0x18] sm:$0xff] }
 0x766   :  { %v5422_v13 = vpop.permute.xlu0 %5421  ;;  %v4585_v40 = vsel %vm113_vm0, %v5413_v27, %v5414_v31  ;;  %v4584_v36 = vsel %vm113_vm0, %v5408_v52, %v5413_v27 }
 0x767   :  { %v5424_v7 = vunpack.i.h.bf16 %v5422_v13  ;;  %v5423_v4 = vunpack.i.l.bf16 %v5422_v13  ;;  %v5427_v15 = vpop.permute.xlu1 %5426  ;;  %v4629_v16 = vpack.c.bf16 %v4589_v32, %v4585_v40  ;;  %v4628_v35 = vpack.c.bf16 %v4588_v44, %v4584_v36 }
 0x768   :  { %v5429_v53 = vunpack.i.h.bf16 %v5427_v15  ;;  %v5428_v63 = vunpack.i.l.bf16 %v5427_v15 }
 0x769   :  { %4935 = vmatprep.mubr.bf16.mxu0 %v4629_v16  ;;  %v4587_v34 = vsel %vm113_vm0, %v5423_v4, %v5424_v7  ;;  %v4586_v2 = vsel %vm113_vm0, %v5414_v31, %v5423_v4 }
 0x76a   :  { %4936 = vmatmul.mubr.bf16.gmra.mrb[28].mxu0 %v4628_v35  ;;  %v4591_v28 = vsel %vm113_vm0, %v5428_v63, %v5429_v53  ;;  %v4590_v29 = vsel %vm113_vm0, %v5419_v12, %v5428_v63 }
 0x76b   :  { %v4631_v21 = vpack.c.bf16 %v4591_v28, %v4587_v34  ;;  %v4630_v30 = vpack.c.bf16 %v4590_v29, %v4586_v2 }
 0x76d   :  { %4984 = vmatprep.mubr.bf16.mxu1 %v4631_v21 }
 0x76e   :  { %4985 = vmatmul.mubr.bf16.gmra.mrb[28].mxu1 %v4630_v30 }
 0x7c5   :  { %v5325_v55 = vpop.f32.mrb[24].mxu0 }
 0x7c6   :  { %v5326_v47 = vpop.f32.mrb[25].mxu0 }
 0x7c7   :  { %v5327_v26 = vadd.f32 %v5326_v47, %v5325_v55  ;;  %v5328_v61 = vpop.f32.mrb[26].mxu0 }
 0x7c8   :  { %v5329_v45 = vpop.f32.mrb[27].mxu0 }
 0x7c9   :  { %v5330_v10 = vadd.f32 %v5329_v45, %v5328_v61  ;;  %v5353_v56 = vpop.f32.mrb[24].mxu1  ;;  %v4930_v46 = vadd.f32 %v5327_v26, %v5188_v5 }
 0x7ca   :  { %v5354_v18 = vpop.f32.mrb[25].mxu1 }
 0x7cb   :  { %v5355_v59 = vadd.f32 %v5354_v18, %v5353_v56  ;;  %v5356_v49 = vpop.f32.mrb[26].mxu1  ;;  %v4933_v0 = vadd.f32 %v5330_v10, %v5188_v5 }
 0x7cc   :  { %v5357_v62 = vpop.f32.mrb[27].mxu1 }
 0x7cd   :  { %v4979_v19 = vadd.f32 %v5355_v59, %v4930_v46  ;;  %v5358_v54 = vadd.f32 %v5357_v62, %v5356_v49 }
 0x7cf   :  { %v4993_v8 = vadd.f32 %v5814_v25, %v4979_v19  ;;  %v4982_v33 = vadd.f32 %v5358_v54, %v4933_v0 }
 0x7d1   :  { %4997 = vst [vmem:[#allocation13] sm:$0xff] %v4993_v8  ;;  %v4994_v11 = vadd.f32 %v5815_v9, %v4982_v33 }
 0x7d3   :  { %4998 = vst [vmem:[#allocation13 + $0x8] sm:$0xff] %v4994_v11 }
 0x83d   :  { %v5331_v3 = vpop.f32.mrb[28].mxu0 }
 0x83e   :  { %v5332_v20 = vpop.f32.mrb[29].mxu0 }
 0x83f   :  { %v5333_v43 = vadd.f32 %v5332_v20, %v5331_v3  ;;  %v5334_v39 = vpop.f32.mrb[30].mxu0 }
 0x840   :  { %v5335_v48 = vpop.f32.mrb[31].mxu0 }
 0x841   :  { %v5336_v60 = vadd.f32 %v5335_v48, %v5334_v39  ;;  %v5359_v42 = vpop.f32.mrb[28].mxu1  ;;  %v4938_v37 = vadd.f32 %v5333_v43, %v5188_v5 }
 0x842   :  { %v5360_v58 = vpop.f32.mrb[29].mxu1 }
 0x843   :  { %v5361_v22 = vadd.f32 %v5360_v58, %v5359_v42  ;;  %v5362_v6 = vpop.f32.mrb[30].mxu1  ;;  %v4941_v41 = vadd.f32 %v5336_v60, %v5188_v5 }
 0x844   :  { %v5363_v57 = vpop.f32.mrb[31].mxu1 }
 0x845   :  { %v4987_v24 = vadd.f32 %v5361_v22, %v4938_v37  ;;  %v5364_v50 = vadd.f32 %v5363_v57, %v5362_v6 }
 0x847   :  { %v4995_v1 = vadd.f32 %v5816_v38, %v4987_v24  ;;  %v4990_v17 = vadd.f32 %v5364_v50, %v4941_v41 }
 0x849   :  { %4999 = vst [vmem:[#allocation13 + $0x10] sm:$0xff] %v4995_v1  ;;  %v4996_v12 = vadd.f32 %v5817_v23, %v4990_v17 }
 0x84b   :  { %5000 = vst [vmem:[#allocation13 + $0x18] sm:$0xff] %v4996_v12 }
 0x84c   :  { %5939 = shalt.err (!%p5936_p2)
}
 0x84d   :  { %s5940_s16 = scalar_lea.hbm %s9186_s11, 512 }
 0x84e   :  { %p5941_p3 = scmp.ne.s32.totalorder %s9186_s11, %s5940_s16  ;;  %p5944_p4 = scmp.lt.u32.totalorder %s5940_s16, %s9186_s11 }
 0x850   :  { %p5946_p5 = pnand %p5944_p4, %p5941_p3 }
 0x852   :  { %5949 = shalt.err (!%p5946_p5)
}
 0x853   :  { %5012 = dma.vmem_to_hbm [thread:$0]  %s5007_s1, 512, %s9186_s11, [#allocation6], %s5961_s4, %s5961_s4, %s5962_s20  }
 0x854   :  { %5956 = dma.done.wait [#allocation6], 512  }
 0x855   :  { %5957 = vsyncadd [#allocation6], 4294966784 }
 0x856   :  { %5016 = vsyncpa [#allocation5], 1 }
 0x857   :  { %5017 = vsyncpa [#allocation8], 1 }
 0x858   :  { %5018 = vsyncpa [#allocation11], 1 }
 0x859   :  { %5019 = vsyncpa [#allocation6], 1 }

</bundles_post_ra>
